<compile_context>
chip_gen: v6e
topology: v6e:2x2x1
jax: 0.10.0
libtpu: 0.0.40
codegen_flags: <defaults>
</compile_context>

<pallas_src>
import functools

import jax
import jax.numpy as jnp
from jax.experimental import pallas as pl
from jax.experimental.pallas import tpu as pltpu

D_MAX = 5           # MFConv max_degree
N_DEG = D_MAX + 1   # number of degree-specific linear layers


# ----------------------------------------------------------------------------
# Fused Pallas kernel: conv1 -> conv2 -> conv3 -> conv4 -> residual -> MLP head
# ----------------------------------------------------------------------------
def fused_gnn_kernel(adj_ref, x_ref, oh_ref,
                     wl1_ref, wr1_ref, bc1_ref,
                     wl2_ref, wr2_ref, bc2_ref,
                     wl3_ref, wr3_ref, bc3_ref,
                     wl4_ref, wr4_ref, bc4_ref,
                     wh1_ref, bh1_ref, wh2_ref, bh2_ref,
                     out_ref):
    adj = adj_ref[...]      # (N, N)      f32 dense adjacency (dst x src)
    oh = oh_ref[...]        # (N, 6)      f32 one-hot of clamped in-degree
    x = x_ref[...]          # (N, C_pad)  f32 (zero-padded input features)

    def mfconv(x_in, wl_cat, wr_cat, b_cat):
        # neighbor sum-aggregation on the MXU
        h = jnp.dot(adj, x_in, preferred_element_type=jnp.float32)
        # all 6 degree-specific linears in two wide MXU pushes
        z = (jnp.dot(h, wl_cat, preferred_element_type=jnp.float32)
             + jnp.dot(x_in, wr_cat, preferred_element_type=jnp.float32)
             + b_cat)                                    # (N, 6*Cout)
        c_out = wl_cat.shape[1] // N_DEG
        # one-hot degree select (lane-128-aligned static slices of z)
        acc = oh[:, 0:1] * z[:, :c_out]
        for d in range(1, N_DEG):
            acc = acc + oh[:, d:d + 1] * z[:, d * c_out:(d + 1) * c_out]
        return acc

    r1 = mfconv(x, wl1_ref[...], wr1_ref[...], bc1_ref[...])
    r2 = mfconv(r1, wl2_ref[...], wr2_ref[...], bc2_ref[...])
    r3 = mfconv(r2, wl3_ref[...], wr3_ref[...], bc3_ref[...])
    r4 = mfconv(r3, wl4_ref[...], wr4_ref[...], bc4_ref[...])

    res = r4 + r3 + r2
    hh = (jnp.dot(res, wh1_ref[...], preferred_element_type=jnp.float32)
          + bh1_ref[...])
    hh = jnp.maximum(hh, 0.0)
    # TODO(synk): Dropout(p=0.5) is identity (eval mode); train-mode masking
    # would need pltpu.prng_seed / prng_random_bits.
    out_ref[...] = (jnp.dot(hh, wh2_ref[...], preferred_element_type=jnp.float32)
                    + bh2_ref[...])


# ----------------------------------------------------------------------------
# Wrapper glue
# ----------------------------------------------------------------------------
_VMEM = pl.BlockSpec(memory_space=pltpu.MemorySpace.VMEM)


def pack_mfconv(w_lin, b_lin, w_root):
    """(6,Cin,Cout)x2 + (6,1,Cout) -> (Cin,6*Cout)x2 + (1,6*Cout), deg-major cols."""
    nd, cin, cout = w_lin.shape
    wl_cat = jnp.transpose(w_lin, (1, 0, 2)).reshape(cin, nd * cout)
    wr_cat = jnp.transpose(w_root, (1, 0, 2)).reshape(cin, nd * cout)
    b_cat = b_lin.reshape(1, nd * cout)
    return wl_cat, wr_cat, b_cat


@functools.partial(jax.jit, static_argnames=("num_classes",))
def model_forward(params, x, adj, deg, *, num_classes):
    n, c_in = x.shape

    # pad input channels to a sublane-friendly width (29 -> 32); exact (zeros)
    c_pad = max(8, ((c_in + 7) // 8) * 8)
    x_p = jnp.pad(x, ((0, 0), (0, c_pad - c_in)))

    # degree one-hot, clamped in the wrapper so the kernel is safe standalone
    deg_c = jnp.clip(deg.reshape(-1), 0, D_MAX)
    oh = (deg_c[:, None] == jnp.arange(N_DEG, dtype=deg_c.dtype)[None, :]
          ).astype(jnp.float32)

    packed = []
    for name in ("conv1", "conv2", "conv3", "conv4"):
        wl, bl, wr = params[name]
        wlc, wrc, bc = pack_mfconv(wl, bl, wr)
        if name == "conv1":
            wlc = jnp.pad(wlc, ((0, c_pad - c_in), (0, 0)))
            wrc = jnp.pad(wrc, ((0, c_pad - c_in), (0, 0)))
        packed += [wlc, wrc, bc]

    w1, b1 = params["lin1"]
    w2, b2 = params["lin2"]
    # lane-dense output slab: pad num_classes -> multiple of 128, slice after
    out_pad = ((num_classes + 127) // 128) * 128
    w2p = jnp.pad(w2, ((0, 0), (0, out_pad - num_classes)))
    b2p = jnp.pad(b2, ((0, 0), (0, out_pad - num_classes)))

    n_in = 3 + 12 + 4
    out = pl.pallas_call(
        fused_gnn_kernel,
        out_shape=jax.ShapeDtypeStruct((n, out_pad), jnp.float32),
        in_specs=[_VMEM] * n_in,
        out_specs=_VMEM,
        compiler_params=pltpu.CompilerParams(vmem_limit_bytes=64 << 20),
    )(adj, x_p, oh, *packed, w1, b1, w2p, b2p)
    return out[:, :num_classes]


# ----------------------------------------------------------------------------
# Pure-JAX reference (ground truth for correctness check)
# ----------------------------------------------------------------------------
def mfconv_ref(adj, x, deg, w_lin, b_lin, w_root):
    h = adj @ x
    out = jnp.zeros((x.shape[0], w_lin.shape[-1]), jnp.float32)
    for d in range(D_MAX + 1):
        r = h @ w_lin[d] + b_lin[d] + x @ w_root[d]
        out = jnp.where(deg == d, r, out)
    return out


def model_ref(params, x, adj, deg):
    r1 = mfconv_ref(adj, x, deg, *params["conv1"])
    r2 = mfconv_ref(adj, r1, deg, *params["conv2"])
    r3 = mfconv_ref(adj, r2, deg, *params["conv3"])
    r4 = mfconv_ref(adj, r3, deg, *params["conv4"])
    res = r4 + r3 + r2
    w1, b1 = params["lin1"]
    w2, b2 = params["lin2"]
    h = jnp.maximum(res @ w1 + b1, 0.0)
    return h @ w2 + b2


# ----------------------------------------------------------------------------
# Deterministic parameter init + example inputs
# ----------------------------------------------------------------------------
def init_mfconv_params(key, c_in, c_out, scale=0.05):
    k1, k2, k3 = jax.random.split(key, 3)
    w_lin = jax.random.normal(k1, (N_DEG, c_in, c_out), jnp.float32) * scale
    b_lin = jax.random.normal(k2, (N_DEG, 1, c_out), jnp.float32) * scale
    w_root = jax.random.normal(k3, (N_DEG, c_in, c_out), jnp.float32) * scale
    return (w_lin, b_lin, w_root)


def init_linear_params(key, c_in, c_out, scale=0.05):
    k1, k2 = jax.random.split(key, 2)
    w = jax.random.normal(k1, (c_in, c_out), jnp.float32) * scale
    b = jax.random.normal(k2, (1, c_out), jnp.float32) * scale
    return (w, b)


if __name__ == "__main__":
    # Small shapes (synthetic, consistent with the module scaled down):
    # 64 nodes, 29 input features, conv_hidden = cls_hidden = 128, 2 classes,
    # 256 random directed edges.
    N, C_IN, E = 64, 29, 256
    CONV_HIDDEN, CLS_HIDDEN, NUM_CLASSES = 128, 128, 2

    key = jax.random.PRNGKey(0)
    kx, ke, k1, k2, k3, k4, k5, k6 = jax.random.split(key, 8)

    x = jax.random.normal(kx, (N, C_IN), jnp.float32)
    edge_index = jax.random.randint(ke, (2, E), 0, N, jnp.int32)  # (2,E): src,dst

    # Glue: dense adjacency for sum-aggregation and clamped in-degree.
    src, dst = edge_index[0], edge_index[1]
    adj = jnp.zeros((N, N), jnp.float32).at[dst, src].add(1.0)
    deg = jnp.clip(jnp.bincount(dst, length=N), 0, D_MAX
                   ).astype(jnp.int32).reshape(N, 1)

    params = {
        "conv1": init_mfconv_params(k1, C_IN, CONV_HIDDEN),
        "conv2": init_mfconv_params(k2, CONV_HIDDEN, CONV_HIDDEN),
        "conv3": init_mfconv_params(k3, CONV_HIDDEN, CONV_HIDDEN),
        "conv4": init_mfconv_params(k4, CONV_HIDDEN, CONV_HIDDEN),
        "lin1": init_linear_params(k5, CONV_HIDDEN, CLS_HIDDEN),
        "lin2": init_linear_params(k6, CLS_HIDDEN, NUM_CLASSES),
    }

    out = jax.block_until_ready(
        model_forward(params, x, adj, deg, num_classes=NUM_CLASSES))
    ref = jax.block_until_ready(model_ref(params, x, adj, deg))

    assert out.shape == (N, NUM_CLASSES), out.shape
    rel_err = jnp.max(jnp.abs(out - ref)) / (jnp.max(jnp.abs(ref)) + 1e-6)
    assert rel_err < 1e-2, f"relative error too large: {rel_err}"

    print("KERNEL_OK")
</pallas_src>

<mosaic_0001>
module attributes {stable_mosaic.version = 11 : i64} {
  func.func @fused_gnn_kernel(%arg0: memref<64x64xf32, #tpu.memory_space<vmem>>, %arg1: memref<64x32xf32, #tpu.memory_space<vmem>>, %arg2: memref<64x6xf32, #tpu.memory_space<vmem>>, %arg3: memref<32x768xf32, #tpu.memory_space<vmem>>, %arg4: memref<32x768xf32, #tpu.memory_space<vmem>>, %arg5: memref<1x768xf32, #tpu.memory_space<vmem>>, %arg6: memref<128x768xf32, #tpu.memory_space<vmem>>, %arg7: memref<128x768xf32, #tpu.memory_space<vmem>>, %arg8: memref<1x768xf32, #tpu.memory_space<vmem>>, %arg9: memref<128x768xf32, #tpu.memory_space<vmem>>, %arg10: memref<128x768xf32, #tpu.memory_space<vmem>>, %arg11: memref<1x768xf32, #tpu.memory_space<vmem>>, %arg12: memref<128x768xf32, #tpu.memory_space<vmem>>, %arg13: memref<128x768xf32, #tpu.memory_space<vmem>>, %arg14: memref<1x768xf32, #tpu.memory_space<vmem>>, %arg15: memref<128x128xf32, #tpu.memory_space<vmem>>, %arg16: memref<1x128xf32, #tpu.memory_space<vmem>>, %arg17: memref<128x128xf32, #tpu.memory_space<vmem>>, %arg18: memref<1x128xf32, #tpu.memory_space<vmem>>, %arg19: memref<64x128xf32, #tpu.memory_space<vmem>>) attributes {dimension_semantics = [], scalar_prefetch = 0 : i64, scratch_operands = 0 : i64, tpu.core_type = #tpu.core_type<tc>} {
    %c0 = arith.constant 0 : index
    %c0_0 = arith.constant 0 : index
    %0 = vector.load %arg0[%c0, %c0_0] : memref<64x64xf32, #tpu.memory_space<vmem>>, vector<64x64xf32>
    %c0_1 = arith.constant 0 : index
    %c0_2 = arith.constant 0 : index
    %1 = vector.load %arg2[%c0_1, %c0_2] : memref<64x6xf32, #tpu.memory_space<vmem>>, vector<64x6xf32>
    %c0_3 = arith.constant 0 : index
    %c0_4 = arith.constant 0 : index
    %2 = vector.load %arg1[%c0_3, %c0_4] : memref<64x32xf32, #tpu.memory_space<vmem>>, vector<64x32xf32>
    %c0_5 = arith.constant 0 : index
    %c0_6 = arith.constant 0 : index
    %3 = vector.load %arg3[%c0_5, %c0_6] : memref<32x768xf32, #tpu.memory_space<vmem>>, vector<32x768xf32>
    %c0_7 = arith.constant 0 : index
    %c0_8 = arith.constant 0 : index
    %4 = vector.load %arg4[%c0_7, %c0_8] : memref<32x768xf32, #tpu.memory_space<vmem>>, vector<32x768xf32>
    %c0_9 = arith.constant 0 : index
    %c0_10 = arith.constant 0 : index
    %5 = vector.load %arg5[%c0_9, %c0_10] : memref<1x768xf32, #tpu.memory_space<vmem>>, vector<1x768xf32>
    %cst = arith.constant dense<0.000000e+00> : vector<64x32xf32>
    %6 = tpu.matmul %0, %2, %cst {dimension_numbers = #tpu.dot_dimension_numbers<[1], [0], [0], [1], [0, 0, 1, 1], [], []>} : vector<64x64xf32>, vector<64x32xf32>, vector<64x32xf32> -> vector<64x32xf32>
    %cst_11 = arith.constant dense<0.000000e+00> : vector<64x768xf32>
    %7 = tpu.matmul %6, %3, %cst_11 {dimension_numbers = #tpu.dot_dimension_numbers<[1], [0], [0], [1], [0, 0, 1, 1], [], []>} : vector<64x32xf32>, vector<32x768xf32>, vector<64x768xf32> -> vector<64x768xf32>
    %cst_12 = arith.constant dense<0.000000e+00> : vector<64x768xf32>
    %8 = tpu.matmul %2, %4, %cst_12 {dimension_numbers = #tpu.dot_dimension_numbers<[1], [0], [0], [1], [0, 0, 1, 1], [], []>} : vector<64x32xf32>, vector<32x768xf32>, vector<64x768xf32> -> vector<64x768xf32>
    %9 = arith.addf %7, %8 : vector<64x768xf32>
    %10 = vector.broadcast %5 : vector<1x768xf32> to vector<64x768xf32>
    %11 = arith.addf %9, %10 : vector<64x768xf32>
    %12 = vector.extract_strided_slice %1 {offsets = [0, 0], sizes = [64, 1], strides = [1, 1]} : vector<64x6xf32> to vector<64x1xf32>
    %13 = vector.extract_strided_slice %11 {offsets = [0, 0], sizes = [64, 128], strides = [1, 1]} : vector<64x768xf32> to vector<64x128xf32>
    %14 = vector.broadcast %12 : vector<64x1xf32> to vector<64x128xf32>
    %15 = arith.mulf %14, %13 : vector<64x128xf32>
    %16 = vector.extract_strided_slice %1 {offsets = [0, 1], sizes = [64, 1], strides = [1, 1]} : vector<64x6xf32> to vector<64x1xf32>
    %17 = vector.extract_strided_slice %11 {offsets = [0, 128], sizes = [64, 128], strides = [1, 1]} : vector<64x768xf32> to vector<64x128xf32>
    %18 = vector.broadcast %16 : vector<64x1xf32> to vector<64x128xf32>
    %19 = arith.mulf %18, %17 : vector<64x128xf32>
    %20 = arith.addf %15, %19 : vector<64x128xf32>
    %21 = vector.extract_strided_slice %1 {offsets = [0, 2], sizes = [64, 1], strides = [1, 1]} : vector<64x6xf32> to vector<64x1xf32>
    %22 = vector.extract_strided_slice %11 {offsets = [0, 256], sizes = [64, 128], strides = [1, 1]} : vector<64x768xf32> to vector<64x128xf32>
    %23 = vector.broadcast %21 : vector<64x1xf32> to vector<64x128xf32>
    %24 = arith.mulf %23, %22 : vector<64x128xf32>
    %25 = arith.addf %20, %24 : vector<64x128xf32>
    %26 = vector.extract_strided_slice %1 {offsets = [0, 3], sizes = [64, 1], strides = [1, 1]} : vector<64x6xf32> to vector<64x1xf32>
    %27 = vector.extract_strided_slice %11 {offsets = [0, 384], sizes = [64, 128], strides = [1, 1]} : vector<64x768xf32> to vector<64x128xf32>
    %28 = vector.broadcast %26 : vector<64x1xf32> to vector<64x128xf32>
    %29 = arith.mulf %28, %27 : vector<64x128xf32>
    %30 = arith.addf %25, %29 : vector<64x128xf32>
    %31 = vector.extract_strided_slice %1 {offsets = [0, 4], sizes = [64, 1], strides = [1, 1]} : vector<64x6xf32> to vector<64x1xf32>
    %32 = vector.extract_strided_slice %11 {offsets = [0, 512], sizes = [64, 128], strides = [1, 1]} : vector<64x768xf32> to vector<64x128xf32>
    %33 = vector.broadcast %31 : vector<64x1xf32> to vector<64x128xf32>
    %34 = arith.mulf %33, %32 : vector<64x128xf32>
    %35 = arith.addf %30, %34 : vector<64x128xf32>
    %36 = vector.extract_strided_slice %1 {offsets = [0, 5], sizes = [64, 1], strides = [1, 1]} : vector<64x6xf32> to vector<64x1xf32>
    %37 = vector.extract_strided_slice %11 {offsets = [0, 640], sizes = [64, 128], strides = [1, 1]} : vector<64x768xf32> to vector<64x128xf32>
    %38 = vector.broadcast %36 : vector<64x1xf32> to vector<64x128xf32>
    %39 = arith.mulf %38, %37 : vector<64x128xf32>
    %40 = arith.addf %35, %39 : vector<64x128xf32>
    %c0_13 = arith.constant 0 : index
    %c0_14 = arith.constant 0 : index
    %41 = vector.load %arg6[%c0_13, %c0_14] : memref<128x768xf32, #tpu.memory_space<vmem>>, vector<128x768xf32>
    %c0_15 = arith.constant 0 : index
    %c0_16 = arith.constant 0 : index
    %42 = vector.load %arg7[%c0_15, %c0_16] : memref<128x768xf32, #tpu.memory_space<vmem>>, vector<128x768xf32>
    %c0_17 = arith.constant 0 : index
    %c0_18 = arith.constant 0 : index
    %43 = vector.load %arg8[%c0_17, %c0_18] : memref<1x768xf32, #tpu.memory_space<vmem>>, vector<1x768xf32>
    %cst_19 = arith.constant dense<0.000000e+00> : vector<64x128xf32>
    %44 = tpu.matmul %0, %40, %cst_19 {dimension_numbers = #tpu.dot_dimension_numbers<[1], [0], [0], [1], [0, 0, 1, 1], [], []>} : vector<64x64xf32>, vector<64x128xf32>, vector<64x128xf32> -> vector<64x128xf32>
    %cst_20 = arith.constant dense<0.000000e+00> : vector<64x768xf32>
    %45 = tpu.matmul %44, %41, %cst_20 {dimension_numbers = #tpu.dot_dimension_numbers<[1], [0], [0], [1], [0, 0, 1, 1], [], []>} : vector<64x128xf32>, vector<128x768xf32>, vector<64x768xf32> -> vector<64x768xf32>
    %cst_21 = arith.constant dense<0.000000e+00> : vector<64x768xf32>
    %46 = tpu.matmul %40, %42, %cst_21 {dimension_numbers = #tpu.dot_dimension_numbers<[1], [0], [0], [1], [0, 0, 1, 1], [], []>} : vector<64x128xf32>, vector<128x768xf32>, vector<64x768xf32> -> vector<64x768xf32>
    %47 = arith.addf %45, %46 : vector<64x768xf32>
    %48 = vector.broadcast %43 : vector<1x768xf32> to vector<64x768xf32>
    %49 = arith.addf %47, %48 : vector<64x768xf32>
    %50 = vector.extract_strided_slice %1 {offsets = [0, 0], sizes = [64, 1], strides = [1, 1]} : vector<64x6xf32> to vector<64x1xf32>
    %51 = vector.extract_strided_slice %49 {offsets = [0, 0], sizes = [64, 128], strides = [1, 1]} : vector<64x768xf32> to vector<64x128xf32>
    %52 = vector.broadcast %50 : vector<64x1xf32> to vector<64x128xf32>
    %53 = arith.mulf %52, %51 : vector<64x128xf32>
    %54 = vector.extract_strided_slice %1 {offsets = [0, 1], sizes = [64, 1], strides = [1, 1]} : vector<64x6xf32> to vector<64x1xf32>
    %55 = vector.extract_strided_slice %49 {offsets = [0, 128], sizes = [64, 128], strides = [1, 1]} : vector<64x768xf32> to vector<64x128xf32>
    %56 = vector.broadcast %54 : vector<64x1xf32> to vector<64x128xf32>
    %57 = arith.mulf %56, %55 : vector<64x128xf32>
    %58 = arith.addf %53, %57 : vector<64x128xf32>
    %59 = vector.extract_strided_slice %1 {offsets = [0, 2], sizes = [64, 1], strides = [1, 1]} : vector<64x6xf32> to vector<64x1xf32>
    %60 = vector.extract_strided_slice %49 {offsets = [0, 256], sizes = [64, 128], strides = [1, 1]} : vector<64x768xf32> to vector<64x128xf32>
    %61 = vector.broadcast %59 : vector<64x1xf32> to vector<64x128xf32>
    %62 = arith.mulf %61, %60 : vector<64x128xf32>
    %63 = arith.addf %58, %62 : vector<64x128xf32>
    %64 = vector.extract_strided_slice %1 {offsets = [0, 3], sizes = [64, 1], strides = [1, 1]} : vector<64x6xf32> to vector<64x1xf32>
    %65 = vector.extract_strided_slice %49 {offsets = [0, 384], sizes = [64, 128], strides = [1, 1]} : vector<64x768xf32> to vector<64x128xf32>
    %66 = vector.broadcast %64 : vector<64x1xf32> to vector<64x128xf32>
    %67 = arith.mulf %66, %65 : vector<64x128xf32>
    %68 = arith.addf %63, %67 : vector<64x128xf32>
    %69 = vector.extract_strided_slice %1 {offsets = [0, 4], sizes = [64, 1], strides = [1, 1]} : vector<64x6xf32> to vector<64x1xf32>
    %70 = vector.extract_strided_slice %49 {offsets = [0, 512], sizes = [64, 128], strides = [1, 1]} : vector<64x768xf32> to vector<64x128xf32>
    %71 = vector.broadcast %69 : vector<64x1xf32> to vector<64x128xf32>
    %72 = arith.mulf %71, %70 : vector<64x128xf32>
    %73 = arith.addf %68, %72 : vector<64x128xf32>
    %74 = vector.extract_strided_slice %1 {offsets = [0, 5], sizes = [64, 1], strides = [1, 1]} : vector<64x6xf32> to vector<64x1xf32>
    %75 = vector.extract_strided_slice %49 {offsets = [0, 640], sizes = [64, 128], strides = [1, 1]} : vector<64x768xf32> to vector<64x128xf32>
    %76 = vector.broadcast %74 : vector<64x1xf32> to vector<64x128xf32>
    %77 = arith.mulf %76, %75 : vector<64x128xf32>
    %78 = arith.addf %73, %77 : vector<64x128xf32>
    %c0_22 = arith.constant 0 : index
    %c0_23 = arith.constant 0 : index
    %79 = vector.load %arg9[%c0_22, %c0_23] : memref<128x768xf32, #tpu.memory_space<vmem>>, vector<128x768xf32>
    %c0_24 = arith.constant 0 : index
    %c0_25 = arith.constant 0 : index
    %80 = vector.load %arg10[%c0_24, %c0_25] : memref<128x768xf32, #tpu.memory_space<vmem>>, vector<128x768xf32>
    %c0_26 = arith.constant 0 : index
    %c0_27 = arith.constant 0 : index
    %81 = vector.load %arg11[%c0_26, %c0_27] : memref<1x768xf32, #tpu.memory_space<vmem>>, vector<1x768xf32>
    %cst_28 = arith.constant dense<0.000000e+00> : vector<64x128xf32>
    %82 = tpu.matmul %0, %78, %cst_28 {dimension_numbers = #tpu.dot_dimension_numbers<[1], [0], [0], [1], [0, 0, 1, 1], [], []>} : vector<64x64xf32>, vector<64x128xf32>, vector<64x128xf32> -> vector<64x128xf32>
    %cst_29 = arith.constant dense<0.000000e+00> : vector<64x768xf32>
    %83 = tpu.matmul %82, %79, %cst_29 {dimension_numbers = #tpu.dot_dimension_numbers<[1], [0], [0], [1], [0, 0, 1, 1], [], []>} : vector<64x128xf32>, vector<128x768xf32>, vector<64x768xf32> -> vector<64x768xf32>
    %cst_30 = arith.constant dense<0.000000e+00> : vector<64x768xf32>
    %84 = tpu.matmul %78, %80, %cst_30 {dimension_numbers = #tpu.dot_dimension_numbers<[1], [0], [0], [1], [0, 0, 1, 1], [], []>} : vector<64x128xf32>, vector<128x768xf32>, vector<64x768xf32> -> vector<64x768xf32>
    %85 = arith.addf %83, %84 : vector<64x768xf32>
    %86 = vector.broadcast %81 : vector<1x768xf32> to vector<64x768xf32>
    %87 = arith.addf %85, %86 : vector<64x768xf32>
    %88 = vector.extract_strided_slice %1 {offsets = [0, 0], sizes = [64, 1], strides = [1, 1]} : vector<64x6xf32> to vector<64x1xf32>
    %89 = vector.extract_strided_slice %87 {offsets = [0, 0], sizes = [64, 128], strides = [1, 1]} : vector<64x768xf32> to vector<64x128xf32>
    %90 = vector.broadcast %88 : vector<64x1xf32> to vector<64x128xf32>
    %91 = arith.mulf %90, %89 : vector<64x128xf32>
    %92 = vector.extract_strided_slice %1 {offsets = [0, 1], sizes = [64, 1], strides = [1, 1]} : vector<64x6xf32> to vector<64x1xf32>
    %93 = vector.extract_strided_slice %87 {offsets = [0, 128], sizes = [64, 128], strides = [1, 1]} : vector<64x768xf32> to vector<64x128xf32>
    %94 = vector.broadcast %92 : vector<64x1xf32> to vector<64x128xf32>
    %95 = arith.mulf %94, %93 : vector<64x128xf32>
    %96 = arith.addf %91, %95 : vector<64x128xf32>
    %97 = vector.extract_strided_slice %1 {offsets = [0, 2], sizes = [64, 1], strides = [1, 1]} : vector<64x6xf32> to vector<64x1xf32>
    %98 = vector.extract_strided_slice %87 {offsets = [0, 256], sizes = [64, 128], strides = [1, 1]} : vector<64x768xf32> to vector<64x128xf32>
    %99 = vector.broadcast %97 : vector<64x1xf32> to vector<64x128xf32>
    %100 = arith.mulf %99, %98 : vector<64x128xf32>
    %101 = arith.addf %96, %100 : vector<64x128xf32>
    %102 = vector.extract_strided_slice %1 {offsets = [0, 3], sizes = [64, 1], strides = [1, 1]} : vector<64x6xf32> to vector<64x1xf32>
    %103 = vector.extract_strided_slice %87 {offsets = [0, 384], sizes = [64, 128], strides = [1, 1]} : vector<64x768xf32> to vector<64x128xf32>
    %104 = vector.broadcast %102 : vector<64x1xf32> to vector<64x128xf32>
    %105 = arith.mulf %104, %103 : vector<64x128xf32>
    %106 = arith.addf %101, %105 : vector<64x128xf32>
    %107 = vector.extract_strided_slice %1 {offsets = [0, 4], sizes = [64, 1], strides = [1, 1]} : vector<64x6xf32> to vector<64x1xf32>
    %108 = vector.extract_strided_slice %87 {offsets = [0, 512], sizes = [64, 128], strides = [1, 1]} : vector<64x768xf32> to vector<64x128xf32>
    %109 = vector.broadcast %107 : vector<64x1xf32> to vector<64x128xf32>
    %110 = arith.mulf %109, %108 : vector<64x128xf32>
    %111 = arith.addf %106, %110 : vector<64x128xf32>
    %112 = vector.extract_strided_slice %1 {offsets = [0, 5], sizes = [64, 1], strides = [1, 1]} : vector<64x6xf32> to vector<64x1xf32>
    %113 = vector.extract_strided_slice %87 {offsets = [0, 640], sizes = [64, 128], strides = [1, 1]} : vector<64x768xf32> to vector<64x128xf32>
    %114 = vector.broadcast %112 : vector<64x1xf32> to vector<64x128xf32>
    %115 = arith.mulf %114, %113 : vector<64x128xf32>
    %116 = arith.addf %111, %115 : vector<64x128xf32>
    %c0_31 = arith.constant 0 : index
    %c0_32 = arith.constant 0 : index
    %117 = vector.load %arg12[%c0_31, %c0_32] : memref<128x768xf32, #tpu.memory_space<vmem>>, vector<128x768xf32>
    %c0_33 = arith.constant 0 : index
    %c0_34 = arith.constant 0 : index
    %118 = vector.load %arg13[%c0_33, %c0_34] : memref<128x768xf32, #tpu.memory_space<vmem>>, vector<128x768xf32>
    %c0_35 = arith.constant 0 : index
    %c0_36 = arith.constant 0 : index
    %119 = vector.load %arg14[%c0_35, %c0_36] : memref<1x768xf32, #tpu.memory_space<vmem>>, vector<1x768xf32>
    %cst_37 = arith.constant dense<0.000000e+00> : vector<64x128xf32>
    %120 = tpu.matmul %0, %116, %cst_37 {dimension_numbers = #tpu.dot_dimension_numbers<[1], [0], [0], [1], [0, 0, 1, 1], [], []>} : vector<64x64xf32>, vector<64x128xf32>, vector<64x128xf32> -> vector<64x128xf32>
    %cst_38 = arith.constant dense<0.000000e+00> : vector<64x768xf32>
    %121 = tpu.matmul %120, %117, %cst_38 {dimension_numbers = #tpu.dot_dimension_numbers<[1], [0], [0], [1], [0, 0, 1, 1], [], []>} : vector<64x128xf32>, vector<128x768xf32>, vector<64x768xf32> -> vector<64x768xf32>
    %cst_39 = arith.constant dense<0.000000e+00> : vector<64x768xf32>
    %122 = tpu.matmul %116, %118, %cst_39 {dimension_numbers = #tpu.dot_dimension_numbers<[1], [0], [0], [1], [0, 0, 1, 1], [], []>} : vector<64x128xf32>, vector<128x768xf32>, vector<64x768xf32> -> vector<64x768xf32>
    %123 = arith.addf %121, %122 : vector<64x768xf32>
    %124 = vector.broadcast %119 : vector<1x768xf32> to vector<64x768xf32>
    %125 = arith.addf %123, %124 : vector<64x768xf32>
    %126 = vector.extract_strided_slice %1 {offsets = [0, 0], sizes = [64, 1], strides = [1, 1]} : vector<64x6xf32> to vector<64x1xf32>
    %127 = vector.extract_strided_slice %125 {offsets = [0, 0], sizes = [64, 128], strides = [1, 1]} : vector<64x768xf32> to vector<64x128xf32>
    %128 = vector.broadcast %126 : vector<64x1xf32> to vector<64x128xf32>
    %129 = arith.mulf %128, %127 : vector<64x128xf32>
    %130 = vector.extract_strided_slice %1 {offsets = [0, 1], sizes = [64, 1], strides = [1, 1]} : vector<64x6xf32> to vector<64x1xf32>
    %131 = vector.extract_strided_slice %125 {offsets = [0, 128], sizes = [64, 128], strides = [1, 1]} : vector<64x768xf32> to vector<64x128xf32>
    %132 = vector.broadcast %130 : vector<64x1xf32> to vector<64x128xf32>
    %133 = arith.mulf %132, %131 : vector<64x128xf32>
    %134 = arith.addf %129, %133 : vector<64x128xf32>
    %135 = vector.extract_strided_slice %1 {offsets = [0, 2], sizes = [64, 1], strides = [1, 1]} : vector<64x6xf32> to vector<64x1xf32>
    %136 = vector.extract_strided_slice %125 {offsets = [0, 256], sizes = [64, 128], strides = [1, 1]} : vector<64x768xf32> to vector<64x128xf32>
    %137 = vector.broadcast %135 : vector<64x1xf32> to vector<64x128xf32>
    %138 = arith.mulf %137, %136 : vector<64x128xf32>
    %139 = arith.addf %134, %138 : vector<64x128xf32>
    %140 = vector.extract_strided_slice %1 {offsets = [0, 3], sizes = [64, 1], strides = [1, 1]} : vector<64x6xf32> to vector<64x1xf32>
    %141 = vector.extract_strided_slice %125 {offsets = [0, 384], sizes = [64, 128], strides = [1, 1]} : vector<64x768xf32> to vector<64x128xf32>
    %142 = vector.broadcast %140 : vector<64x1xf32> to vector<64x128xf32>
    %143 = arith.mulf %142, %141 : vector<64x128xf32>
    %144 = arith.addf %139, %143 : vector<64x128xf32>
    %145 = vector.extract_strided_slice %1 {offsets = [0, 4], sizes = [64, 1], strides = [1, 1]} : vector<64x6xf32> to vector<64x1xf32>
    %146 = vector.extract_strided_slice %125 {offsets = [0, 512], sizes = [64, 128], strides = [1, 1]} : vector<64x768xf32> to vector<64x128xf32>
    %147 = vector.broadcast %145 : vector<64x1xf32> to vector<64x128xf32>
    %148 = arith.mulf %147, %146 : vector<64x128xf32>
    %149 = arith.addf %144, %148 : vector<64x128xf32>
    %150 = vector.extract_strided_slice %1 {offsets = [0, 5], sizes = [64, 1], strides = [1, 1]} : vector<64x6xf32> to vector<64x1xf32>
    %151 = vector.extract_strided_slice %125 {offsets = [0, 640], sizes = [64, 128], strides = [1, 1]} : vector<64x768xf32> to vector<64x128xf32>
    %152 = vector.broadcast %150 : vector<64x1xf32> to vector<64x128xf32>
    %153 = arith.mulf %152, %151 : vector<64x128xf32>
    %154 = arith.addf %149, %153 : vector<64x128xf32>
    %155 = arith.addf %154, %116 : vector<64x128xf32>
    %156 = arith.addf %155, %78 : vector<64x128xf32>
    %c0_40 = arith.constant 0 : index
    %c0_41 = arith.constant 0 : index
    %157 = vector.load %arg15[%c0_40, %c0_41] : memref<128x128xf32, #tpu.memory_space<vmem>>, vector<128x128xf32>
    %cst_42 = arith.constant dense<0.000000e+00> : vector<64x128xf32>
    %158 = tpu.matmul %156, %157, %cst_42 {dimension_numbers = #tpu.dot_dimension_numbers<[1], [0], [0], [1], [0, 0, 1, 1], [], []>} : vector<64x128xf32>, vector<128x128xf32>, vector<64x128xf32> -> vector<64x128xf32>
    %c0_43 = arith.constant 0 : index
    %c0_44 = arith.constant 0 : index
    %159 = vector.load %arg16[%c0_43, %c0_44] : memref<1x128xf32, #tpu.memory_space<vmem>>, vector<1x128xf32>
    %160 = vector.broadcast %159 : vector<1x128xf32> to vector<64x128xf32>
    %161 = arith.addf %158, %160 : vector<64x128xf32>
    %cst_45 = arith.constant 0.000000e+00 : f32
    %162 = vector.broadcast %cst_45 : f32 to vector<64x128xf32>
    %163 = arith.maximumf %161, %162 : vector<64x128xf32>
    %c0_46 = arith.constant 0 : index
    %c0_47 = arith.constant 0 : index
    %164 = vector.load %arg17[%c0_46, %c0_47] : memref<128x128xf32, #tpu.memory_space<vmem>>, vector<128x128xf32>
    %cst_48 = arith.constant dense<0.000000e+00> : vector<64x128xf32>
    %165 = tpu.matmul %163, %164, %cst_48 {dimension_numbers = #tpu.dot_dimension_numbers<[1], [0], [0], [1], [0, 0, 1, 1], [], []>} : vector<64x128xf32>, vector<128x128xf32>, vector<64x128xf32> -> vector<64x128xf32>
    %c0_49 = arith.constant 0 : index
    %c0_50 = arith.constant 0 : index
    %166 = vector.load %arg18[%c0_49, %c0_50] : memref<1x128xf32, #tpu.memory_space<vmem>>, vector<1x128xf32>
    %167 = vector.broadcast %166 : vector<1x128xf32> to vector<64x128xf32>
    %168 = arith.addf %165, %167 : vector<64x128xf32>
    %c0_51 = arith.constant 0 : index
    %c0_52 = arith.constant 0 : index
    %169 = vector.load %arg19[%c0_51, %c0_52] : memref<64x128xf32, #tpu.memory_space<vmem>>, vector<64x128xf32>
    tpu.vector_store %arg19[%c0_51, %c0_52], %168 {strides = array<i32>} : memref<64x128xf32, #tpu.memory_space<vmem>>, vector<64x128xf32>,
    return
  }
}

</mosaic_0001>

<bundles_post_ra>
// kernel: model_forward.1
= control target key start
LH: loop header
LB: loop body
LE: loop exit
PB: predicated region body
PF: predicated region fallthrough
CT: control target
= control target key end

     0   :  { %vm135_vm0 = vcmask 523264   ;;  %v9732_v2 = vmov 0.0   ;;  %v5540_v3 = vmov 0   ;;  %v5541_v4 = vmov 1   ;;  %s9708_s1 = inlined_call_operand.vmem [shape: f32[64,32], index: 1, kind: input, shape index: {}]   ;;  %s9709_s0 = inlined_call_operand.vmem [shape: f32[64,64], index: 0, kind: input, shape index: {}]   ;;  %s9710_s4 = inlined_call_operand.vmem [shape: f32[32,768], index: 4, kind: input, shape index: {}]   ;;  %s9711_s2 = inlined_call_operand.vmem [shape: f32[64,6], index: 2, kind: input, shape index: {}]   ;;  %s9712_s3 = inlined_call_operand.vmem [shape: f32[32,768], index: 3, kind: input, shape index: {}]   ;;  %s9713_s7 = inlined_call_operand.vmem [shape: f32[128,768], index: 7, kind: input, shape index: {}]   ;;  %s9714_s5 = inlined_call_operand.vmem [shape: f32[1,768], index: 5, kind: input, shape index: {}]   ;;  %s9715_s6 = inlined_call_operand.vmem [shape: f32[128,768], index: 6, kind: input, shape index: {}]   ;;  %s9716_s10 = inlined_call_operand.vmem [shape: f32[128,768], index: 10, kind: input, shape index: {}]   ;;  %s9717_s8 = inlined_call_operand.vmem [shape: f32[1,768], index: 8, kind: input, shape index: {}]   ;;  %s9718_s9 = inlined_call_operand.vmem [shape: f32[128,768], index: 9, kind: input, shape index: {}]   ;;  %s9719_s13 = inlined_call_operand.vmem [shape: f32[128,768], index: 13, kind: input, shape index: {}]   ;;  %s9720_s11 = inlined_call_operand.vmem [shape: f32[1,768], index: 11, kind: input, shape index: {}]   ;;  %s9721_s12 = inlined_call_operand.vmem [shape: f32[128,768], index: 12, kind: input, shape index: {}]   ;;  %s9722_s15 = inlined_call_operand.vmem [shape: f32[128,128], index: 15, kind: input, shape index: {}]   ;;  %s9723_s17 = inlined_call_operand.vmem [shape: f32[128,128], index: 17, kind: input, shape index: {}]   ;;  %s9724_s14 = inlined_call_operand.vmem [shape: f32[1,768], index: 14, kind: input, shape index: {}]   ;;  %s9725_s16 = inlined_call_operand.vmem [shape: f32[1,128], index: 16, kind: input, shape index: {}]   ;;  %s9726_s18 = inlined_call_operand.vmem [shape: f32[1,128], index: 18, kind: input, shape index: {}]   ;;  %s9727_s19 = inlined_call_operand.vmem [shape: f32[64,128], index: 19, kind: output, shape index: {}]  }
   0x1   :  { %9807 = sst [smem:[#allocation83_spill]] %s9708_s1  ;;  %354 = vmatprep.mubr.f32.mxu1 %v9732_v2  ;;  %5483 = vset.pattern.permute.xlu1 %v5540_v3  ;;  %vm265_vm1 = vcmask 261120   ;;  %v5542_v34 = vmov 2   ;;  %v105_v47 = vld [vmem:[%s9712_s3 + $0x98] sm:$0xff]  ;;  %v104_v49 = vld [vmem:[%s9712_s3 + $0x90] sm:$0xff]  ;;  %v99_v50 = vld [vmem:[%s9712_s3 + $0x68] sm:$0xff] }
   0x2   :  { %9808 = sst [smem:[#allocation84_spill]] %s9709_s0  ;;  %5481 = vset.pattern.permute.xlu0 %v5541_v4  ;;  %v107_v51 = vld [vmem:[%s9712_s3 + $0xa8] sm:$0xff]  ;;  %v106_v52 = vld [vmem:[%s9712_s3 + $0xa0] sm:$0xff]  ;;  %v101_v54 = vld [vmem:[%s9712_s3 + $0x78] sm:$0xff]  ;;  %v5543_v56 = vmov 3   ;;  %v5544_v59 = vmov 4  }
   0x3   :  { %9809 = sst [smem:[#allocation85_spill]] %s9710_s4  ;;  %v98_v53 = vld [vmem:[%s9712_s3 + $0x60] sm:$0xff]  ;;  %v100_v55 = vld [vmem:[%s9712_s3 + $0x70] sm:$0xff]  ;;  %v93_v57 = vld [vmem:[%s9712_s3 + $0x38] sm:$0xff] }
   0x4   :  { %9810 = sst [smem:[#allocation86_spill]] %s9711_s2  ;;  %v95_v58 = vld [vmem:[%s9712_s3 + $0x48] sm:$0xff]  ;;  %v92_v61 = vld [vmem:[%s9712_s3 + $0x30] sm:$0xff]  ;;  %v94_v62 = vld [vmem:[%s9712_s3 + $0x40] sm:$0xff] }
   0x5   :  { %s9811_s20 = sld [smem:[#allocation83_spill]]  ;;  %v87_v63 = vld [vmem:[%s9712_s3 + $0x8] sm:$0xff] }
   0x6   :  { %s9812_s25 = sld [smem:[#allocation84_spill]] }
   0x7   :  { %s9813_s29 = sld [smem:[#allocation85_spill]] }
   0x8   :  { %s9814_s1 = sld [smem:[#allocation86_spill]] }
   0xb   :  { %v5649_v0 = vld [vmem:[%s9811_s20 + $0x38] sm:$0xff]  ;;  %v5654_v1 = vld [vmem:[%s9811_s20 + $0x30] sm:$0xff]  ;;  %v5664_v5 = vld [vmem:[%s9811_s20 + $0x28] sm:$0xff] }
   0xc   :  { %5274 = vmatprep.subr.mxu0 %v5649_v0  ;;  %v5669_v6 = vld [vmem:[%s9812_s25] sm:$0xff]  ;;  %v5691_v10 = vld [vmem:[%s9811_s20 + $0x18] sm:$0xff]  ;;  %v5707_v14 = vld [vmem:[%s9811_s20 + $0x10] sm:$0xff] }
   0xd   :  { %5275 = vmatpush3.msra.mxu0 %v5649_v0  ;;  %5290 = vmatprep.mubr.msk.f32.mxu0 %vm135_vm0, %v5669_v6  ;;  %v5678_v7 = vld [vmem:[%s9811_s20 + $0x20] sm:$0xff]  ;;  %v129_v8 = vld [vmem:[%s9813_s29 + $0x98] sm:$0xff]  ;;  %v128_v9 = vld [vmem:[%s9813_s29 + $0x90] sm:$0xff] }
   0xe   :  { %5276 = vmatprep.subr.mxu0 %v5654_v1  ;;  %314 = vmatprep.subr.mxu1 %v129_v8  ;;  %v123_v11 = vld [vmem:[%s9813_s29 + $0x68] sm:$0xff]  ;;  %v122_v12 = vld [vmem:[%s9813_s29 + $0x60] sm:$0xff]  ;;  %v117_v13 = vld [vmem:[%s9813_s29 + $0x38] sm:$0xff] }
   0xf   :  { %5277 = vmatpush3.msra.mxu0 %v5654_v1  ;;  %315 = vmatpush1.msra.mxu1 %v128_v9  ;;  %v116_v15 = vld [vmem:[%s9813_s29 + $0x30] sm:$0xff]  ;;  %v111_v16 = vld [vmem:[%s9813_s29 + $0x8] sm:$0xff]  ;;  %v110_v18 = vld [vmem:[%s9813_s29] sm:$0xff] }
  0x10   :  { %5278 = vmatprep.subr.mxu0 %v5664_v5  ;;  %316 = vmatprep.subr.mxu1 %v123_v11  ;;  %v5720_v17 = vld [vmem:[%s9811_s20 + $0x8] sm:$0xff]  ;;  %v5730_v19 = vld [vmem:[%s9811_s20] sm:$0xff]  ;;  %v5736_v20 = vld [vmem:[%s9814_s1 + $0x30] sm:$0xff] }
  0x11   :  { %5279 = vmatpush3.msra.mxu0 %v5664_v5  ;;  %317 = vmatpush1.msra.mxu1 %v122_v12  ;;  %v63_v21 = vld [vmem:[%s9812_s25 + $0x8] sm:$0xff]  ;;  %v64_v23 = vld [vmem:[%s9812_s25 + $0x10] sm:$0xff]  ;;  %v130_v24 = vld [vmem:[%s9813_s29 + $0xa0] sm:$0xff] }
  0x12   :  { %5280 = vmatprep.subr.mxu0 %v5678_v7  ;;  %318 = vmatprep.subr.mxu1 %v117_v13  ;;  %v131_v22 = vld [vmem:[%s9813_s29 + $0xa8] sm:$0xff]  ;;  %v133_v25 = vld [vmem:[%s9813_s29 + $0xb8] sm:$0xff]  ;;  %v66_v27 = vld [vmem:[%s9812_s25 + $0x20] sm:$0xff] }
  0x13   :  { %5281 = vmatpush3.msra.mxu0 %v5678_v7  ;;  %319 = vmatpush1.msra.mxu1 %v116_v15  ;;  %v65_v26 = vld [vmem:[%s9812_s25 + $0x18] sm:$0xff]  ;;  %v124_v29 = vld [vmem:[%s9813_s29 + $0x70] sm:$0xff]  ;;  %v67_v31 = vld [vmem:[%s9812_s25 + $0x28] sm:$0xff] }
  0x14   :  { %5282 = vmatprep.subr.mxu0 %v5691_v10  ;;  %320 = vmatprep.subr.mxu1 %v111_v16  ;;  %v125_v28 = vld [vmem:[%s9813_s29 + $0x78] sm:$0xff]  ;;  %v132_v30 = vld [vmem:[%s9813_s29 + $0xb0] sm:$0xff]  ;;  %v119_v35 = vld [vmem:[%s9813_s29 + $0x48] sm:$0xff] }
  0x15   :  { %5283 = vmatpush3.msra.mxu0 %v5691_v10  ;;  %321 = vmatpush1.msra.mxu1 %v110_v18  ;;  %v68_v32 = vld [vmem:[%s9812_s25 + $0x30] sm:$0xff]  ;;  %v5796_v33 = vld [vmem:[%s9814_s1 + $0x38] sm:$0xff]  ;;  %v127_v36 = vld [vmem:[%s9813_s29 + $0x88] sm:$0xff] }
  0x16   :  { %5284 = vmatprep.subr.mxu0 %v5707_v14  ;;  %5088 = vmatmul.mubr.msk.f32.vlgmr.msra.gmra.mxu1 %vm265_vm1, %v5730_v19  ;;  %v69_v37 = vld [vmem:[%s9812_s25 + $0x38] sm:$0xff]  ;;  %v126_v38 = vld [vmem:[%s9813_s29 + $0x80] sm:$0xff]  ;;  %v5824_v40 = vld [vmem:[%s9814_s1 + $0x28] sm:$0xff] }
  0x17   :  { %5285 = vmatpush3.msra.mxu0 %v5707_v14  ;;  %360 = vmatprep.mubr.f32.mxu1 %v9732_v2  ;;  %v118_v39 = vld [vmem:[%s9813_s29 + $0x40] sm:$0xff]  ;;  %v113_v41 = vld [vmem:[%s9813_s29 + $0x18] sm:$0xff]  ;;  %v112_v43 = vld [vmem:[%s9813_s29 + $0x10] sm:$0xff] }
  0x18   :  { %5286 = vmatprep.subr.mxu0 %v5720_v17  ;;  %1103 = vperm.xlu1 %5483, %v5736_v20   ;;  %v121_v42 = vld [vmem:[%s9813_s29 + $0x58] sm:$0xff]  ;;  %v120_v44 = vld [vmem:[%s9813_s29 + $0x50] sm:$0xff]  ;;  %v115_v45 = vld [vmem:[%s9813_s29 + $0x28] sm:$0xff] }
  0x19   :  { %5287 = vmatpush3.msra.mxu0 %v5720_v17  ;;  %540 = vmatprep.subr.mxu1 %v133_v25  ;;  %v114_v46 = vld [vmem:[%s9813_s29 + $0x20] sm:$0xff]  ;;  %v5938_v60 = vld [vmem:[%s9814_s1 + $0x18] sm:$0xff]  ;;  %v71_v9 = vld [vmem:[%s9814_s1 + $0x8] sm:$0xff] }
  0x1a   :  { %5288 = vmatprep.subr.mxu0 %v5730_v19  ;;  %5089 = vmatmul.mubr.msk.f32.gmra.mxu1 %vm265_vm1, %v5720_v17  ;;  %v5867_v48 = vld [vmem:[%s9814_s1 + $0x20] sm:$0xff]  ;;  %v109_v8 = vld [vmem:[%s9712_s3 + $0xb8] sm:$0xff]  ;;  %v108_v12 = vld [vmem:[%s9712_s3 + $0xb0] sm:$0xff] }
  0x1b   :  { %5289 = vmatpush3.msra.mxu0 %v5730_v19  ;;  %366 = vmatprep.mubr.f32.mxu1 %v9732_v2  ;;  %v103_v13 = vld [vmem:[%s9712_s3 + $0x88] sm:$0xff]  ;;  %v102_v15 = vld [vmem:[%s9712_s3 + $0x80] sm:$0xff]  ;;  %v97_v16 = vld [vmem:[%s9712_s3 + $0x58] sm:$0xff] }
  0x1c   :  { %5291 = vmatmul.mubr.msk.f32.vlgmr.msra.gmra.mxu0 %vm135_vm0, %v63_v21  ;;  %427 = vmatprep.subr.mxu0 %v131_v22  ;;  %v96_v18 = vld [vmem:[%s9712_s3 + $0x50] sm:$0xff]  ;;  %v90_v21 = vld [vmem:[%s9712_s3 + $0x20] sm:$0xff] }
  0x1d   :  { %5293 = vmatprep.mubr.msk.f32.mxu0 %vm135_vm0, %v64_v23  ;;  %428 = vmatpush1.msra.mxu0 %v130_v24 }
  0x1e   :  { %5484 = vset.pattern.permute.xlu1 %v5541_v4  ;;  %5090 = vmatmul.mubr.msk.f32.gmra.mxu1 %vm265_vm1, %v5707_v14 }
  0x1f   :  { %1144 = vperm.xlu1 %5484, %v5736_v20   ;;  %372 = vmatprep.mubr.f32.mxu1 %v9732_v2 }
  0x20   :  { %5294 = vmatmul.mubr.msk.f32.gmra.mxu0 %vm135_vm0, %v65_v26  ;;  %429 = vmatprep.subr.mxu0 %v125_v28 }
  0x21   :  { %5296 = vmatprep.mubr.msk.f32.mxu0 %vm135_vm0, %v66_v27  ;;  %430 = vmatpush1.msra.mxu0 %v124_v29 }
  0x22   :  { %541 = vmatpush1.msra.mxu1 %v132_v30  ;;  %431 = vmatprep.subr.mxu0 %v119_v35  ;;  %v1540_v35 = vld [vmem:[%s9713_s7 + $0x2a8] sm:$0xff] }
  0x23   :  { %5485 = vset.pattern.permute.xlu1 %v5542_v34  ;;  %5091 = vmatmul.mubr.msk.f32.gmra.mxu1 %vm265_vm1, %v5691_v10 }
  0x24   :  { %5297 = vmatmul.mubr.msk.f32.gmra.mxu0 %vm135_vm0, %v67_v31  ;;  %1196 = vperm.xlu1 %5485, %v5796_v33  }
  0x25   :  { %5299 = vmatprep.mubr.msk.f32.mxu0 %vm135_vm0, %v68_v32  ;;  %378 = vmatprep.mubr.f32.mxu1 %v9732_v2  ;;  %v1546_v32 = vld [vmem:[%s9713_s7 + $0x2d8] sm:$0xff] }
  0x26   :  { %542 = vmatprep.subr.mxu1 %v127_v36  ;;  %432 = vmatpush1.msra.mxu0 %v118_v39  ;;  %v1539_v36 = vld [vmem:[%s9713_s7 + $0x2a0] sm:$0xff]  ;;  %v1533_v39 = vld [vmem:[%s9713_s7 + $0x270] sm:$0xff] }
  0x27   :  { %543 = vmatpush1.msra.mxu1 %v126_v38  ;;  %433 = vmatprep.subr.mxu0 %v113_v41  ;;  %v1528_v41 = vld [vmem:[%s9713_s7 + $0x248] sm:$0xff] }
  0x28   :  { %5300 = vmatmul.mubr.msk.f32.gmra.mxu0 %vm135_vm0, %v69_v37  ;;  %5092 = vmatmul.mubr.msk.f32.gmra.mxu1 %vm265_vm1, %v5678_v7  ;;  %v1534_v37 = vld [vmem:[%s9713_s7 + $0x278] sm:$0xff] }
  0x29   :  { %5486 = vset.pattern.permute.xlu1 %v5541_v4  ;;  %384 = vmatprep.mubr.f32.mxu1 %v9732_v2 }
  0x2a   :  { %1140 = vperm.xlu1 %5486, %v5824_v40   ;;  %544 = vmatprep.subr.mxu1 %v121_v42  ;;  %v1527_v42 = vld [vmem:[%s9713_s7 + $0x240] sm:$0xff] }
  0x2b   :  { %434 = vmatpush1.msra.mxu0 %v112_v43  ;;  %467 = vmatprep.mubr.f32.mxu0 %v9732_v2  ;;  %v1522_v43 = vld [vmem:[%s9713_s7 + $0x218] sm:$0xff] }
  0x2c   :  { %5093 = vmatmul.mubr.msk.f32.gmra.mxu1 %vm265_vm1, %v5664_v5  ;;  %5096 = vmatmul.mubr.msk.f32.vlgmr.msra.gmra.mxu0 %vm265_vm1, %v5730_v19 }
  0x2d   :  { %390 = vmatprep.mubr.f32.mxu1 %v9732_v2  ;;  %545 = vmatpush1.msra.mxu1 %v120_v44 }
  0x2e   :  { %5487 = vset.pattern.permute.xlu1 %v5542_v34  ;;  %546 = vmatprep.subr.mxu1 %v115_v45  ;;  %v1521_v45 = vld [vmem:[%s9713_s7 + $0x210] sm:$0xff] }
  0x2f   :  { %1192 = vperm.xlu1 %5487, %v5736_v20   ;;  %473 = vmatprep.mubr.f32.mxu0 %v9732_v2 }
  0x30   :  { %5094 = vmatmul.mubr.msk.f32.gmra.mxu1 %vm265_vm1, %v5654_v1  ;;  %5097 = vmatmul.mubr.msk.f32.gmra.mxu0 %vm265_vm1, %v5720_v17 }
  0x31   :  { %396 = vmatprep.mubr.f32.mxu1 %v9732_v2  ;;  %547 = vmatpush1.msra.mxu1 %v114_v46  ;;  %v1516_v46 = vld [vmem:[%s9713_s7 + $0x1e8] sm:$0xff] }
  0x32   :  { %677 = vmatprep.subr.mxu0 %v105_v47  ;;  %479 = vmatprep.mubr.f32.mxu0 %v9732_v2  ;;  %v1515_v47 = vld [vmem:[%s9713_s7 + $0x1e0] sm:$0xff] }
  0x33   :  { %5488 = vset.pattern.permute.xlu1 %v5540_v3  ;;  %678 = vmatpush1.msra.mxu0 %v104_v49  ;;  %v1510_v49 = vld [vmem:[%s9713_s7 + $0x1b8] sm:$0xff] }
  0x34   :  { %5095 = vmatmul.mubr.msk.f32.gmra.mxu1 %vm265_vm1, %v5649_v0  ;;  %1093 = vperm.xlu1 %5488, %v5867_v48  }
  0x35   :  { %580 = vmatprep.mubr.f32.mxu1 %v9732_v2  ;;  %5098 = vmatmul.mubr.msk.f32.gmra.mxu0 %vm265_vm1, %v5707_v14 }
  0x36   :  { %679 = vmatprep.subr.mxu0 %v99_v50  ;;  %485 = vmatprep.mubr.f32.mxu0 %v9732_v2 }
  0x37   :  { %790 = vmatprep.subr.mxu1 %v107_v51  ;;  %680 = vmatpush1.msra.mxu0 %v98_v53  ;;  %v1509_v51 = vld [vmem:[%s9713_s7 + $0x1b0] sm:$0xff]  ;;  %v1503_v53 = vld [vmem:[%s9713_s7 + $0x180] sm:$0xff] }
  0x38   :  { %5104 = vmatmul.mubr.msk.f32.vlgmr.msra.gmra.mxu1 %vm265_vm1, %v5730_v19  ;;  %5489 = vset.pattern.permute.xlu1 %v5541_v4  ;;  %v91_v19 = vld [vmem:[%s9712_s3 + $0x28] sm:$0xff] }
  0x39   :  { %1136 = vperm.xlu1 %5489, %v5867_v48   ;;  %586 = vmatprep.mubr.f32.mxu1 %v9732_v2 }
  0x3a   :  { %5099 = vmatmul.mubr.msk.f32.gmra.mxu0 %vm265_vm1, %v5691_v10  ;;  %791 = vmatpush1.msra.mxu1 %v106_v52  ;;  %v1504_v52 = vld [vmem:[%s9713_s7 + $0x188] sm:$0xff] }
  0x3b   :  { %491 = vmatprep.mubr.f32.mxu0 %v9732_v2  ;;  %792 = vmatprep.subr.mxu1 %v101_v54  ;;  %v1498_v54 = vld [vmem:[%s9713_s7 + $0x158] sm:$0xff] }
  0x3c   :  { %5105 = vmatmul.mubr.msk.f32.gmra.mxu1 %vm265_vm1, %v5720_v17  ;;  %681 = vmatprep.subr.mxu0 %v93_v57 }
  0x3d   :  { %5490 = vset.pattern.permute.xlu1 %v5543_v56  ;;  %592 = vmatprep.mubr.f32.mxu1 %v9732_v2 }
  0x3e   :  { %1240 = vperm.xlu1 %5490, %v5736_v20   ;;  %5100 = vmatmul.mubr.msk.f32.gmra.mxu0 %vm265_vm1, %v5678_v7 }
  0x3f   :  { %497 = vmatprep.mubr.f32.mxu0 %v9732_v2  ;;  %793 = vmatpush1.msra.mxu1 %v100_v55 }
  0x40   :  { %5106 = vmatmul.mubr.msk.f32.gmra.mxu1 %vm265_vm1, %v5707_v14  ;;  %794 = vmatprep.subr.mxu1 %v95_v58  ;;  %v1492_v58 = vld [vmem:[%s9713_s7 + $0x128] sm:$0xff] }
  0x41   :  { %598 = vmatprep.mubr.f32.mxu1 %v9732_v2  ;;  %1148 = vperm.xlu0 %5481, %v5796_v33  }
  0x42   :  { %5491 = vset.pattern.permute.xlu1 %v5544_v59  ;;  %5101 = vmatmul.mubr.msk.f32.gmra.mxu0 %vm265_vm1, %v5664_v5 }
  0x43   :  { %1292 = vperm.xlu1 %5491, %v5796_v33   ;;  %503 = vmatprep.mubr.f32.mxu0 %v9732_v2 }
  0x44   :  { %5107 = vmatmul.mubr.msk.f32.gmra.mxu1 %vm265_vm1, %v5691_v10  ;;  %682 = vmatpush1.msra.mxu0 %v92_v61  ;;  %v70_v10 = vld [vmem:[%s9814_s1] sm:$0xff] }
  0x45   :  { %604 = vmatprep.mubr.f32.mxu1 %v9732_v2  ;;  %5482 = vset.pattern.permute.xlu0 %v5540_v3  ;;  %v88_v3 = vld [vmem:[%s9712_s3 + $0x10] sm:$0xff] }
  0x46   :  { %5102 = vmatmul.mubr.msk.f32.gmra.mxu0 %vm265_vm1, %v5654_v1  ;;  %1108 = vperm.xlu0 %5482, %v5796_v33  }
  0x47   :  { %5492 = vset.pattern.permute.xlu1 %v5541_v4  ;;  %509 = vmatprep.mubr.f32.mxu0 %v9732_v2 }
  0x48   :  { %5108 = vmatmul.mubr.msk.f32.gmra.mxu1 %vm265_vm1, %v5678_v7  ;;  %1132 = vperm.xlu1 %5492, %v5938_v60   ;;  %v72_v7 = vld [vmem:[%s9814_s1 + $0x10] sm:$0xff] }
  0x49   :  { %610 = vmatprep.mubr.f32.mxu1 %v9732_v2  ;;  %795 = vmatpush1.msra.mxu1 %v94_v62  ;;  %v1485_v62 = vld [vmem:[%s9713_s7 + $0xf0] sm:$0xff] }
  0x4a   :  { %5103 = vmatmul.mubr.msk.f32.gmra.mxu0 %vm265_vm1, %v5649_v0  ;;  %1098 = vperm.xlu0 %5482, %v5824_v40  }
  0x4b   :  { %717 = vmatprep.mubr.f32.mxu0 %v9732_v2  ;;  %683 = vmatprep.subr.mxu0 %v87_v63  ;;  %v1480_v63 = vld [vmem:[%s9713_s7 + $0xc8] sm:$0xff] }
  0x4c   :  { %5109 = vmatmul.mubr.msk.f32.gmra.mxu1 %vm265_vm1, %v5664_v5  ;;  %5493 = vset.pattern.permute.xlu1 %v5542_v34  ;;  %v5545_v5 = vmov 5  }
  0x4d   :  { %1184 = vperm.xlu1 %5493, %v5867_v48   ;;  %616 = vmatprep.mubr.f32.mxu1 %v9732_v2 }
  0x4e   :  { %1088 = vperm.xlu0 %5482, %v5938_v60  }
  0x50   :  { %5110 = vmatmul.mubr.msk.f32.gmra.mxu1 %vm265_vm1, %v5654_v1  ;;  %v86_v1 = vld [vmem:[%s9712_s3] sm:$0xff] }
  0x51   :  { %5494 = vset.pattern.permute.xlu1 %v5544_v59  ;;  %622 = vmatprep.mubr.f32.mxu1 %v9732_v2 }
  0x52   :  { %1288 = vperm.xlu1 %5494, %v5736_v20   ;;  %684 = vmatpush1.msra.mxu0 %v86_v1 }
  0x53   :  { %1083 = vperm.xlu0 %5482, %v72_v7   ;;  %903 = vmatprep.subr.mxu0 %v109_v8  ;;  %v1468_v8 = vld [vmem:[%s9713_s7 + $0x68] sm:$0xff] }
  0x54   :  { %5111 = vmatmul.mubr.msk.f32.gmra.mxu1 %vm265_vm1, %v5649_v0  ;;  %v89_v0 = vld [vmem:[%s9712_s3 + $0x18] sm:$0xff] }
  0x55   :  { %830 = vmatprep.mubr.f32.mxu1 %v9732_v2  ;;  %796 = vmatprep.subr.mxu1 %v89_v0  ;;  %v1479_v0 = vld [vmem:[%s9713_s7 + $0xc0] sm:$0xff] }
  0x56   :  { %5495 = vset.pattern.permute.xlu1 %v5545_v5  ;;  %797 = vmatpush1.msra.mxu1 %v88_v3  ;;  %v1474_v3 = vld [vmem:[%s9713_s7 + $0x98] sm:$0xff] }
  0x57   :  { %1340 = vperm.xlu1 %5495, %v5796_v33   ;;  %1078 = vperm.xlu0 %5482, %v71_v9  }
  0x5b   :  { %5496 = vset.pattern.permute.xlu1 %v5541_v4  ;;  %1073 = vperm.xlu0 %5482, %v70_v10  }
  0x5c   :  { %1128 = vperm.xlu1 %5496, %v72_v7  }
  0x5f   :  { %5504 = vset.pattern.permute.xlu0 %v5543_v56 }
  0x60   :  { %5497 = vset.pattern.permute.xlu1 %v5542_v34  ;;  %1244 = vperm.xlu0 %5504, %v5796_v33  }
  0x61   :  { %1180 = vperm.xlu1 %5497, %v5938_v60  }
  0x64   :  { %1236 = vperm.xlu0 %5504, %v5824_v40  }
  0x65   :  { %5498 = vset.pattern.permute.xlu1 %v5544_v59 }
  0x66   :  { %1284 = vperm.xlu1 %5498, %v5824_v40  }
  0x68   :  { %1232 = vperm.xlu0 %5504, %v5867_v48  }
  0x6a   :  { %5499 = vset.pattern.permute.xlu1 %v5545_v5 }
  0x6b   :  { %1336 = vperm.xlu1 %5499, %v5736_v20  }
  0x6c   :  { %1228 = vperm.xlu0 %5504, %v5938_v60  }
  0x6f   :  { %5500 = vset.pattern.permute.xlu1 %v5541_v4 }
  0x70   :  { %1124 = vperm.xlu1 %5500, %v71_v9   ;;  %1224 = vperm.xlu0 %5504, %v72_v7  }
  0x74   :  { %5501 = vset.pattern.permute.xlu1 %v5542_v34  ;;  %5507 = vset.pattern.permute.xlu0 %v5542_v34 }
  0x75   :  { %1176 = vperm.xlu1 %5501, %v72_v7   ;;  %1188 = vperm.xlu0 %5507, %v5824_v40  }
  0x79   :  { %5502 = vset.pattern.permute.xlu1 %v5544_v59  ;;  %1168 = vperm.xlu0 %5507, %v70_v10  }
  0x7a   :  { %1280 = vperm.xlu1 %5502, %v5867_v48  }
  0x7d   :  { %5512 = vset.pattern.permute.xlu0 %v5545_v5 }
  0x7e   :  { %5503 = vset.pattern.permute.xlu1 %v5545_v5  ;;  %1324 = vperm.xlu0 %5512, %v5938_v60  }
  0x7f   :  { %1332 = vperm.xlu1 %5503, %v5824_v40  }
  0x82   :  { %1320 = vperm.xlu0 %5512, %v72_v7  }
  0x83   :  { %5505 = vset.pattern.permute.xlu1 %v5541_v4 }
  0x84   :  { %1120 = vperm.xlu1 %5505, %v70_v10  }
  0x86   :  { %1316 = vperm.xlu0 %5512, %v71_v9  }
  0x88   :  { %5506 = vset.pattern.permute.xlu1 %v5542_v34  ;;  %v1545_v34 = vld [vmem:[%s9713_s7 + $0x2d0] sm:$0xff] }
  0x89   :  { %1172 = vperm.xlu1 %5506, %v71_v9  }
  0x8d   :  { %5508 = vset.pattern.permute.xlu1 %v5544_v59 }
  0x8e   :  { %1276 = vperm.xlu1 %5508, %v5938_v60   ;;  %v1486_v60 = vld [vmem:[%s9713_s7 + $0xf8] sm:$0xff] }
  0x92   :  { %5509 = vset.pattern.permute.xlu1 %v5545_v5 }
  0x93   :  { %1328 = vperm.xlu1 %5509, %v5867_v48  }
  0x97   :  { %5510 = vset.pattern.permute.xlu1 %v5543_v56 }
  0x98   :  { %1220 = vperm.xlu1 %5510, %v71_v9  }
  0x9c   :  { %5511 = vset.pattern.permute.xlu1 %v5544_v59 }
  0x9d   :  { %1272 = vperm.xlu1 %5511, %v72_v7   ;;  %v1473_v7 = vld [vmem:[%s9713_s7 + $0x90] sm:$0xff] }
  0xa1   :  { %5513 = vset.pattern.permute.xlu1 %v5543_v56  ;;  %v1497_v56 = vld [vmem:[%s9713_s7 + $0x150] sm:$0xff] }
  0xa2   :  { %1216 = vperm.xlu1 %5513, %v70_v10  }
  0xa6   :  { %5514 = vset.pattern.permute.xlu1 %v5544_v59  ;;  %v1491_v59 = vld [vmem:[%s9713_s7 + $0x120] sm:$0xff] }
  0xa7   :  { %1268 = vperm.xlu1 %5514, %v71_v9   ;;  %v1467_v9 = vld [vmem:[%s9713_s7 + $0x60] sm:$0xff] }
  0xab   :  { %1264 = vperm.xlu1 %5514, %v70_v10  }
  0xaf   :  { %5515 = vset.pattern.permute.xlu1 %v5545_v5 }
  0xb0   :  { %1312 = vperm.xlu1 %5515, %v70_v10   ;;  %v1462_v10 = vld [vmem:[%s9713_s7 + $0x38] sm:$0xff] }
  0xd6   :  { %v6103_v27 = vpop.f32.mrf.mxu1 }
  0xd8   :  { %v6105_v28 = vpop.f32.mrf.mxu1 }
  0xda   :  { %v6109_v30 = vpop.f32.mrf.mxu1 }
  0xdc   :  { %v5292_v4 = vpop.f32.mrf.mxu0  ;;  %v6116_v33 = vpop.f32.mrf.mxu1 }
  0xde   :  { %v226_v11 = vpop.f32.mrf.mxu0  ;;  %v6130_v38 = vpop.f32.mrf.mxu1 }
  0xdf   :  { %5112 = vmatmul.mubr.msk.f32.vlgmr.msra.gmra.mxu0 %vm265_vm1, %v226_v11  ;;  %5120 = vmatmul.mubr.msk.f32.vlgmr.msra.gmra.mxu1 %vm265_vm1, %v226_v11 }
  0xe0   :  { %723 = vmatprep.mubr.f32.mxu0 %v9732_v2  ;;  %836 = vmatprep.mubr.f32.mxu1 %v9732_v2  ;;  %v5295_v14 = vpop.f32.mrf.mxu0  ;;  %v6146_v44 = vpop.f32.mrf.mxu1 }
  0xe1   :  { %904 = vmatpush1.msra.mxu0 %v108_v12 }
  0xe2   :  { %905 = vmatprep.subr.mxu0 %v103_v13  ;;  %v236_v17 = vpop.f32.mrf.mxu0  ;;  %v1456_v13 = vld [vmem:[%s9713_s7 + $0x8] sm:$0xff] }
  0xe3   :  { %5113 = vmatmul.mubr.msk.f32.gmra.mxu0 %vm265_vm1, %v5292_v4  ;;  %5121 = vmatmul.mubr.msk.f32.gmra.mxu1 %vm265_vm1, %v5292_v4  ;;  %v6162_v50 = vpop.f32.mrf.mxu1 }
  0xe4   :  { %729 = vmatprep.mubr.f32.mxu0 %v9732_v2  ;;  %842 = vmatprep.mubr.f32.mxu1 %v9732_v2  ;;  %v5298_v20 = vpop.f32.mrf.mxu0 }
  0xe5   :  { %906 = vmatpush1.msra.mxu0 %v102_v15  ;;  %v6176_v55 = vpop.f32.mrf.mxu1  ;;  %v1550_v15 = vld [vmem:[%s9713_s7 + $0x2f8] sm:$0xff] }
  0xe6   :  { %907 = vmatprep.subr.mxu0 %v97_v16  ;;  %v246_v22 = vpop.f32.mrf.mxu0 }
  0xe7   :  { %5114 = vmatmul.mubr.msk.f32.gmra.mxu0 %vm265_vm1, %v236_v17  ;;  %5122 = vmatmul.mubr.msk.f32.gmra.mxu1 %vm265_vm1, %v236_v17 }
  0xe8   :  { %735 = vmatprep.mubr.f32.mxu0 %v9732_v2  ;;  %848 = vmatprep.mubr.f32.mxu1 %v9732_v2  ;;  %v5301_v23 = vpop.f32.mrf.mxu0  ;;  %v6192_v61 = vpop.f32.mrf.mxu1 }
  0xe9   :  { %908 = vmatpush1.msra.mxu0 %v96_v18 }
  0xea   :  { %909 = vmatprep.subr.mxu0 %v91_v19  ;;  %v256_v24 = vpop.f32.mrf.mxu0  ;;  %v6208_v5 = vpop.f32.mrf.mxu1 }
  0xeb   :  { %5115 = vmatmul.mubr.msk.f32.gmra.mxu0 %vm265_vm1, %v5295_v14  ;;  %5123 = vmatmul.mubr.msk.f32.gmra.mxu1 %vm265_vm1, %v5295_v14 }
  0xec   :  { %741 = vmatprep.mubr.f32.mxu0 %v9732_v2  ;;  %854 = vmatprep.mubr.f32.mxu1 %v9732_v2 }
  0xed   :  { %910 = vmatpush1.msra.mxu0 %v90_v21 }
  0xee   :  { %1657 = vmatprep.subr.mxu0 %v1546_v32 }
  0xef   :  { %5116 = vmatmul.mubr.msk.f32.gmra.mxu0 %vm265_vm1, %v246_v22  ;;  %5124 = vmatmul.mubr.msk.f32.gmra.mxu1 %vm265_vm1, %v246_v22 }
  0xf0   :  { %747 = vmatprep.mubr.f32.mxu0 %v9732_v2  ;;  %860 = vmatprep.mubr.f32.mxu1 %v9732_v2 }
  0xf3   :  { %5117 = vmatmul.mubr.msk.f32.gmra.mxu0 %vm265_vm1, %v5298_v20  ;;  %5125 = vmatmul.mubr.msk.f32.gmra.mxu1 %vm265_vm1, %v5298_v20 }
  0xf4   :  { %753 = vmatprep.mubr.f32.mxu0 %v9732_v2  ;;  %866 = vmatprep.mubr.f32.mxu1 %v9732_v2 }
  0xf7   :  { %5118 = vmatmul.mubr.msk.f32.gmra.mxu0 %vm265_vm1, %v256_v24  ;;  %5126 = vmatmul.mubr.msk.f32.gmra.mxu1 %vm265_vm1, %v256_v24 }
  0xf8   :  { %759 = vmatprep.mubr.f32.mxu0 %v9732_v2  ;;  %872 = vmatprep.mubr.f32.mxu1 %v9732_v2 }
  0xfb   :  { %5119 = vmatmul.mubr.msk.f32.gmra.mxu0 %vm265_vm1, %v5301_v23  ;;  %5127 = vmatmul.mubr.msk.f32.gmra.mxu1 %vm265_vm1, %v5301_v23 }
  0xfc   :  { %943 = vmatprep.mubr.f32.mxu0 %v9732_v2  ;;  %5318 = vmatprep.mubr.msk.f32.mxu1 %vm135_vm0, %v5669_v6  ;;  %v6091_v6 = vpop.permute.xlu1 %1103 }
  0xfd   :  { %9815 = vst [vmem:[#allocation2_spill] sm:$0xff] %v6091_v6 }
  0xff   :  { %5128 = vmatmul.mubr.msk.f32.vlgmr.msra.gmra.mxu0 %vm265_vm1, %v226_v11  ;;  %v1461_v11 = vld [vmem:[%s9713_s7 + $0x30] sm:$0xff] }
 0x100   :  { %949 = vmatprep.mubr.f32.mxu0 %v9732_v2  ;;  %v6097_v25 = vpop.permute.xlu1 %1144  ;;  %1658 = vmatpush1.msra.mxu0 %v1545_v34  ;;  %v6258_v34 = vpop.f32.mrf.mxu0 }
 0x101   :  { %9816 = vst [vmem:[#allocation3_spill] sm:$0xff] %v6097_v25  ;;  %1659 = vmatprep.subr.mxu0 %v1540_v35 }
 0x102   :  { %1660 = vmatpush1.msra.mxu0 %v1539_v36  ;;  %v6262_v36 = vpop.f32.mrf.mxu0 }
 0x103   :  { %5129 = vmatmul.mubr.msk.f32.gmra.mxu0 %vm265_vm1, %v5292_v4  ;;  %1661 = vmatprep.subr.mxu0 %v1534_v37  ;;  %v6222_v4 = vpop.f32.mrf.mxu1 }
 0x104   :  { %955 = vmatprep.mubr.f32.mxu0 %v9732_v2  ;;  %v6101_v26 = vpop.permute.xlu1 %1196  ;;  %1662 = vmatpush1.msra.mxu0 %v1533_v39 }
 0x105   :  { %9817 = vst [vmem:[#allocation4_spill] sm:$0xff] %v6101_v26  ;;  %1663 = vmatprep.subr.mxu0 %v1528_v41  ;;  %v6238_v16 = vpop.f32.mrf.mxu1  ;;  %v6268_v41 = vpop.permute.xlu0 %1148 }
 0x106   :  { %1664 = vmatpush1.msra.mxu0 %v1527_v42  ;;  %9824 = vst [vmem:[#allocation11_spill] sm:$0xff] %v6238_v16  ;;  %9836 = vst [vmem:[#allocation23_spill] sm:$0xff] %v6268_v41  ;;  %v6270_v42 = vpop.f32.mrf.mxu0 }
 0x107   :  { %5130 = vmatmul.mubr.msk.f32.gmra.mxu0 %vm265_vm1, %v236_v17  ;;  %1665 = vmatprep.subr.mxu0 %v1522_v43  ;;  %v6242_v18 = vpop.f32.mrf.mxu1 }
 0x108   :  { %961 = vmatprep.mubr.f32.mxu0 %v9732_v2  ;;  %v6107_v29 = vpop.permute.xlu1 %1140  ;;  %1666 = vmatpush1.msra.mxu0 %v1521_v45  ;;  %9826 = vst [vmem:[#allocation13_spill] sm:$0xff] %v6242_v18 }
 0x109   :  { %9818 = vst [vmem:[#allocation5_spill] sm:$0xff] %v6107_v29  ;;  %1667 = vmatprep.subr.mxu0 %v1516_v46  ;;  %v6244_v19 = vpop.f32.mrf.mxu1  ;;  %v6276_v46 = vpop.f32.mrf.mxu0 }
 0x10a   :  { %1668 = vmatpush1.msra.mxu0 %v1515_v47  ;;  %9827 = vst [vmem:[#allocation14_spill] sm:$0xff] %v6244_v19  ;;  %v6278_v47 = vpop.permute.xlu0 %1108 }
 0x10b   :  { %5131 = vmatmul.mubr.msk.f32.gmra.mxu0 %vm265_vm1, %v5295_v14  ;;  %1669 = vmatprep.subr.mxu0 %v1510_v49  ;;  %v1455_v14 = vld [vmem:[%s9713_s7] sm:$0xff]  ;;  %v6248_v21 = vpop.f32.mrf.mxu1  ;;  %9839 = vst [vmem:[#allocation26_spill] sm:$0xff] %v6278_v47 }
 0x10c   :  { %967 = vmatprep.mubr.f32.mxu0 %v9732_v2  ;;  %v6111_v31 = vpop.permute.xlu1 %1192  ;;  %1670 = vmatpush1.msra.mxu0 %v1509_v51  ;;  %9829 = vst [vmem:[#allocation16_spill] sm:$0xff] %v6248_v21  ;;  %v6282_v51 = vpop.f32.mrf.mxu0 }
 0x10d   :  { %9819 = vst [vmem:[#allocation6_spill] sm:$0xff] %v6111_v31  ;;  %1671 = vmatprep.subr.mxu0 %v1504_v52 }
 0x10e   :  { %1672 = vmatpush1.msra.mxu0 %v1503_v53 }
 0x10f   :  { %5132 = vmatmul.mubr.msk.f32.gmra.mxu0 %vm265_vm1, %v246_v22  ;;  %1673 = vmatprep.subr.mxu0 %v1498_v54  ;;  %v6288_v54 = vpop.permute.xlu0 %1098 }
 0x110   :  { %973 = vmatprep.mubr.f32.mxu0 %v9732_v2  ;;  %v6135_v40 = vpop.permute.xlu1 %1093  ;;  %1674 = vmatpush1.msra.mxu0 %v1497_v56  ;;  %9843 = vst [vmem:[#allocation30_spill] sm:$0xff] %v6288_v54  ;;  %v6290_v56 = vpop.f32.mrf.mxu0 }
 0x111   :  { %9820 = vst [vmem:[#allocation7_spill] sm:$0xff] %v6135_v40  ;;  %1675 = vmatprep.subr.mxu0 %v1492_v58 }
 0x112   :  { %1676 = vmatpush1.msra.mxu0 %v1491_v59 }
 0x113   :  { %5133 = vmatmul.mubr.msk.f32.gmra.mxu0 %vm265_vm1, %v5298_v20  ;;  %1677 = vmatprep.subr.mxu0 %v1486_v60  ;;  %v6296_v60 = vpop.f32.mrf.mxu0 }
 0x114   :  { %979 = vmatprep.mubr.f32.mxu0 %v9732_v2  ;;  %v6157_v48 = vpop.permute.xlu1 %1136  ;;  %1678 = vmatpush1.msra.mxu0 %v1485_v62  ;;  %v6298_v62 = vpop.permute.xlu0 %1088 }
 0x115   :  { %9821 = vst [vmem:[#allocation8_spill] sm:$0xff] %v6157_v48  ;;  %1679 = vmatprep.subr.mxu0 %v1480_v63 }
 0x116   :  { %1680 = vmatpush1.msra.mxu0 %v1479_v0  ;;  %v6302_v0 = vpop.f32.mrf.mxu0 }
 0x117   :  { %5134 = vmatmul.mubr.msk.f32.gmra.mxu0 %vm265_vm1, %v256_v24  ;;  %1681 = vmatprep.subr.mxu0 %v1474_v3 }
 0x118   :  { %985 = vmatprep.mubr.f32.mxu0 %v9732_v2  ;;  %v6181_v57 = vpop.permute.xlu1 %1240  ;;  %1682 = vmatpush1.msra.mxu0 %v1473_v7 }
 0x119   :  { %9822 = vst [vmem:[#allocation9_spill] sm:$0xff] %v6181_v57  ;;  %1683 = vmatprep.subr.mxu0 %v1468_v8  ;;  %v6308_v8 = vpop.permute.xlu0 %1083 }
 0x11a   :  { %1684 = vmatpush1.msra.mxu0 %v1467_v9  ;;  %v6310_v9 = vpop.f32.mrf.mxu0 }
 0x11b   :  { %5135 = vmatmul.mubr.msk.f32.gmra.mxu0 %vm265_vm1, %v5301_v23  ;;  %1685 = vmatprep.subr.mxu0 %v1462_v10  ;;  %v6252_v23 = vpop.f32.mrf.mxu1 }
 0x11c   :  { %1721 = vmatprep.mubr.f32.mxu0 %v9732_v2  ;;  %v6203_v1 = vpop.permute.xlu1 %1292  ;;  %1686 = vmatpush1.msra.mxu0 %v1461_v11  ;;  %9831 = vst [vmem:[#allocation18_spill] sm:$0xff] %v6252_v23 }
 0x11d   :  { %9823 = vst [vmem:[#allocation10_spill] sm:$0xff] %v6203_v1  ;;  %1687 = vmatprep.subr.mxu0 %v1456_v13  ;;  %v6254_v24 = vpop.f32.mrf.mxu1  ;;  %v6316_v13 = vpop.f32.mrf.mxu0 }
 0x11e   :  { %1688 = vmatpush1.msra.mxu0 %v1455_v14  ;;  %9832 = vst [vmem:[#allocation19_spill] sm:$0xff] %v6254_v24  ;;  %v6318_v14 = vpop.permute.xlu0 %1078 }
 0x11f   :  { %1883 = vmatprep.subr.mxu0 %v1550_v15  ;;  %v6260_v35 = vpop.f32.mrf.mxu1  ;;  %v6322_v2 = vpop.f32.mrf.mxu0 }
 0x120   :  { %v6227_v12 = vpop.permute.xlu1 %1132  ;;  %9833 = vst [vmem:[#allocation20_spill] sm:$0xff] %v6260_v35 }
 0x121   :  { %v6266_v39 = vpop.f32.mrf.mxu1 }
 0x122   :  { %9835 = vst [vmem:[#allocation22_spill] sm:$0xff] %v6266_v39 }
 0x123   :  { %v6272_v43 = vpop.f32.mrf.mxu1 }
 0x124   :  { %v6240_v17 = vpop.permute.xlu1 %1184  ;;  %9837 = vst [vmem:[#allocation24_spill] sm:$0xff] %v6272_v43 }
 0x125   :  { %9825 = vst [vmem:[#allocation12_spill] sm:$0xff] %v6240_v17  ;;  %v6280_v49 = vpop.f32.mrf.mxu1 }
 0x126   :  { %9840 = vst [vmem:[#allocation27_spill] sm:$0xff] %v6280_v49 }
 0x127   :  { %v6286_v53 = vpop.f32.mrf.mxu1 }
 0x128   :  { %v6246_v20 = vpop.permute.xlu1 %1288  ;;  %9842 = vst [vmem:[#allocation29_spill] sm:$0xff] %v6286_v53 }
 0x129   :  { %9828 = vst [vmem:[#allocation15_spill] sm:$0xff] %v6246_v20  ;;  %v6292_v58 = vpop.f32.mrf.mxu1  ;;  %v6330_v20 = vpop.f32.mrf.mxu0 }
 0x12a   :  { %9844 = vst [vmem:[#allocation31_spill] sm:$0xff] %v6292_v58  ;;  %9853 = vst [vmem:[#allocation40_spill] sm:$0xff] %v6330_v20 }
 0x12b   :  { %v6300_v63 = vpop.f32.mrf.mxu1 }
 0x12c   :  { %v6250_v22 = vpop.permute.xlu1 %1340  ;;  %9846 = vst [vmem:[#allocation33_spill] sm:$0xff] %v6300_v63  ;;  %v993_v63 = vlaneseq }
 0x12d   :  { %9830 = vst [vmem:[#allocation17_spill] sm:$0xff] %v6250_v22  ;;  %v6306_v7 = vpop.f32.mrf.mxu1 }
 0x12e   :  { %9847 = vst [vmem:[#allocation34_spill] sm:$0xff] %v6306_v7 }
 0x12f   :  { %v6312_v10 = vpop.f32.mrf.mxu1 }
 0x130   :  { %v6256_v32 = vpop.permute.xlu1 %1128  ;;  %9848 = vst [vmem:[#allocation35_spill] sm:$0xff] %v6312_v10 }
 0x131   :  { %v6320_v15 = vpop.f32.mrf.mxu1 }
 0x132   :  { %9850 = vst [vmem:[#allocation37_spill] sm:$0xff] %v6320_v15 }
 0x133   :  { %v6326_v1 = vpop.f32.mrf.mxu1 }
 0x134   :  { %v6264_v37 = vpop.permute.xlu1 %1180  ;;  %9852 = vst [vmem:[#allocation39_spill] sm:$0xff] %v6326_v1 }
 0x135   :  { %9834 = vst [vmem:[#allocation21_spill] sm:$0xff] %v6264_v37  ;;  %v6332_v26 = vpop.f32.mrf.mxu1 }
 0x136   :  { %9854 = vst [vmem:[#allocation41_spill] sm:$0xff] %v6332_v26 }
 0x138   :  { %v6274_v45 = vpop.permute.xlu1 %1284 }
 0x139   :  { %9838 = vst [vmem:[#allocation25_spill] sm:$0xff] %v6274_v45  ;;  %v6336_v45 = vpop.f32.mrf.mxu0 }
 0x13a   :  { %9855 = vst [vmem:[#allocation42_spill] sm:$0xff] %v6336_v45 }
 0x13b   :  { %v6342_v15 = vpop.f32.mrf.mxu0 }
 0x13c   :  { %v6284_v52 = vpop.permute.xlu1 %1336  ;;  %9858 = vst [vmem:[#allocation45_spill] sm:$0xff] %v6342_v15 }
 0x13d   :  { %9841 = vst [vmem:[#allocation28_spill] sm:$0xff] %v6284_v52  ;;  %v6328_v52 = vpop.permute.xlu0 %1073  ;;  %v6350_v10 = vpop.f32.mrf.mxu0 }
 0x13e   :  { %9861 = vst [vmem:[#allocation48_spill] sm:$0xff] %v6350_v10  ;;  %v994_v10 = vshrl.u32 %v993_v63, 7 }
 0x13f   :  { %v6356_v7 = vpop.f32.mrf.mxu0 }
 0x140   :  { %v6294_v59 = vpop.permute.xlu1 %1124  ;;  %9864 = vst [vmem:[#allocation51_spill] sm:$0xff] %v6356_v7  ;;  %v6368_v49 = vsub.s32 0, %v994_v10  ;;  %v6390_v40 = vsub.s32 3, %v994_v10 }
 0x141   :  { %9845 = vst [vmem:[#allocation32_spill] sm:$0xff] %v6294_v59  ;;  %v6338_v47 = vpop.permute.xlu0 %1244 }
 0x142   :  { %9856 = vst [vmem:[#allocation43_spill] sm:$0xff] %v6338_v47  ;;  %9870 = vst [vmem:[#allocation57_spill] sm:$0xff] %v6368_v49 }
 0x144   :  { %v6304_v3 = vpop.permute.xlu1 %1176 }
 0x145   :  { %v6348_v1 = vpop.permute.xlu0 %1236 }
 0x146   :  { %9860 = vst [vmem:[#allocation47_spill] sm:$0xff] %v6348_v1  ;;  %v6364_v1 = vsub.s32 1, %v994_v10 }
 0x148   :  { %v6314_v11 = vpop.permute.xlu1 %1280  ;;  %9868 = vst [vmem:[#allocation55_spill] sm:$0xff] %v6364_v1 }
 0x149   :  { %9849 = vst [vmem:[#allocation36_spill] sm:$0xff] %v6314_v11  ;;  %v6340_v11 = vpop.f32.mrf.mxu1  ;;  %v6358_v25 = vpop.permute.xlu0 %1232 }
 0x14a   :  { %9857 = vst [vmem:[#allocation44_spill] sm:$0xff] %v6340_v11  ;;  %9865 = vst [vmem:[#allocation52_spill] sm:$0xff] %v6358_v25 }
 0x14c   :  { %v6324_v22 = vpop.permute.xlu1 %1332 }
 0x14d   :  { %9851 = vst [vmem:[#allocation38_spill] sm:$0xff] %v6324_v22  ;;  %v6346_v22 = vpop.f32.mrf.mxu1  ;;  %v6362_v53 = vpop.permute.xlu0 %1228 }
 0x14e   :  { %9859 = vst [vmem:[#allocation46_spill] sm:$0xff] %v6346_v22  ;;  %9867 = vst [vmem:[#allocation54_spill] sm:$0xff] %v6362_v53  ;;  %v6386_v53 = vsub.s32 2, %v994_v10 }
 0x14f   :  { %v6352_v31 = vpop.f32.mrf.mxu1 }
 0x150   :  { %v6334_v57 = vpop.permute.xlu1 %1120  ;;  %9862 = vst [vmem:[#allocation49_spill] sm:$0xff] %v6352_v31 }
 0x151   :  { %v6372_v43 = vpop.permute.xlu0 %1224 }
 0x152   :  { %9871 = vst [vmem:[#allocation58_spill] sm:$0xff] %v6372_v43  ;;  %v6402_v43 = vsub.s32 5, %v994_v10 }
 0x154   :  { %v6344_v41 = vpop.permute.xlu1 %1172  ;;  %9875 = vst [vmem:[#allocation62_spill] sm:$0xff] %v6402_v43 }
 0x158   :  { %v6354_v26 = vpop.permute.xlu1 %1276 }
 0x159   :  { %9863 = vst [vmem:[#allocation50_spill] sm:$0xff] %v6354_v26 }
 0x15c   :  { %v6360_v58 = vpop.permute.xlu1 %1328 }
 0x15d   :  { %9866 = vst [vmem:[#allocation53_spill] sm:$0xff] %v6360_v58  ;;  %v134_v58 = vld [vmem:[%s9714_s5] sm:$0x3f] }
 0x15e   :  { %v6379_v54 = vrot.slane %v134_v58, %v6364_v1  ;;  %v6384_v17 = vrot.slane %v134_v58, %v6368_v49 }
 0x160   :  { %v6366_v29 = vpop.permute.xlu1 %1220 }
 0x161   :  { %9869 = vst [vmem:[#allocation56_spill] sm:$0xff] %v6366_v29 }
 0x164   :  { %v6388_v16 = vpop.permute.xlu1 %1272 }
 0x165   :  { %9872 = vst [vmem:[#allocation59_spill] sm:$0xff] %v6388_v16 }
 0x19f   :  { %v719_v47 = vpop.f32.mrf.mxu0  ;;  %v832_v11 = vpop.f32.mrf.mxu1 }
 0x1a0   :  { %v720_v25 = vadd.f32 %v719_v47, %v6103_v27  ;;  %v6397_v27 = vpop.permute.xlu0 %1188 }
 0x1a1   :  { %v721_v21 = vpop.f32.mrf.mxu0  ;;  %v834_v6 = vpop.f32.mrf.mxu1  ;;  %9874 = vst [vmem:[#allocation61_spill] sm:$0xff] %v6397_v27  ;;  %v6411_v27 = vrot.slane %v134_v58, %v6390_v40 }
 0x1a2   :  { %v722_v63 = vadd.f32 %v721_v21, %v6105_v28 }
 0x1a3   :  { %v725_v22 = vpop.f32.mrf.mxu0  ;;  %v838_v23 = vpop.f32.mrf.mxu1 }
 0x1a4   :  { %v726_v28 = vadd.f32 %v725_v22, %v6109_v30  ;;  %v1024_v24 = vadd.f32 %v6379_v54, %v722_v63  ;;  %v1023_v30 = vadd.f32 %v6384_v17, %v720_v25  ;;  %v839_v22 = vadd.f32 %v838_v23, %v6270_v42  ;;  %v6422_v42 = vpop.permute.xlu1 %1216 }
 0x1a5   :  { %v727_v15 = vpop.f32.mrf.mxu0  ;;  %v840_v31 = vpop.f32.mrf.mxu1 }
 0x1a6   :  { %v728_v35 = vadd.f32 %v727_v15, %v6116_v33  ;;  %v6395_v15 = vsub.s32 4, %v994_v10  ;;  %v1151_v25 = vmul.f32 %v6334_v57, %v1024_v24  ;;  %v1111_v24 = vmul.f32 %v6328_v52, %v1023_v30 }
 0x1a7   :  { %v731_v26 = vpop.f32.mrf.mxu0  ;;  %v844_v7 = vpop.f32.mrf.mxu1 }
 0x1a8   :  { %9873 = vst [vmem:[#allocation60_spill] sm:$0xff] %v6395_v15  ;;  %v1030_v47 = vadd.f32 %v6379_v54, %v728_v35  ;;  %v732_v49 = vadd.f32 %v731_v26, %v6130_v38  ;;  %v1029_v35 = vadd.f32 %v6384_v17, %v726_v28  ;;  %v6420_v23 = vrot.slane %v134_v58, %v6395_v15 }
 0x1a9   :  { %v733_v19 = vpop.f32.mrf.mxu0  ;;  %v6370_v45 = vpop.f32.mrf.mxu1  ;;  %v1159_v15 = vadd.f32 %v1151_v25, %v1111_v24 }
 0x1aa   :  { %v734_v21 = vadd.f32 %v733_v19, %v6146_v44  ;;  %v833_v44 = vadd.f32 %v832_v11, %v6258_v34  ;;  %v6407_v19 = vrot.slane %v134_v58, %v6386_v53  ;;  %v845_v34 = vadd.f32 %v844_v7, %v6282_v51  ;;  %v6434_v7 = vpop.permute.xlu0 %1168 }
 0x1ab   :  { %v737_v39 = vpop.f32.mrf.mxu0  ;;  %v850_v18 = vpop.f32.mrf.mxu1  ;;  %v1152_v11 = vmul.f32 %v6294_v59, %v1030_v47  ;;  %v1035_v28 = vadd.f32 %v6384_v17, %v732_v49  ;;  %v1112_v47 = vmul.f32 %v6318_v14, %v1029_v35  ;;  %v847_v35 = vadd.f32 %v6370_v45, %v6290_v56 }
 0x1ac   :  { %v1036_v26 = vadd.f32 %v6379_v54, %v734_v21  ;;  %v738_v38 = vadd.f32 %v737_v39, %v6162_v50  ;;  %v6428_v50 = vrot.slane %v134_v58, %v6402_v43  ;;  %v841_v39 = vadd.f32 %v840_v31, %v6276_v46 }
 0x1ad   :  { %v739_v20 = vpop.f32.mrf.mxu0  ;;  %v852_v1 = vpop.f32.mrf.mxu1  ;;  %v851_v58 = vadd.f32 %v850_v18, %v6296_v60  ;;  %v1160_v46 = vadd.f32 %v1152_v11, %v1112_v47  ;;  %v1113_v59 = vmul.f32 %v6308_v8, %v1035_v28 }
 0x1ae   :  { %v740_v16 = vadd.f32 %v739_v20, %v6176_v55  ;;  %v835_v20 = vadd.f32 %v834_v6, %v6262_v36  ;;  %v1025_v6 = vadd.f32 %v6407_v19, %v833_v44  ;;  %v1031_v36 = vadd.f32 %v6407_v19, %v839_v22 }
 0x1af   :  { %v743_v33 = vpop.f32.mrf.mxu0  ;;  %v856_v55 = vpop.f32.mrf.mxu1  ;;  %v1153_v49 = vmul.f32 %v6256_v32, %v1036_v26  ;;  %v1037_v44 = vadd.f32 %v6407_v19, %v845_v34  ;;  %v1032_v25 = vadd.f32 %v6411_v27, %v841_v39  ;;  %v1043_v11 = vadd.f32 %v6407_v19, %v851_v58 }
 0x1b0   :  { %v1042_v21 = vadd.f32 %v6379_v54, %v740_v16  ;;  %v1041_v16 = vadd.f32 %v6384_v17, %v738_v38  ;;  %v1026_v30 = vadd.f32 %v6411_v27, %v835_v20  ;;  %v6449_v38 = vpop.permute.xlu1 %1268  ;;  %v1199_v18 = vmul.f32 %v6434_v7, %v1025_v6 }
 0x1b1   :  { %v745_v63 = vpop.f32.mrf.mxu0  ;;  %v858_v43 = vpop.f32.mrf.mxu1  ;;  %9876 = vst [vmem:[#allocation63_spill] sm:$0xff] %v6449_v38  ;;  %v1200_v60 = vmul.f32 %v6344_v41, %v1031_v36  ;;  %v1161_v20 = vadd.f32 %v1153_v49, %v1113_v59  ;;  %v853_v45 = vadd.f32 %v852_v1, %v6302_v0  ;;  %v1201_v59 = vmul.f32 %v6304_v3, %v1037_v44 }
 0x1b2   :  { %v746_v22 = vadd.f32 %v745_v63, %v6208_v5  ;;  %v1154_v26 = vmul.f32 %v6227_v12, %v1042_v21  ;;  %v744_v5 = vadd.f32 %v743_v33, %v6192_v61  ;;  %v1114_v34 = vmul.f32 %v6298_v62, %v1041_v16  ;;  %v6465_v61 = vpop.permute.xlu0 %1324 }
 0x1b3   :  { %v749_v10 = vpop.f32.mrf.mxu0  ;;  %v862_v56 = vpop.f32.mrf.mxu1  ;;  %v1207_v28 = vadd.f32 %v1199_v18, %v1159_v15  ;;  %v857_v21 = vadd.f32 %v856_v55, %v6310_v9  ;;  %v859_v6 = vadd.f32 %v858_v43, %v6316_v13  ;;  %9877 = vst [vmem:[#allocation64_spill] sm:$0xff] %v6465_v61  ;;  %v1208_v33 = vadd.f32 %v1200_v60, %v1160_v46 }
 0x1b4   :  { %v1048_v24 = vadd.f32 %v6379_v54, %v746_v22  ;;  %v1038_v39 = vadd.f32 %v6411_v27, %v847_v35  ;;  %v1162_v47 = vadd.f32 %v1154_v26, %v1114_v34  ;;  %v1247_v1 = vmul.f32 %v6422_v42, %v1026_v30  ;;  %v6478_v44 = vpop.permute.xlu1 %1264  ;;  %v9879_v26 = vld [vmem:[#allocation58_spill] sm:$0xff] }
 0x1b5   :  { %v751_v51 = vpop.f32.mrf.mxu0  ;;  %v1248_v0 = vmul.f32 %v6366_v29, %v1032_v25  ;;  %v1047_v9 = vadd.f32 %v6384_v17, %v744_v5  ;;  %v750_v15 = vadd.f32 %v749_v10, %v6222_v4  ;;  %v1209_v43 = vadd.f32 %v1201_v59, %v1161_v20  ;;  %v864_v58 = vpop.f32.mrf.mxu1  ;;  %9878 = vst [vmem:[#allocation65_spill] sm:$0xff] %v6478_v44  ;;  %v9880_v25 = vld [vmem:[#allocation19_spill] sm:$0xff] }
 0x1b6   :  { %v1202_v13 = vmul.f32 %v6264_v37, %v1043_v11  ;;  %v1044_v49 = vadd.f32 %v6411_v27, %v853_v45  ;;  %v863_v16 = vadd.f32 %v862_v56, %v6322_v2  ;;  %v1255_v22 = vadd.f32 %v1247_v1, %v1207_v28  ;;  %v9881_v20 = vld [vmem:[#allocation7_spill] sm:$0xff]  ;;  %v9883_v56 = vld [vmem:[#allocation40_spill] sm:$0xff]  ;;  %v6489_v59 = vpop.permute.xlu0 %1320 }
 0x1b7   :  { %v6443_v31 = vpop.f32.mrf.mxu0  ;;  %v1049_v30 = vadd.f32 %v6407_v19, %v857_v21  ;;  %v1155_v46 = vmul.f32 %v6157_v48, %v1048_v24  ;;  %v1050_v35 = vadd.f32 %v6411_v27, %v859_v6  ;;  %v1256_v10 = vadd.f32 %v1248_v0, %v1208_v33  ;;  %v9882_v11 = vld [vmem:[#allocation11_spill] sm:$0xff]  ;;  %9884 = vst [vmem:[#allocation19_spill] sm:$0xff] %v6489_v59  ;;  %v9885_v6 = vld [vmem:[#allocation54_spill] sm:$0xff]  ;;  %v9886_v0 = vld [vmem:[#allocation12_spill] sm:$0xff] }
 0x1b8   :  { %v1249_v18 = vmul.f32 %v9879_v26, %v1038_v39  ;;  %v1210_v60 = vadd.f32 %v1202_v13, %v1162_v47  ;;  %v1115_v34 = vmul.f32 %v9881_v20, %v1047_v9  ;;  %v1053_v2 = vadd.f32 %v6384_v17, %v750_v15  ;;  %v868_v47 = vpop.f32.mrf.mxu1  ;;  %v9887_v15 = vld [vmem:[#allocation52_spill] sm:$0xff]  ;;  %v6505_v20 = vpop.permute.xlu1 %1312 }
 0x1b9   :  { %v6455_v63 = vpop.f32.mrf.mxu0  ;;  %v752_v45 = vadd.f32 %v751_v51, %v9882_v11  ;;  %v865_v28 = vadd.f32 %v864_v58, %v9883_v56  ;;  %v1250_v33 = vmul.f32 %v9885_v6, %v1044_v49  ;;  %v1055_v39 = vadd.f32 %v6407_v19, %v863_v16  ;;  %v9888_v51 = vld [vmem:[#allocation20_spill] sm:$0xff]  ;;  %v9889_v56 = vld [vmem:[#allocation13_spill] sm:$0xff]  ;;  %9891 = vst [vmem:[#allocation11_spill] sm:$0xff] %v6505_v20 }
 0x1ba   :  { %v6491_v24 = vadd.f32 %v1249_v18, %v1209_v43  ;;  %v1203_v9 = vmul.f32 %v9886_v0, %v1049_v30  ;;  %v1163_v13 = vadd.f32 %v1155_v46, %v1115_v34  ;;  %v756_v43 = vadd.f32 %v6443_v31, %v9889_v56  ;;  %v9890_v18 = vld [vmem:[#allocation22_spill] sm:$0xff] }
 0x1bb   :  { %v6463_v36 = vpop.f32.mrf.mxu0  ;;  %v6499_v11 = vadd.f32 %v1250_v33, %v1210_v60  ;;  %v1054_v30 = vadd.f32 %v6379_v54, %v752_v45  ;;  %v1056_v46 = vadd.f32 %v6411_v27, %v865_v28  ;;  %v9893_v60 = vld [vmem:[#allocation61_spill] sm:$0xff]  ;;  %v870_v33 = vpop.f32.mrf.mxu1 }
 0x1bc   :  { %v1211_v56 = vadd.f32 %v1203_v9, %v1163_v13  ;;  %v9900_v13 = vld [vmem:[#allocation47_spill] sm:$0xff] }
 0x1bd   :  { %v6473_v55 = vpop.f32.mrf.mxu0 }
 0x1bf   :  { %v945_v4 = vpop.f32.mrf.mxu0 }
 0x1c0   :  { %v946_v5 = vadd.f32 %v945_v4, %v9880_v25  ;;  %v1251_v4 = vmul.f32 %v9887_v15, %v1050_v35  ;;  %v9964_v15 = vld [vmem:[#allocation57_spill] sm:$0xff] }
 0x1c1   :  { %v947_v21 = vpop.f32.mrf.mxu0 }
 0x1c2   :  { %v1027_v1 = vadd.f32 %v6420_v23, %v946_v5  ;;  %v948_v25 = vadd.f32 %v947_v21, %v9888_v51  ;;  %v9892_v5 = vld [vmem:[#allocation30_spill] sm:$0xff]  ;;  %v6512_v21 = vmul.f32 %v9893_v60, %v1055_v39  ;;  %v9894_v51 = vld [vmem:[#allocation24_spill] sm:$0xff]  ;;  %v1059_v39 = vadd.f32 %v6384_v17, %v756_v43 }
 0x1c3   :  { %v951_v58 = vpop.f32.mrf.mxu0  ;;  %v1116_v48 = vmul.f32 %v9892_v5, %v1053_v2  ;;  %v9896_v2 = vld [vmem:[#allocation14_spill] sm:$0xff]  ;;  %v1549_v43 = vld [vmem:[%s9713_s7 + $0x2f0] sm:$0xff] }
 0x1c4   :  { %v1295_v49 = vmul.f32 %v6478_v44, %v1027_v1  ;;  %v952_v16 = vadd.f32 %v951_v58, %v9890_v18  ;;  %v1028_v35 = vadd.f32 %v6428_v50, %v948_v25  ;;  %v9895_v18 = vld [vmem:[#allocation42_spill] sm:$0xff]  ;;  %v758_v45 = vadd.f32 %v6455_v63, %v9896_v2  ;;  %v6520_v25 = vpop.permute.xlu0 %1316 }
 0x1c5   :  { %v953_v34 = vpop.f32.mrf.mxu0  ;;  %v869_v44 = vadd.f32 %v868_v47, %v9895_v18  ;;  %9897 = vst [vmem:[#allocation40_spill] sm:$0xff] %v6520_v25  ;;  %v6528_v47 = vmul.f32 %v9900_v13, %v1056_v46  ;;  %v6542_v46 = vadd.f32 %v1251_v4, %v1211_v56  ;;  %v9905_v56 = vld [vmem:[#allocation31_spill] sm:$0xff] }
 0x1c6   :  { %v1033_v31 = vadd.f32 %v6420_v23, %v952_v16  ;;  %v1303_v1 = vadd.f32 %v1295_v49, %v1255_v22  ;;  %v954_v58 = vadd.f32 %v953_v34, %v9894_v51  ;;  %v1343_v28 = vmul.f32 %v6505_v20, %v1028_v35  ;;  %v9898_v22 = vld [vmem:[#allocation27_spill] sm:$0xff]  ;;  %v9899_v34 = vld [vmem:[#allocation5_spill] sm:$0xff] }
 0x1c7   :  { %v957_v5 = vpop.f32.mrf.mxu0  ;;  %v1156_v9 = vmul.f32 %v9899_v34, %v1054_v30  ;;  %v9901_v51 = vld [vmem:[#allocation45_spill] sm:$0xff]  ;;  %v1544_v30 = vld [vmem:[%s9713_s7 + $0x2c8] sm:$0xff] }
 0x1c8   :  { %v1296_v60 = vmul.f32 %v6449_v38, %v1033_v31  ;;  %v1034_v16 = vadd.f32 %v6428_v50, %v954_v58  ;;  %v958_v49 = vadd.f32 %v957_v5, %v9898_v22  ;;  %v871_v63 = vadd.f32 %v870_v33, %v9901_v51  ;;  %v9902_v5 = vld [vmem:[#allocation29_spill] sm:$0xff] }
 0x1c9   :  { %v6531_v18 = vadd.f32 %v1343_v28, %v1303_v1  ;;  %v959_v35 = vpop.f32.mrf.mxu0  ;;  %v1061_v33 = vadd.f32 %v6407_v19, %v869_v44  ;;  %v1060_v1 = vadd.f32 %v6379_v54, %v758_v45  ;;  %v9903_v28 = vld [vmem:[#allocation18_spill] sm:$0xff] }
 0x1ca   :  { %v1304_v2 = vadd.f32 %v1296_v60, %v1256_v10  ;;  %v1039_v31 = vadd.f32 %v6420_v23, %v958_v49  ;;  %v1344_v58 = vmul.f32 %v6520_v25, %v1034_v16  ;;  %v960_v22 = vadd.f32 %v959_v35, %v9902_v5  ;;  %v1543_v60 = vld [vmem:[%s9713_s7 + $0x2c0] sm:$0xff]  ;;  %v9904_v16 = vld [vmem:[#allocation59_spill] sm:$0xff]  ;;  %v9907_v25 = vld [vmem:[#allocation16_spill] sm:$0xff] }
 0x1cb   :  { %v764_v51 = vadd.f32 %v6473_v55, %v9903_v28  ;;  %1722 = vmatmul.mubr.f32.vlgmr.msra.gmra.mxu0 %v6531_v18  ;;  %v963_v10 = vpop.f32.mrf.mxu0  ;;  %v1538_v55 = vld [vmem:[%s9713_s7 + $0x298] sm:$0xff]  ;;  %v9906_v45 = vld [vmem:[#allocation2_spill] sm:$0xff]  ;;  %v6562_v28 = vadd.f32 %v6411_v27, %v871_v63  ;;  %v762_v34 = vadd.f32 %v6463_v36, %v9907_v25  ;;  %v1532_v36 = vld [vmem:[%s9713_s7 + $0x268] sm:$0xff]  ;;  %v1164_v25 = vadd.f32 %v1156_v9, %v1116_v48 }
 0x1cc   :  { %v1297_v49 = vmul.f32 %v9904_v16, %v1039_v31  ;;  %v6553_v35 = vadd.f32 %v1344_v58, %v1304_v2  ;;  %v1040_v4 = vadd.f32 %v6428_v50, %v960_v22  ;;  %v964_v44 = vadd.f32 %v963_v10, %v9905_v56  ;;  %1884 = vmatpush1.msra.mxu0 %v1549_v43  ;;  %v1537_v43 = vld [vmem:[%s9713_s7 + $0x290] sm:$0xff]  ;;  %v874_v58 = vpop.f32.mrf.mxu1  ;;  %v9909_v63 = vld [vmem:[#allocation33_spill] sm:$0xff]  ;;  %v9913_v9 = vld [vmem:[#allocation6_spill] sm:$0xff] }
 0x1cd   :  { %v1117_v5 = vmul.f32 %v9906_v45, %v1059_v39  ;;  %1885 = vmatprep.subr.mxu0 %v1544_v30  ;;  %v965_v2 = vpop.f32.mrf.mxu0  ;;  %v9908_v31 = vmov 0.0   ;;  %v9910_v30 = vld [vmem:[#allocation3_spill] sm:$0xff]  ;;  %v1066_v16 = vadd.f32 %v6379_v54, %v764_v51  ;;  %v1526_v54 = vld [vmem:[%s9713_s7 + $0x238] sm:$0xff]  ;;  %v1065_v51 = vadd.f32 %v6384_v17, %v762_v34 }
 0x1ce   :  { %1727 = vmatprep.mubr.f32.mxu0 %v9908_v31  ;;  %v1305_v22 = vadd.f32 %v1297_v49, %v6491_v24  ;;  %v1345_v10 = vmul.f32 %v6489_v59, %v1040_v4  ;;  %v1045_v39 = vadd.f32 %v6420_v23, %v964_v44  ;;  %v966_v56 = vadd.f32 %v965_v2, %v9909_v63  ;;  %v1531_v49 = vld [vmem:[%s9713_s7 + $0x260] sm:$0xff]  ;;  %v1520_v17 = vld [vmem:[%s9713_s7 + $0x208] sm:$0xff] }
 0x1cf   :  { %1886 = vmatpush1.msra.mxu0 %v1543_v60  ;;  %v1157_v45 = vmul.f32 %v9910_v30, %v1060_v1  ;;  %v969_v24 = vpop.f32.mrf.mxu0  ;;  %v9911_v60 = vld [vmem:[#allocation50_spill] sm:$0xff]  ;;  %v1205_v1 = vmul.f32 %v9913_v9, %v1061_v33  ;;  %v9915_v33 = vld [vmem:[#allocation35_spill] sm:$0xff]  ;;  %v1212_v34 = vadd.f32 %v6512_v21, %v1164_v25  ;;  %v1514_v21 = vld [vmem:[%s9713_s7 + $0x1d8] sm:$0xff] }
 0x1d0   :  { %1728 = vmatmul.mubr.f32.gmra.mxu0 %v6553_v35  ;;  %1887 = vmatprep.subr.mxu0 %v1538_v55  ;;  %v6583_v4 = vadd.f32 %v1345_v10, %v1305_v22  ;;  %v1298_v44 = vmul.f32 %v9911_v60, %v1045_v39  ;;  %v1046_v2 = vadd.f32 %v6428_v50, %v966_v56  ;;  %v9912_v63 = vld [vmem:[#allocation34_spill] sm:$0xff]  ;;  %v9914_v55 = vld [vmem:[#allocation48_spill] sm:$0xff]  ;;  %v876_v39 = vpop.f32.mrf.mxu1  ;;  %v9920_v25 = vld [vmem:[#allocation51_spill] sm:$0xff] }
 0x1d1   :  { %v970_v48 = vadd.f32 %v969_v24, %v9912_v63  ;;  %1888 = vmatpush1.msra.mxu0 %v1537_v43  ;;  %v875_v30 = vadd.f32 %v874_v58, %v9914_v55  ;;  %v971_v22 = vpop.f32.mrf.mxu0  ;;  %1733 = vmatprep.mubr.f32.mxu0 %v9908_v31  ;;  %v1525_v10 = vld [vmem:[%s9713_s7 + $0x230] sm:$0xff]  ;;  %v1165_v58 = vadd.f32 %v1157_v45, %v1117_v5 }
 0x1d2   :  { %1889 = vmatprep.subr.mxu0 %v1532_v36  ;;  %v1306_v43 = vadd.f32 %v1298_v44, %v6499_v11  ;;  %v1346_v56 = vmul.f32 %v6465_v61, %v1046_v2  ;;  %v972_v63 = vadd.f32 %v971_v22, %v9915_v33  ;;  %v9916_v36 = vld [vmem:[#allocation23_spill] sm:$0xff]  ;;  %v1519_v44 = vld [vmem:[%s9713_s7 + $0x200] sm:$0xff]  ;;  %v9918_v33 = vld [vmem:[#allocation37_spill] sm:$0xff] }
 0x1d3   :  { %v1051_v24 = vadd.f32 %v6420_v23, %v970_v48  ;;  %1890 = vmatpush1.msra.mxu0 %v1531_v49  ;;  %v1158_v55 = vmul.f32 %v9916_v36, %v1066_v16  ;;  %v975_v11 = vpop.f32.mrf.mxu0  ;;  %v9917_v49 = vld [vmem:[#allocation36_spill] sm:$0xff]  ;;  %v9919_v16 = vld [vmem:[#allocation26_spill] sm:$0xff]  ;;  %v1067_v5 = vadd.f32 %v6407_v19, %v875_v30  ;;  %v1508_v19 = vld [vmem:[%s9713_s7 + $0x1a8] sm:$0xff]  ;;  %v1260_v30 = vadd.f32 %v6528_v47, %v1212_v34 }
 0x1d4   :  { %1734 = vmatmul.mubr.f32.gmra.mxu0 %v6583_v4  ;;  %1891 = vmatprep.subr.mxu0 %v1526_v54  ;;  %v6611_v2 = vadd.f32 %v1346_v56, %v1306_v43  ;;  %v1052_v22 = vadd.f32 %v6428_v50, %v972_v63  ;;  %v976_v61 = vadd.f32 %v975_v11, %v9918_v33  ;;  %v1513_v56 = vld [vmem:[%s9713_s7 + $0x1d0] sm:$0xff]  ;;  %v9922_v33 = vld [vmem:[#allocation39_spill] sm:$0xff]  ;;  %v1502_v47 = vld [vmem:[%s9713_s7 + $0x178] sm:$0xff] }
 0x1d5   :  { %v1299_v48 = vmul.f32 %v9917_v49, %v1051_v24  ;;  %1892 = vmatpush1.msra.mxu0 %v1525_v10  ;;  %v1118_v45 = vmul.f32 %v9919_v16, %v1065_v51  ;;  %v877_v54 = vadd.f32 %v876_v39, %v9920_v25  ;;  %v977_v43 = vpop.f32.mrf.mxu0  ;;  %1739 = vmatprep.mubr.f32.mxu0 %v9908_v31  ;;  %v9921_v24 = vld [vmem:[#allocation53_spill] sm:$0xff] }
 0x1d6   :  { %1893 = vmatprep.subr.mxu0 %v1520_v17  ;;  %v1347_v63 = vmul.f32 %v9921_v24, %v1052_v22  ;;  %v1057_v11 = vadd.f32 %v6420_v23, %v976_v61  ;;  %v978_v51 = vadd.f32 %v977_v43, %v9922_v33  ;;  %v1213_v39 = vadd.f32 %v1205_v1, %v1165_v58  ;;  %v9924_v43 = vld [vmem:[#allocation41_spill] sm:$0xff]  ;;  %v9926_v58 = vld [vmem:[#allocation4_spill] sm:$0xff] }
 0x1d7   :  { %v1307_v10 = vadd.f32 %v1299_v48, %v6542_v46  ;;  %1894 = vmatpush1.msra.mxu0 %v1519_v44  ;;  %v1166_v17 = vadd.f32 %v1158_v55, %v1118_v45  ;;  %v981_v25 = vpop.f32.mrf.mxu0  ;;  %v1507_v46 = vld [vmem:[%s9713_s7 + $0x1a0] sm:$0xff]  ;;  %v9923_v48 = vld [vmem:[#allocation25_spill] sm:$0xff]  ;;  %v1206_v55 = vmul.f32 %v9926_v58, %v1067_v5 }
 0x1d8   :  { %1740 = vmatmul.mubr.f32.gmra.mxu0 %v6611_v2  ;;  %1895 = vmatprep.subr.mxu0 %v1514_v21  ;;  %v1300_v44 = vmul.f32 %v9923_v48, %v1057_v11  ;;  %v1058_v22 = vadd.f32 %v6428_v50, %v978_v51  ;;  %v982_v33 = vadd.f32 %v981_v25, %v9924_v43  ;;  %v9925_v1 = vld [vmem:[#allocation9_spill] sm:$0xff]  ;;  %v9928_v25 = vld [vmem:[#allocation44_spill] sm:$0xff] }
 0x1d9   :  { %v6638_v61 = vadd.f32 %v1347_v63, %v1307_v10  ;;  %1896 = vmatpush1.msra.mxu0 %v1513_v56  ;;  %v1253_v34 = vmul.f32 %v9925_v1, %v6562_v28  ;;  %v1068_v21 = vadd.f32 %v6411_v27, %v877_v54  ;;  %v983_v45 = vpop.f32.mrf.mxu0  ;;  %1745 = vmatprep.mubr.f32.mxu0 %v9908_v31  ;;  %v1501_v10 = vld [vmem:[%s9713_s7 + $0x170] sm:$0xff]  ;;  %v9927_v63 = vld [vmem:[#allocation38_spill] sm:$0xff]  ;;  %v1496_v27 = vld [vmem:[%s9713_s7 + $0x148] sm:$0xff] }
 0x1da   :  { %1897 = vmatprep.subr.mxu0 %v1508_v19  ;;  %v1308_v56 = vadd.f32 %v1300_v44, %v1260_v30  ;;  %v1348_v11 = vmul.f32 %v9927_v63, %v1058_v22  ;;  %v1063_v51 = vadd.f32 %v6420_v23, %v982_v33  ;;  %v984_v43 = vadd.f32 %v983_v45, %v9928_v25  ;;  %v1495_v19 = vld [vmem:[%s9713_s7 + $0x140] sm:$0xff]  ;;  %v9929_v44 = vld [vmem:[#allocation15_spill] sm:$0xff] }
 0x1db   :  { %1898 = vmatpush1.msra.mxu0 %v1507_v46  ;;  %v1261_v28 = vadd.f32 %v1253_v34, %v1213_v39  ;;  %v1214_v5 = vadd.f32 %v1206_v55, %v1166_v17  ;;  %v987_v54 = vpop.f32.mrf.mxu0  ;;  %v9930_v33 = vld [vmem:[#allocation46_spill] sm:$0xff]  ;;  %v1490_v39 = vld [vmem:[%s9713_s7 + $0x118] sm:$0xff]  ;;  %v9931_v17 = vld [vmem:[#allocation43_spill] sm:$0xff] }
 0x1dc   :  { %1746 = vmatmul.mubr.f32.gmra.mxu0 %v6638_v61  ;;  %1899 = vmatprep.subr.mxu0 %v1502_v47  ;;  %v6664_v30 = vadd.f32 %v1348_v11, %v1308_v56  ;;  %v1301_v22 = vmul.f32 %v9929_v44, %v1063_v51  ;;  %v1064_v46 = vadd.f32 %v6428_v50, %v984_v43  ;;  %v1489_v55 = vld [vmem:[%s9713_s7 + $0x110] sm:$0xff] }
 0x1dd   :  { %v988_v45 = vadd.f32 %v987_v54, %v9930_v33  ;;  %1900 = vmatpush1.msra.mxu0 %v1501_v10  ;;  %v1254_v47 = vmul.f32 %v9931_v17, %v1068_v21  ;;  %v989_v34 = vpop.f32.mrf.mxu0  ;;  %1751 = vmatprep.mubr.f32.mxu0 %v9908_v31  ;;  %v9932_v11 = vld [vmem:[#allocation28_spill] sm:$0xff]  ;;  %v9933_v10 = vld [vmem:[#allocation49_spill] sm:$0xff]  ;;  %v1484_v21 = vld [vmem:[%s9713_s7 + $0xe8] sm:$0xff] }
 0x1de   :  { %1901 = vmatprep.subr.mxu0 %v1496_v27  ;;  %v1309_v56 = vadd.f32 %v1301_v22, %v1261_v28  ;;  %v1349_v51 = vmul.f32 %v9932_v11, %v1064_v46  ;;  %v990_v43 = vadd.f32 %v989_v34, %v9933_v10  ;;  %v1483_v54 = vld [vmem:[%s9713_s7 + $0xe0] sm:$0xff]  ;;  %v1548_v10 = vld [vmem:[%s9713_s7 + $0x2e8] sm:$0xff] }
 0x1df   :  { %v1069_v25 = vadd.f32 %v6420_v23, %v988_v45  ;;  %1902 = vmatpush1.msra.mxu0 %v1495_v19  ;;  %v1262_v27 = vadd.f32 %v1254_v47, %v1214_v5  ;;  %v9934_v22 = vld [vmem:[#allocation10_spill] sm:$0xff]  ;;  %v1478_v5 = vld [vmem:[%s9713_s7 + $0xb8] sm:$0xff]  ;;  %v1477_v19 = vld [vmem:[%s9713_s7 + $0xb0] sm:$0xff] }
 0x1e0   :  { %1752 = vmatmul.mubr.f32.gmra.mxu0 %v6664_v30  ;;  %1903 = vmatprep.subr.mxu0 %v1490_v39  ;;  %v6687_v28 = vadd.f32 %v1349_v51, %v1309_v56  ;;  %v1070_v23 = vadd.f32 %v6428_v50, %v990_v43  ;;  %v9935_v45 = vld [vmem:[#allocation17_spill] sm:$0xff]  ;;  %v1472_v50 = vld [vmem:[%s9713_s7 + $0x88] sm:$0xff]  ;;  %v1471_v47 = vld [vmem:[%s9713_s7 + $0x80] sm:$0xff] }
 0x1e1   :  { %v1302_v46 = vmul.f32 %v9934_v22, %v1069_v25  ;;  %1904 = vmatpush1.msra.mxu0 %v1489_v55  ;;  %1757 = vmatprep.mubr.f32.mxu0 %v9908_v31  ;;  %v1466_v55 = vld [vmem:[%s9713_s7 + $0x58] sm:$0xff]  ;;  %v1465_v56 = vld [vmem:[%s9713_s7 + $0x50] sm:$0xff]  ;;  %v1460_v51 = vld [vmem:[%s9713_s7 + $0x28] sm:$0xff] }
 0x1e2   :  { %1905 = vmatprep.subr.mxu0 %v1484_v21  ;;  %v1350_v39 = vmul.f32 %v9935_v45, %v1070_v23  ;;  %v1459_v25 = vld [vmem:[%s9713_s7 + $0x20] sm:$0xff]  ;;  %v1542_v21 = vld [vmem:[%s9713_s7 + $0x2b8] sm:$0xff] }
 0x1e3   :  { %v1310_v33 = vadd.f32 %v1302_v46, %v1262_v27  ;;  %1906 = vmatpush1.msra.mxu0 %v1483_v54  ;;  %v1547_v43 = vld [vmem:[%s9713_s7 + $0x2e0] sm:$0xff]  ;;  %v5516_v27 = vld [vmem:[%s9812_s25 + $0x8] sm:$0xff]  ;;  %v1541_v54 = vld [vmem:[%s9713_s7 + $0x2b0] sm:$0xff] }
 0x1e4   :  { %1758 = vmatmul.mubr.f32.gmra.mxu0 %v6687_v28  ;;  %1907 = vmatprep.subr.mxu0 %v1478_v5  ;;  %v1536_v46 = vld [vmem:[%s9713_s7 + $0x288] sm:$0xff]  ;;  %v1535_v23 = vld [vmem:[%s9713_s7 + $0x280] sm:$0xff]  ;;  %v5517_v5 = vld [vmem:[%s9812_s25 + $0x10] sm:$0xff] }
 0x1e5   :  { %v6706_v34 = vadd.f32 %v1350_v39, %v1310_v33  ;;  %1908 = vmatpush1.msra.mxu0 %v1477_v19  ;;  %1763 = vmatprep.mubr.f32.mxu0 %v9908_v31  ;;  %v1530_v19 = vld [vmem:[%s9713_s7 + $0x258] sm:$0xff]  ;;  %v1529_v39 = vld [vmem:[%s9713_s7 + $0x250] sm:$0xff] }
 0x1e6   :  { %1909 = vmatprep.subr.mxu0 %v1472_v50  ;;  %v5518_v33 = vld [vmem:[%s9812_s25 + $0x18] sm:$0xff]  ;;  %v1524_v50 = vld [vmem:[%s9713_s7 + $0x228] sm:$0xff] }
 0x1e7   :  { %1910 = vmatpush1.msra.mxu0 %v1471_v47  ;;  %5302 = vmatprep.subr.mxu1 %v6706_v34  ;;  %v1523_v47 = vld [vmem:[%s9713_s7 + $0x220] sm:$0xff] }
 0x1e8   :  { %1764 = vmatmul.mubr.f32.gmra.mxu0 %v6706_v34  ;;  %1911 = vmatprep.subr.mxu0 %v1466_v55  ;;  %v1518_v55 = vld [vmem:[%s9713_s7 + $0x1f8] sm:$0xff] }
 0x1e9   :  { %5303 = vmatpush3.msra.mxu1 %v6706_v34  ;;  %1912 = vmatpush1.msra.mxu0 %v1465_v56  ;;  %v5519_v56 = vld [vmem:[%s9812_s25 + $0x20] sm:$0xff] }
 0x1ea   :  { %5304 = vmatprep.subr.mxu1 %v6687_v28  ;;  %1913 = vmatprep.subr.mxu0 %v1460_v51  ;;  %v1517_v51 = vld [vmem:[%s9713_s7 + $0x1f0] sm:$0xff] }
 0x1eb   :  { %5305 = vmatpush3.msra.mxu1 %v6687_v28  ;;  %1914 = vmatpush1.msra.mxu0 %v1459_v25  ;;  %v5520_v25 = vld [vmem:[%s9812_s25 + $0x28] sm:$0xff] }
 0x1ec   :  { %1947 = vmatprep.mubr.f32.mxu0 %v9908_v31  ;;  %5306 = vmatprep.subr.mxu1 %v6664_v30 }
 0x1ed   :  { %1948 = vmatmul.mubr.f32.vlgmr.msra.gmra.mxu0 %v6531_v18  ;;  %5307 = vmatpush3.msra.mxu1 %v6664_v30 }
 0x1ee   :  { %5308 = vmatprep.subr.mxu1 %v6638_v61  ;;  %1953 = vmatprep.mubr.f32.mxu0 %v9908_v31 }
 0x1ef   :  { %5309 = vmatpush3.msra.mxu1 %v6638_v61 }
 0x1f0   :  { %5310 = vmatprep.subr.mxu1 %v6611_v2 }
 0x1f1   :  { %1954 = vmatmul.mubr.f32.gmra.mxu0 %v6553_v35  ;;  %5311 = vmatpush3.msra.mxu1 %v6611_v2 }
 0x1f2   :  { %5312 = vmatprep.subr.mxu1 %v6583_v4  ;;  %1959 = vmatprep.mubr.f32.mxu0 %v9908_v31 }
 0x1f3   :  { %5313 = vmatpush3.msra.mxu1 %v6583_v4 }
 0x1f4   :  { %5314 = vmatprep.subr.mxu1 %v6553_v35 }
 0x1f5   :  { %1960 = vmatmul.mubr.f32.gmra.mxu0 %v6583_v4  ;;  %5315 = vmatpush3.msra.mxu1 %v6553_v35 }
 0x1f6   :  { %5316 = vmatprep.subr.mxu1 %v6531_v18  ;;  %1965 = vmatprep.mubr.f32.mxu0 %v9908_v31 }
 0x1f7   :  { %5317 = vmatpush3.msra.mxu1 %v6531_v18 }
 0x1f8   :  { %5319 = vmatmul.mubr.msk.f32.vlgmr.msra.gmra.mxu1 %vm135_vm0, %v5516_v27  ;;  %1770 = vmatprep.subr.mxu1 %v1548_v10  ;;  %v1512_v10 = vld [vmem:[%s9713_s7 + $0x1c8] sm:$0xff]  ;;  %v5521_v27 = vld [vmem:[%s9812_s25 + $0x30] sm:$0xff] }
 0x1f9   :  { %1966 = vmatmul.mubr.f32.gmra.mxu0 %v6611_v2  ;;  %1771 = vmatpush1.msra.mxu1 %v1547_v43  ;;  %v1511_v43 = vld [vmem:[%s9713_s7 + $0x1c0] sm:$0xff] }
 0x1fa   :  { %1772 = vmatprep.subr.mxu1 %v1542_v21  ;;  %1971 = vmatprep.mubr.f32.mxu0 %v9908_v31  ;;  %v1506_v21 = vld [vmem:[%s9713_s7 + $0x198] sm:$0xff] }
 0x1fb   :  { %1773 = vmatpush1.msra.mxu1 %v1541_v54  ;;  %5321 = vmatprep.mubr.msk.f32.mxu1 %vm135_vm0, %v5517_v5  ;;  %v1505_v54 = vld [vmem:[%s9713_s7 + $0x190] sm:$0xff]  ;;  %v1499_v5 = vld [vmem:[%s9713_s7 + $0x160] sm:$0xff] }
 0x1fc   :  { %1774 = vmatprep.subr.mxu1 %v1536_v46  ;;  %5322 = vmatmul.mubr.msk.f32.gmra.mxu1 %vm135_vm0, %v5518_v33  ;;  %v5522_v46 = vld [vmem:[%s9812_s25 + $0x38] sm:$0xff]  ;;  %v1493_v33 = vld [vmem:[%s9713_s7 + $0x130] sm:$0xff] }
 0x1fd   :  { %1972 = vmatmul.mubr.f32.gmra.mxu0 %v6638_v61  ;;  %1775 = vmatpush1.msra.mxu1 %v1535_v23  ;;  %v1500_v23 = vld [vmem:[%s9713_s7 + $0x168] sm:$0xff] }
 0x1fe   :  { %1776 = vmatprep.subr.mxu1 %v1530_v19  ;;  %1977 = vmatprep.mubr.f32.mxu0 %v9908_v31  ;;  %v1494_v19 = vld [vmem:[%s9713_s7 + $0x138] sm:$0xff] }
 0x1ff   :  { %1777 = vmatpush1.msra.mxu1 %v1529_v39  ;;  %5324 = vmatprep.mubr.msk.f32.mxu1 %vm135_vm0, %v5519_v56  ;;  %v1488_v39 = vld [vmem:[%s9713_s7 + $0x108] sm:$0xff] }
 0x200   :  { %1778 = vmatprep.subr.mxu1 %v1524_v50  ;;  %5325 = vmatmul.mubr.msk.f32.gmra.mxu1 %vm135_vm0, %v5520_v25  ;;  %v1487_v50 = vld [vmem:[%s9713_s7 + $0x100] sm:$0xff]  ;;  %v1476_v56 = vld [vmem:[%s9713_s7 + $0xa8] sm:$0xff]  ;;  %v1470_v25 = vld [vmem:[%s9713_s7 + $0x78] sm:$0xff] }
 0x201   :  { %1978 = vmatmul.mubr.f32.gmra.mxu0 %v6664_v30  ;;  %1779 = vmatpush1.msra.mxu1 %v1523_v47  ;;  %v1482_v47 = vld [vmem:[%s9713_s7 + $0xd8] sm:$0xff] }
 0x202   :  { %1780 = vmatprep.subr.mxu1 %v1518_v55  ;;  %1983 = vmatprep.mubr.f32.mxu0 %v9908_v31  ;;  %v1481_v55 = vld [vmem:[%s9713_s7 + $0xd0] sm:$0xff] }
 0x203   :  { %1781 = vmatpush1.msra.mxu1 %v1517_v51  ;;  %5327 = vmatprep.mubr.msk.f32.mxu1 %vm135_vm0, %v5521_v27  ;;  %v1475_v51 = vld [vmem:[%s9713_s7 + $0xa0] sm:$0xff]  ;;  %v1458_v27 = vld [vmem:[%s9713_s7 + $0x18] sm:$0xff] }
 0x204   :  { %1782 = vmatprep.subr.mxu1 %v1512_v10  ;;  %5328 = vmatmul.mubr.msk.f32.gmra.mxu1 %vm135_vm0, %v5522_v46  ;;  %v1469_v10 = vld [vmem:[%s9713_s7 + $0x70] sm:$0xff]  ;;  %v1450_v46 = vld [vmem:[%s9715_s6 + $0x2d8] sm:$0xff] }
 0x205   :  { %1984 = vmatmul.mubr.f32.gmra.mxu0 %v6687_v28  ;;  %1783 = vmatpush1.msra.mxu1 %v1511_v43  ;;  %v1464_v43 = vld [vmem:[%s9713_s7 + $0x48] sm:$0xff] }
 0x206   :  { %1784 = vmatprep.subr.mxu1 %v1506_v21  ;;  %1989 = vmatprep.mubr.f32.mxu0 %v9908_v31  ;;  %v1463_v21 = vld [vmem:[%s9713_s7 + $0x40] sm:$0xff] }
 0x207   :  { %1785 = vmatpush1.msra.mxu1 %v1505_v54  ;;  %1834 = vmatprep.mubr.f32.mxu1 %v9908_v31  ;;  %v1457_v54 = vld [vmem:[%s9713_s7 + $0x10] sm:$0xff] }
 0x208   :  { %1786 = vmatprep.subr.mxu1 %v1500_v23  ;;  %v1452_v23 = vld [vmem:[%s9715_s6 + $0x2e8] sm:$0xff] }
 0x209   :  { %1990 = vmatmul.mubr.f32.gmra.mxu0 %v6706_v34  ;;  %1787 = vmatpush1.msra.mxu1 %v1499_v5  ;;  %v1449_v5 = vld [vmem:[%s9715_s6 + $0x2d0] sm:$0xff] }
 0x20a   :  { %1788 = vmatprep.subr.mxu1 %v1494_v19  ;;  %2173 = vmatprep.mubr.f32.mxu0 %v9908_v31  ;;  %v1444_v19 = vld [vmem:[%s9715_s6 + $0x2a8] sm:$0xff] }
 0x20b   :  { %1789 = vmatpush1.msra.mxu1 %v1493_v33  ;;  %2109 = vmatprep.subr.mxu0 %v1452_v23  ;;  %v1443_v33 = vld [vmem:[%s9715_s6 + $0x2a0] sm:$0xff] }
 0x20c   :  { %1790 = vmatprep.subr.mxu1 %v1488_v39  ;;  %v1445_v39 = vld [vmem:[%s9715_s6 + $0x2b0] sm:$0xff]  ;;  %v1419_v23 = vld [vmem:[%s9715_s6 + $0x1e0] sm:$0xff] }
 0x20d   :  { %1791 = vmatpush1.msra.mxu1 %v1487_v50  ;;  %v1438_v50 = vld [vmem:[%s9715_s6 + $0x278] sm:$0xff] }
 0x20e   :  { %1792 = vmatprep.subr.mxu1 %v1482_v47  ;;  %v1440_v47 = vld [vmem:[%s9715_s6 + $0x288] sm:$0xff] }
 0x20f   :  { %1793 = vmatpush1.msra.mxu1 %v1481_v55  ;;  %v1437_v55 = vld [vmem:[%s9715_s6 + $0x270] sm:$0xff] }
 0x210   :  { %1794 = vmatprep.subr.mxu1 %v1476_v56  ;;  %v1439_v56 = vld [vmem:[%s9715_s6 + $0x280] sm:$0xff] }
 0x211   :  { %1795 = vmatpush1.msra.mxu1 %v1475_v51  ;;  %v1432_v51 = vld [vmem:[%s9715_s6 + $0x248] sm:$0xff] }
 0x212   :  { %1796 = vmatprep.subr.mxu1 %v1470_v25  ;;  %v1431_v25 = vld [vmem:[%s9715_s6 + $0x240] sm:$0xff] }
 0x213   :  { %1797 = vmatpush1.msra.mxu1 %v1469_v10  ;;  %v1433_v10 = vld [vmem:[%s9715_s6 + $0x250] sm:$0xff] }
 0x214   :  { %1798 = vmatprep.subr.mxu1 %v1464_v43  ;;  %v1426_v43 = vld [vmem:[%s9715_s6 + $0x218] sm:$0xff] }
 0x215   :  { %1799 = vmatpush1.msra.mxu1 %v1463_v21  ;;  %v1428_v21 = vld [vmem:[%s9715_s6 + $0x228] sm:$0xff] }
 0x216   :  { %1800 = vmatprep.subr.mxu1 %v1458_v27  ;;  %v1427_v27 = vld [vmem:[%s9715_s6 + $0x220] sm:$0xff] }
 0x217   :  { %1801 = vmatpush1.msra.mxu1 %v1457_v54  ;;  %v1420_v54 = vld [vmem:[%s9715_s6 + $0x1e8] sm:$0xff] }
 0x218   :  { %1835 = vmatmul.mubr.f32.vlgmr.msra.gmra.mxu1 %v6531_v18  ;;  %1996 = vmatprep.subr.mxu1 %v1450_v46  ;;  %v1451_v18 = vld [vmem:[%s9715_s6 + $0x2e0] sm:$0xff]  ;;  %v1422_v46 = vld [vmem:[%s9715_s6 + $0x1f8] sm:$0xff] }
 0x219   :  { %1840 = vmatprep.mubr.f32.mxu1 %v9908_v31  ;;  %1997 = vmatpush1.msra.mxu1 %v1449_v5  ;;  %v1421_v5 = vld [vmem:[%s9715_s6 + $0x1f0] sm:$0xff] }
 0x21a   :  { %2110 = vmatpush1.msra.mxu0 %v1451_v18  ;;  %1998 = vmatprep.subr.mxu1 %v1444_v19  ;;  %v1414_v18 = vld [vmem:[%s9715_s6 + $0x1b8] sm:$0xff]  ;;  %v1413_v19 = vld [vmem:[%s9715_s6 + $0x1b0] sm:$0xff] }
 0x21b   :  { %1999 = vmatpush1.msra.mxu1 %v1443_v33  ;;  %v1408_v33 = vld [vmem:[%s9715_s6 + $0x188] sm:$0xff] }
 0x21c   :  { %1841 = vmatmul.mubr.f32.gmra.mxu1 %v6553_v35  ;;  %v1446_v35 = vld [vmem:[%s9715_s6 + $0x2b8] sm:$0xff]  ;;  %2000 = vmatprep.subr.mxu1 %v1438_v50  ;;  %v1409_v50 = vld [vmem:[%s9715_s6 + $0x190] sm:$0xff] }
 0x21d   :  { %1846 = vmatprep.mubr.f32.mxu1 %v9908_v31  ;;  %2111 = vmatprep.subr.mxu0 %v1446_v35  ;;  %v1415_v35 = vld [vmem:[%s9715_s6 + $0x1c0] sm:$0xff] }
 0x21e   :  { %2112 = vmatpush1.msra.mxu0 %v1445_v39  ;;  %2001 = vmatpush1.msra.mxu1 %v1437_v55  ;;  %v1410_v39 = vld [vmem:[%s9715_s6 + $0x198] sm:$0xff]  ;;  %v1404_v55 = vld [vmem:[%s9715_s6 + $0x168] sm:$0xff] }
 0x21f   :  { %2113 = vmatprep.subr.mxu0 %v1440_v47  ;;  %2002 = vmatprep.subr.mxu1 %v1432_v51  ;;  %v1402_v47 = vld [vmem:[%s9715_s6 + $0x158] sm:$0xff]  ;;  %v1403_v51 = vld [vmem:[%s9715_s6 + $0x160] sm:$0xff] }
 0x220   :  { %1847 = vmatmul.mubr.f32.gmra.mxu1 %v6583_v4  ;;  %v1434_v4 = vld [vmem:[%s9715_s6 + $0x258] sm:$0xff]  ;;  %2114 = vmatpush1.msra.mxu0 %v1439_v56  ;;  %v1401_v56 = vld [vmem:[%s9715_s6 + $0x150] sm:$0xff] }
 0x221   :  { %1852 = vmatprep.mubr.f32.mxu1 %v9908_v31  ;;  %2115 = vmatprep.subr.mxu0 %v1434_v4  ;;  %v1396_v4 = vld [vmem:[%s9715_s6 + $0x128] sm:$0xff] }
 0x222   :  { %2003 = vmatpush1.msra.mxu1 %v1431_v25  ;;  %2116 = vmatpush1.msra.mxu0 %v1433_v10  ;;  %v1395_v25 = vld [vmem:[%s9715_s6 + $0x120] sm:$0xff]  ;;  %v1397_v10 = vld [vmem:[%s9715_s6 + $0x130] sm:$0xff] }
 0x223   :  { %2004 = vmatprep.subr.mxu1 %v1426_v43  ;;  %2117 = vmatprep.subr.mxu0 %v1428_v21  ;;  %v1390_v43 = vld [vmem:[%s9715_s6 + $0xf8] sm:$0xff]  ;;  %v1392_v21 = vld [vmem:[%s9715_s6 + $0x108] sm:$0xff] }
 0x224   :  { %1853 = vmatmul.mubr.f32.gmra.mxu1 %v6611_v2  ;;  %v1425_v2 = vld [vmem:[%s9715_s6 + $0x210] sm:$0xff]  ;;  %2118 = vmatpush1.msra.mxu0 %v1427_v27 }
 0x225   :  { %1858 = vmatprep.mubr.f32.mxu1 %v9908_v31  ;;  %2005 = vmatpush1.msra.mxu1 %v1425_v2  ;;  %v1389_v27 = vld [vmem:[%s9715_s6 + $0xf0] sm:$0xff]  ;;  %v1391_v2 = vld [vmem:[%s9715_s6 + $0x100] sm:$0xff] }
 0x226   :  { %2006 = vmatprep.subr.mxu1 %v1420_v54  ;;  %2119 = vmatprep.subr.mxu0 %v1422_v46  ;;  %v1384_v54 = vld [vmem:[%s9715_s6 + $0xc8] sm:$0xff]  ;;  %v1383_v46 = vld [vmem:[%s9715_s6 + $0xc0] sm:$0xff] }
 0x227   :  { %2007 = vmatpush1.msra.mxu1 %v1419_v23  ;;  %2120 = vmatpush1.msra.mxu0 %v1421_v5  ;;  %v1385_v23 = vld [vmem:[%s9715_s6 + $0xd0] sm:$0xff]  ;;  %v1378_v5 = vld [vmem:[%s9715_s6 + $0x98] sm:$0xff] }
 0x228   :  { %1859 = vmatmul.mubr.f32.gmra.mxu1 %v6638_v61  ;;  %v1416_v61 = vld [vmem:[%s9715_s6 + $0x1c8] sm:$0xff]  ;;  %2008 = vmatprep.subr.mxu1 %v1414_v18 }
 0x229   :  { %1864 = vmatprep.mubr.f32.mxu1 %v9908_v31  ;;  %2121 = vmatprep.subr.mxu0 %v1416_v61  ;;  %v1380_v18 = vld [vmem:[%s9715_s6 + $0xa8] sm:$0xff]  ;;  %v1377_v61 = vld [vmem:[%s9715_s6 + $0x90] sm:$0xff] }
 0x22a   :  { %2009 = vmatpush1.msra.mxu1 %v1413_v19  ;;  %2122 = vmatpush1.msra.mxu0 %v1415_v35  ;;  %v1379_v19 = vld [vmem:[%s9715_s6 + $0xa0] sm:$0xff]  ;;  %v1372_v35 = vld [vmem:[%s9715_s6 + $0x68] sm:$0xff] }
 0x22b   :  { %2010 = vmatprep.subr.mxu1 %v1408_v33  ;;  %2123 = vmatprep.subr.mxu0 %v1410_v39  ;;  %v1374_v33 = vld [vmem:[%s9715_s6 + $0x78] sm:$0xff]  ;;  %v1371_v39 = vld [vmem:[%s9715_s6 + $0x60] sm:$0xff] }
 0x22c   :  { %1865 = vmatmul.mubr.f32.gmra.mxu1 %v6664_v30  ;;  %v1407_v30 = vld [vmem:[%s9715_s6 + $0x180] sm:$0xff]  ;;  %2124 = vmatpush1.msra.mxu0 %v1409_v50  ;;  %v1373_v50 = vld [vmem:[%s9715_s6 + $0x70] sm:$0xff] }
 0x22d   :  { %1870 = vmatprep.mubr.f32.mxu1 %v9908_v31  ;;  %2011 = vmatpush1.msra.mxu1 %v1407_v30  ;;  %v1366_v30 = vld [vmem:[%s9715_s6 + $0x38] sm:$0xff] }
 0x22e   :  { %2012 = vmatprep.subr.mxu1 %v1402_v47  ;;  %2125 = vmatprep.subr.mxu0 %v1404_v55  ;;  %v1368_v47 = vld [vmem:[%s9715_s6 + $0x48] sm:$0xff]  ;;  %v1365_v55 = vld [vmem:[%s9715_s6 + $0x30] sm:$0xff] }
 0x22f   :  { %2013 = vmatpush1.msra.mxu1 %v1401_v56  ;;  %2126 = vmatpush1.msra.mxu0 %v1403_v51  ;;  %v1367_v56 = vld [vmem:[%s9715_s6 + $0x40] sm:$0xff]  ;;  %v1360_v51 = vld [vmem:[%s9715_s6 + $0x8] sm:$0xff] }
 0x230   :  { %1871 = vmatmul.mubr.f32.gmra.mxu1 %v6687_v28  ;;  %v1398_v28 = vld [vmem:[%s9715_s6 + $0x138] sm:$0xff]  ;;  %2014 = vmatprep.subr.mxu1 %v1396_v4 }
 0x231   :  { %1876 = vmatprep.mubr.f32.mxu1 %v9908_v31  ;;  %2127 = vmatprep.subr.mxu0 %v1398_v28  ;;  %v1362_v4 = vld [vmem:[%s9715_s6 + $0x18] sm:$0xff]  ;;  %v1359_v28 = vld [vmem:[%s9715_s6] sm:$0xff] }
 0x232   :  { %2015 = vmatpush1.msra.mxu1 %v1395_v25  ;;  %2128 = vmatpush1.msra.mxu0 %v1397_v10  ;;  %v1361_v25 = vld [vmem:[%s9715_s6 + $0x10] sm:$0xff]  ;;  %v1454_v10 = vld [vmem:[%s9715_s6 + $0x2f8] sm:$0xff] }
 0x233   :  { %2016 = vmatprep.subr.mxu1 %v1390_v43  ;;  %2129 = vmatprep.subr.mxu0 %v1392_v21  ;;  %v1453_v21 = vld [vmem:[%s9715_s6 + $0x2f0] sm:$0xff] }
 0x234   :  { %1877 = vmatmul.mubr.f32.gmra.mxu1 %v6706_v34  ;;  %v1386_v34 = vld [vmem:[%s9715_s6 + $0xd8] sm:$0xff]  ;;  %2130 = vmatpush1.msra.mxu0 %v1391_v2  ;;  %v1448_v2 = vld [vmem:[%s9715_s6 + $0x2c8] sm:$0xff] }
 0x235   :  { %2017 = vmatpush1.msra.mxu1 %v1389_v27  ;;  %2131 = vmatprep.subr.mxu0 %v1386_v34  ;;  %v1442_v34 = vld [vmem:[%s9715_s6 + $0x298] sm:$0xff] }
 0x236   :  { %2018 = vmatprep.subr.mxu1 %v1384_v54  ;;  %2132 = vmatpush1.msra.mxu0 %v1385_v23  ;;  %v1447_v54 = vld [vmem:[%s9715_s6 + $0x2c0] sm:$0xff]  ;;  %v1441_v23 = vld [vmem:[%s9715_s6 + $0x290] sm:$0xff] }
 0x237   :  { %2019 = vmatpush1.msra.mxu1 %v1383_v46  ;;  %2133 = vmatprep.subr.mxu0 %v1380_v18  ;;  %v1435_v18 = vld [vmem:[%s9715_s6 + $0x260] sm:$0xff] }
 0x238   :  { %2020 = vmatprep.subr.mxu1 %v1378_v5  ;;  %2134 = vmatpush1.msra.mxu0 %v1379_v19  ;;  %v1436_v5 = vld [vmem:[%s9715_s6 + $0x268] sm:$0xff] }
 0x239   :  { %2021 = vmatpush1.msra.mxu1 %v1377_v61  ;;  %2135 = vmatprep.subr.mxu0 %v1374_v33  ;;  %v1430_v61 = vld [vmem:[%s9715_s6 + $0x238] sm:$0xff]  ;;  %v1424_v33 = vld [vmem:[%s9715_s6 + $0x208] sm:$0xff] }
 0x23a   :  { %2022 = vmatprep.subr.mxu1 %v1372_v35  ;;  %2136 = vmatpush1.msra.mxu0 %v1373_v50  ;;  %v1429_v35 = vld [vmem:[%s9715_s6 + $0x230] sm:$0xff]  ;;  %v1418_v50 = vld [vmem:[%s9715_s6 + $0x1d8] sm:$0xff] }
 0x23b   :  { %2023 = vmatpush1.msra.mxu1 %v1371_v39  ;;  %2137 = vmatprep.subr.mxu0 %v1368_v47  ;;  %v1423_v39 = vld [vmem:[%s9715_s6 + $0x200] sm:$0xff]  ;;  %v1417_v47 = vld [vmem:[%s9715_s6 + $0x1d0] sm:$0xff] }
 0x23c   :  { %2024 = vmatprep.subr.mxu1 %v1366_v30  ;;  %2138 = vmatpush1.msra.mxu0 %v1367_v56  ;;  %v1411_v56 = vld [vmem:[%s9715_s6 + $0x1a0] sm:$0xff] }
 0x23d   :  { %2025 = vmatpush1.msra.mxu1 %v1365_v55  ;;  %2139 = vmatprep.subr.mxu0 %v1362_v4  ;;  %v1412_v55 = vld [vmem:[%s9715_s6 + $0x1a8] sm:$0xff] }
 0x23e   :  { %2026 = vmatprep.subr.mxu1 %v1360_v51  ;;  %2060 = vmatprep.mubr.f32.mxu1 %v9908_v31  ;;  %v1406_v51 = vld [vmem:[%s9715_s6 + $0x178] sm:$0xff] }
 0x23f   :  { %2027 = vmatpush1.msra.mxu1 %v1359_v28  ;;  %2140 = vmatpush1.msra.mxu0 %v1361_v25  ;;  %v1405_v28 = vld [vmem:[%s9715_s6 + $0x170] sm:$0xff]  ;;  %v1400_v25 = vld [vmem:[%s9715_s6 + $0x148] sm:$0xff] }
 0x240   :  { %2222 = vmatprep.subr.mxu1 %v1454_v10  ;;  %v1399_v10 = vld [vmem:[%s9715_s6 + $0x140] sm:$0xff] }
 0x2b8   :  { %v7091_v43 = vpop.f32.mrf.mxu1 }
 0x2ba   :  { %v7096_v27 = vpop.f32.mrf.mxu1 }
 0x2bb   :  { %2061 = vmatmul.mubr.f32.vlgmr.msra.gmra.mxu1 %v7096_v27  ;;  %2174 = vmatmul.mubr.f32.vlgmr.msra.gmra.mxu0 %v7096_v27 }
 0x2bc   :  { %2223 = vmatpush1.msra.mxu1 %v1453_v21  ;;  %2066 = vmatprep.mubr.f32.mxu1 %v9908_v31  ;;  %v7111_v46 = vpop.f32.mrf.mxu1  ;;  %v1394_v21 = vld [vmem:[%s9715_s6 + $0x118] sm:$0xff] }
 0x2bd   :  { %2224 = vmatprep.subr.mxu1 %v1448_v2  ;;  %2179 = vmatprep.mubr.f32.mxu0 %v9908_v31 }
 0x2be   :  { %2225 = vmatpush1.msra.mxu1 %v1447_v54  ;;  %v7129_v19 = vpop.f32.mrf.mxu1  ;;  %v1393_v54 = vld [vmem:[%s9715_s6 + $0x110] sm:$0xff] }
 0x2bf   :  { %2067 = vmatmul.mubr.f32.gmra.mxu1 %v7091_v43  ;;  %2180 = vmatmul.mubr.f32.gmra.mxu0 %v7091_v43 }
 0x2c0   :  { %2226 = vmatprep.subr.mxu1 %v1442_v34  ;;  %2072 = vmatprep.mubr.f32.mxu1 %v9908_v31  ;;  %v7146_v30 = vpop.f32.mrf.mxu1  ;;  %v1388_v34 = vld [vmem:[%s9715_s6 + $0xe8] sm:$0xff] }
 0x2c1   :  { %2227 = vmatpush1.msra.mxu1 %v1441_v23  ;;  %2185 = vmatprep.mubr.f32.mxu0 %v9908_v31  ;;  %v1387_v23 = vld [vmem:[%s9715_s6 + $0xe0] sm:$0xff] }
 0x2c2   :  { %2228 = vmatprep.subr.mxu1 %v1436_v5  ;;  %v1638_v4 = vpop.f32.mrf.mxu1  ;;  %v1382_v5 = vld [vmem:[%s9715_s6 + $0xb8] sm:$0xff] }
 0x2c3   :  { %2229 = vmatpush1.msra.mxu1 %v1435_v18  ;;  %2186 = vmatmul.mubr.f32.gmra.mxu0 %v7129_v19 }
 0x2c4   :  { %2073 = vmatmul.mubr.f32.gmra.mxu1 %v7129_v19  ;;  %2230 = vmatprep.subr.mxu1 %v1430_v61  ;;  %v5329_v2 = vpop.f32.mrf.mxu1  ;;  %v1381_v61 = vld [vmem:[%s9715_s6 + $0xb0] sm:$0xff] }
 0x2c5   :  { %2231 = vmatpush1.msra.mxu1 %v1429_v35  ;;  %2078 = vmatprep.mubr.f32.mxu1 %v9908_v31  ;;  %v1376_v35 = vld [vmem:[%s9715_s6 + $0x88] sm:$0xff] }
 0x2c6   :  { %2232 = vmatprep.subr.mxu1 %v1424_v33  ;;  %2191 = vmatprep.mubr.f32.mxu0 %v9908_v31  ;;  %v1648_v18 = vpop.f32.mrf.mxu1  ;;  %v1375_v33 = vld [vmem:[%s9715_s6 + $0x80] sm:$0xff] }
 0x2c7   :  { %2233 = vmatpush1.msra.mxu1 %v1423_v39  ;;  %2192 = vmatmul.mubr.f32.gmra.mxu0 %v7111_v46  ;;  %v1370_v39 = vld [vmem:[%s9715_s6 + $0x58] sm:$0xff] }
 0x2c8   :  { %2079 = vmatmul.mubr.f32.gmra.mxu1 %v7111_v46  ;;  %2234 = vmatprep.subr.mxu1 %v1418_v50  ;;  %v1369_v50 = vld [vmem:[%s9715_s6 + $0x50] sm:$0xff] }
 0x2c9   :  { %2235 = vmatpush1.msra.mxu1 %v1417_v47  ;;  %2084 = vmatprep.mubr.f32.mxu1 %v9908_v31  ;;  %v1364_v47 = vld [vmem:[%s9715_s6 + $0x28] sm:$0xff] }
 0x2ca   :  { %2236 = vmatprep.subr.mxu1 %v1412_v55  ;;  %2197 = vmatprep.mubr.f32.mxu0 %v9908_v31  ;;  %v1363_v55 = vld [vmem:[%s9715_s6 + $0x20] sm:$0xff] }
 0x2cb   :  { %2237 = vmatpush1.msra.mxu1 %v1411_v56  ;;  %2198 = vmatmul.mubr.f32.gmra.mxu0 %v1638_v4  ;;  %v5523_v56 = vld [vmem:[%s9812_s25] sm:$0xff] }
 0x2cc   :  { %2085 = vmatmul.mubr.f32.gmra.mxu1 %v1638_v4  ;;  %2238 = vmatprep.subr.mxu1 %v1406_v51  ;;  %v2683_v51 = vld [vmem:[%s9716_s10 + $0x2a8] sm:$0xff] }
 0x2cd   :  { %2239 = vmatpush1.msra.mxu1 %v1405_v28  ;;  %2090 = vmatprep.mubr.f32.mxu1 %v9908_v31  ;;  %v2682_v28 = vld [vmem:[%s9716_s10 + $0x2a0] sm:$0xff] }
 0x2ce   :  { %2240 = vmatprep.subr.mxu1 %v1400_v25  ;;  %2203 = vmatprep.mubr.f32.mxu0 %v9908_v31  ;;  %v2677_v25 = vld [vmem:[%s9716_s10 + $0x278] sm:$0xff] }
 0x2cf   :  { %2241 = vmatpush1.msra.mxu1 %v1399_v10  ;;  %2204 = vmatmul.mubr.f32.gmra.mxu0 %v7146_v30  ;;  %v2676_v10 = vld [vmem:[%s9716_s10 + $0x270] sm:$0xff] }
 0x2d0   :  { %2091 = vmatmul.mubr.f32.gmra.mxu1 %v7146_v30  ;;  %2242 = vmatprep.subr.mxu1 %v1394_v21  ;;  %v2671_v21 = vld [vmem:[%s9716_s10 + $0x248] sm:$0xff] }
 0x2d1   :  { %2243 = vmatpush1.msra.mxu1 %v1393_v54  ;;  %2096 = vmatprep.mubr.f32.mxu1 %v9908_v31  ;;  %v2670_v54 = vld [vmem:[%s9716_s10 + $0x240] sm:$0xff] }
 0x2d2   :  { %2244 = vmatprep.subr.mxu1 %v1388_v34  ;;  %2209 = vmatprep.mubr.f32.mxu0 %v9908_v31  ;;  %v2665_v34 = vld [vmem:[%s9716_s10 + $0x218] sm:$0xff] }
 0x2d3   :  { %2245 = vmatpush1.msra.mxu1 %v1387_v23  ;;  %2210 = vmatmul.mubr.f32.gmra.mxu0 %v1648_v18  ;;  %v2664_v23 = vld [vmem:[%s9716_s10 + $0x210] sm:$0xff] }
 0x2d4   :  { %2097 = vmatmul.mubr.f32.gmra.mxu1 %v1648_v18  ;;  %2246 = vmatprep.subr.mxu1 %v1382_v5 }
 0x2d5   :  { %2247 = vmatpush1.msra.mxu1 %v1381_v61  ;;  %2102 = vmatprep.mubr.f32.mxu1 %v9908_v31  ;;  %v2658_v61 = vld [vmem:[%s9716_s10 + $0x1e0] sm:$0xff] }
 0x2d6   :  { %2248 = vmatprep.subr.mxu1 %v1376_v35  ;;  %2215 = vmatprep.mubr.f32.mxu0 %v9908_v31  ;;  %v2653_v35 = vld [vmem:[%s9716_s10 + $0x1b8] sm:$0xff] }
 0x2d7   :  { %2249 = vmatpush1.msra.mxu1 %v1375_v33  ;;  %2216 = vmatmul.mubr.f32.gmra.mxu0 %v5329_v2  ;;  %v2652_v33 = vld [vmem:[%s9716_s10 + $0x1b0] sm:$0xff] }
 0x2d8   :  { %2103 = vmatmul.mubr.f32.gmra.mxu1 %v5329_v2  ;;  %2250 = vmatprep.subr.mxu1 %v1370_v39 }
 0x2d9   :  { %2251 = vmatpush1.msra.mxu1 %v1369_v50  ;;  %2286 = vmatprep.mubr.f32.mxu1 %v9908_v31  ;;  %v2647_v50 = vld [vmem:[%s9716_s10 + $0x188] sm:$0xff] }
 0x2da   :  { %2252 = vmatprep.subr.mxu1 %v1364_v47  ;;  %5346 = vmatprep.mubr.msk.f32.mxu0 %vm135_vm0, %v5523_v56  ;;  %v2646_v47 = vld [vmem:[%s9716_s10 + $0x180] sm:$0xff]  ;;  %v2640_v56 = vld [vmem:[%s9716_s10 + $0x150] sm:$0xff] }
 0x2db   :  { %2253 = vmatpush1.msra.mxu1 %v1363_v55  ;;  %v2641_v55 = vld [vmem:[%s9716_s10 + $0x158] sm:$0xff] }
 0x2dc   :  { %2287 = vmatmul.mubr.f32.vlgmr.msra.gmra.mxu1 %v7096_v27 }
 0x2dd   :  { %2292 = vmatprep.mubr.f32.mxu1 %v9908_v31 }
 0x2e0   :  { %2293 = vmatmul.mubr.f32.gmra.mxu1 %v7091_v43  ;;  %v7236_v43 = vpop.f32.mrf.mxu0 }
 0x2e1   :  { %2298 = vmatprep.mubr.f32.mxu1 %v9908_v31 }
 0x2e2   :  { %v7238_v27 = vpop.f32.mrf.mxu0 }
 0x2e4   :  { %2299 = vmatmul.mubr.f32.gmra.mxu1 %v7129_v19  ;;  %v2689_v19 = vld [vmem:[%s9716_s10 + $0x2d8] sm:$0xff] }
 0x2e5   :  { %2304 = vmatprep.mubr.f32.mxu1 %v9908_v31  ;;  %2800 = vmatprep.subr.mxu1 %v2689_v19 }
 0x2e8   :  { %2305 = vmatmul.mubr.f32.gmra.mxu1 %v7111_v46  ;;  %v7240_v46 = vpop.f32.mrf.mxu0 }
 0x2e9   :  { %2310 = vmatprep.mubr.f32.mxu1 %v9908_v31 }
 0x2ec   :  { %2311 = vmatmul.mubr.f32.gmra.mxu1 %v1638_v4  ;;  %v7251_v4 = vpop.f32.mrf.mxu0 }
 0x2ed   :  { %2316 = vmatprep.mubr.f32.mxu1 %v9908_v31 }
 0x2f0   :  { %2317 = vmatmul.mubr.f32.gmra.mxu1 %v7146_v30  ;;  %v2688_v30 = vld [vmem:[%s9716_s10 + $0x2d0] sm:$0xff] }
 0x2f1   :  { %2322 = vmatprep.mubr.f32.mxu1 %v9908_v31  ;;  %2801 = vmatpush1.msra.mxu1 %v2688_v30  ;;  %v2635_v30 = vld [vmem:[%s9716_s10 + $0x128] sm:$0xff] }
 0x2f2   :  { %2802 = vmatprep.subr.mxu1 %v2683_v51  ;;  %v2634_v51 = vld [vmem:[%s9716_s10 + $0x120] sm:$0xff] }
 0x2f3   :  { %2803 = vmatpush1.msra.mxu1 %v2682_v28  ;;  %v2629_v28 = vld [vmem:[%s9716_s10 + $0xf8] sm:$0xff] }
 0x2f4   :  { %2323 = vmatmul.mubr.f32.gmra.mxu1 %v1648_v18  ;;  %2804 = vmatprep.subr.mxu1 %v2677_v25  ;;  %v2659_v18 = vld [vmem:[%s9716_s10 + $0x1e8] sm:$0xff]  ;;  %v2628_v25 = vld [vmem:[%s9716_s10 + $0xf0] sm:$0xff] }
 0x2f5   :  { %2328 = vmatprep.mubr.f32.mxu1 %v9908_v31  ;;  %2805 = vmatpush1.msra.mxu1 %v2676_v10 }
 0x2f6   :  { %2806 = vmatprep.subr.mxu1 %v2671_v21  ;;  %v2623_v21 = vld [vmem:[%s9716_s10 + $0xc8] sm:$0xff] }
 0x2f7   :  { %2807 = vmatpush1.msra.mxu1 %v2670_v54  ;;  %v2622_v54 = vld [vmem:[%s9716_s10 + $0xc0] sm:$0xff] }
 0x2f8   :  { %2329 = vmatmul.mubr.f32.gmra.mxu1 %v5329_v2  ;;  %v7265_v2 = vpop.f32.mrf.mxu0  ;;  %2808 = vmatprep.subr.mxu1 %v2665_v34  ;;  %v2617_v34 = vld [vmem:[%s9716_s10 + $0x98] sm:$0xff] }
 0x2f9   :  { %2864 = vmatprep.mubr.f32.mxu1 %v9908_v31  ;;  %2809 = vmatpush1.msra.mxu1 %v2664_v23  ;;  %v2616_v23 = vld [vmem:[%s9716_s10 + $0x90] sm:$0xff] }
 0x2fa   :  { %v7276_v5 = vpop.f32.mrf.mxu0  ;;  %2810 = vmatprep.subr.mxu1 %v2659_v18 }
 0x2fb   :  { %2811 = vmatpush1.msra.mxu1 %v2658_v61  ;;  %v2611_v61 = vld [vmem:[%s9716_s10 + $0x68] sm:$0xff] }
 0x2fc   :  { %2812 = vmatprep.subr.mxu1 %v2653_v35  ;;  %v7290_v39 = vpop.f32.mrf.mxu0  ;;  %v2610_v35 = vld [vmem:[%s9716_s10 + $0x60] sm:$0xff] }
 0x2fd   :  { %2813 = vmatpush1.msra.mxu1 %v2652_v33  ;;  %v2605_v33 = vld [vmem:[%s9716_s10 + $0x38] sm:$0xff] }
 0x2fe   :  { %2814 = vmatprep.subr.mxu1 %v2647_v50  ;;  %v7304_v19 = vpop.f32.mrf.mxu0  ;;  %v2604_v50 = vld [vmem:[%s9716_s10 + $0x30] sm:$0xff] }
 0x2ff   :  { %2815 = vmatpush1.msra.mxu1 %v2646_v47 }
 0x300   :  { %2816 = vmatprep.subr.mxu1 %v2641_v55  ;;  %v7318_v10 = vpop.f32.mrf.mxu0  ;;  %v2599_v55 = vld [vmem:[%s9716_s10 + $0x8] sm:$0xff] }
 0x301   :  { %2817 = vmatpush1.msra.mxu1 %v2640_v56  ;;  %v2598_v56 = vld [vmem:[%s9716_s10] sm:$0xff] }
 0x302   :  { %2818 = vmatprep.subr.mxu1 %v2635_v30  ;;  %v7332_v18 = vpop.f32.mrf.mxu0  ;;  %v2693_v30 = vld [vmem:[%s9716_s10 + $0x2f8] sm:$0xff] }
 0x303   :  { %2819 = vmatpush1.msra.mxu1 %v2634_v51 }
 0x304   :  { %2820 = vmatprep.subr.mxu1 %v2629_v28  ;;  %v7346_v47 = vpop.f32.mrf.mxu0 }
 0x305   :  { %2821 = vmatpush1.msra.mxu1 %v2628_v25  ;;  %9936 = vst [vmem:[#allocation20_spill] sm:$0xff] %v7346_v47 }
 0x306   :  { %2822 = vmatprep.subr.mxu1 %v2623_v21  ;;  %v7357_v51 = vpop.f32.mrf.mxu0 }
 0x307   :  { %2823 = vmatpush1.msra.mxu1 %v2622_v54  ;;  %9937 = vst [vmem:[#allocation13_spill] sm:$0xff] %v7357_v51 }
 0x308   :  { %2824 = vmatprep.subr.mxu1 %v2617_v34  ;;  %v7359_v28 = vpop.f32.mrf.mxu0 }
 0x309   :  { %2825 = vmatpush1.msra.mxu1 %v2616_v23  ;;  %9938 = vst [vmem:[#allocation22_spill] sm:$0xff] %v7359_v28  ;;  %v1836_v23 = vpop.f32.mrf.mxu1 }
 0x30a   :  { %2826 = vmatprep.subr.mxu1 %v2611_v61  ;;  %v7361_v25 = vpop.f32.mrf.mxu0 }
 0x30b   :  { %2827 = vmatpush1.msra.mxu1 %v2610_v35  ;;  %9939 = vst [vmem:[#allocation24_spill] sm:$0xff] %v7361_v25  ;;  %v7371_v35 = vpop.f32.mrf.mxu1 }
 0x30c   :  { %2828 = vmatprep.subr.mxu1 %v2605_v33  ;;  %v7363_v21 = vpop.f32.mrf.mxu0 }
 0x30d   :  { %2829 = vmatpush1.msra.mxu1 %v2604_v50  ;;  %9940 = vst [vmem:[#allocation42_spill] sm:$0xff] %v7363_v21  ;;  %v7375_v50 = vpop.f32.mrf.mxu1 }
 0x30e   :  { %2830 = vmatprep.subr.mxu1 %v2599_v55  ;;  %v7365_v54 = vpop.f32.mrf.mxu0 }
 0x30f   :  { %2831 = vmatpush1.msra.mxu1 %v2598_v56  ;;  %9941 = vst [vmem:[#allocation14_spill] sm:$0xff] %v7365_v54  ;;  %v7379_v56 = vpop.f32.mrf.mxu1 }
 0x310   :  { %3026 = vmatprep.subr.mxu1 %v2693_v30  ;;  %v7367_v34 = vpop.f32.mrf.mxu0 }
 0x311   :  { %9942 = vst [vmem:[#allocation27_spill] sm:$0xff] %v7367_v34  ;;  %v7383_v45 = vpop.f32.mrf.mxu1 }
 0x312   :  { %v7369_v61 = vpop.f32.mrf.mxu0 }
 0x313   :  { %9943 = vst [vmem:[#allocation45_spill] sm:$0xff] %v7369_v61  ;;  %v7387_v11 = vpop.f32.mrf.mxu1 }
 0x314   :  { %v7373_v33 = vpop.f32.mrf.mxu0 }
 0x315   :  { %9944 = vst [vmem:[#allocation29_spill] sm:$0xff] %v7373_v33  ;;  %v7391_v44 = vpop.f32.mrf.mxu1 }
 0x316   :  { %v7377_v55 = vpop.f32.mrf.mxu0 }
 0x317   :  { %9945 = vst [vmem:[#allocation18_spill] sm:$0xff] %v7377_v55  ;;  %v7395_v58 = vpop.f32.mrf.mxu1 }
 0x318   :  { %v7381_v30 = vpop.f32.mrf.mxu0 }
 0x319   :  { %9946 = vst [vmem:[#allocation31_spill] sm:$0xff] %v7381_v30  ;;  %v7399_v48 = vpop.f32.mrf.mxu1 }
 0x31a   :  { %v7385_v22 = vpop.f32.mrf.mxu0 }
 0x31b   :  { %9947 = vst [vmem:[#allocation16_spill] sm:$0xff] %v7385_v22  ;;  %v7403_v16 = vpop.f32.mrf.mxu1 }
 0x31c   :  { %v7389_v17 = vpop.f32.mrf.mxu0 }
 0x31d   :  { %9948 = vst [vmem:[#allocation33_spill] sm:$0xff] %v7389_v17  ;;  %v7407_v36 = vpop.f32.mrf.mxu1 }
 0x31e   :  { %v7393_v63 = vpop.f32.mrf.mxu0 }
 0x31f   :  { %9949 = vst [vmem:[#allocation34_spill] sm:$0xff] %v7393_v63  ;;  %v7411_v59 = vpop.f32.mrf.mxu1 }
 0x320   :  { %v7397_v1 = vpop.f32.mrf.mxu0  ;;  %9954 = vst [vmem:[#allocation39_spill] sm:$0xff] %v7411_v59 }
 0x321   :  { %9950 = vst [vmem:[#allocation48_spill] sm:$0xff] %v7397_v1  ;;  %v7415_v63 = vpop.f32.mrf.mxu1 }
 0x322   :  { %v7401_v24 = vpop.f32.mrf.mxu0  ;;  %9956 = vst [vmem:[#allocation44_spill] sm:$0xff] %v7415_v63 }
 0x323   :  { %9951 = vst [vmem:[#allocation35_spill] sm:$0xff] %v7401_v24  ;;  %v7419_v1 = vpop.f32.mrf.mxu1 }
 0x324   :  { %v7405_v49 = vpop.f32.mrf.mxu0  ;;  %9958 = vst [vmem:[#allocation49_spill] sm:$0xff] %v7419_v1  ;;  %v9963_v1 = vld [vmem:[#allocation55_spill] sm:$0xff] }
 0x325   :  { %9952 = vst [vmem:[#allocation37_spill] sm:$0xff] %v7405_v49  ;;  %v7423_v24 = vpop.f32.mrf.mxu1 }
 0x326   :  { %v7409_v60 = vpop.f32.mrf.mxu0  ;;  %9960 = vst [vmem:[#allocation67_spill] sm:$0xff] %v7423_v24 }
 0x327   :  { %9953 = vst [vmem:[#allocation51_spill] sm:$0xff] %v7409_v60  ;;  %v7427_v49 = vpop.f32.mrf.mxu1 }
 0x328   :  { %v7413_v21 = vpop.f32.mrf.mxu0  ;;  %9962 = vst [vmem:[#allocation69_spill] sm:$0xff] %v7427_v49 }
 0x329   :  { %9955 = vst [vmem:[#allocation41_spill] sm:$0xff] %v7413_v21 }
 0x32a   :  { %v7417_v9 = vpop.f32.mrf.mxu0 }
 0x32b   :  { %9957 = vst [vmem:[#allocation46_spill] sm:$0xff] %v7417_v9 }
 0x32c   :  { %v7421_v17 = vpop.f32.mrf.mxu0 }
 0x32d   :  { %9959 = vst [vmem:[#allocation66_spill] sm:$0xff] %v7421_v17  ;;  %v1551_v17 = vld [vmem:[%s9717_s8] sm:$0x3f] }
 0x32e   :  { %v7425_v31 = vpop.f32.mrf.mxu0  ;;  %v7434_v49 = vrot.slane %v1551_v17, %v9963_v1  ;;  %v7438_v61 = vrot.slane %v1551_v17, %v9964_v15 }
 0x32f   :  { %9961 = vst [vmem:[#allocation68_spill] sm:$0xff] %v7425_v31 }
 0x37b   :  { %v2062_v54 = vpop.f32.mrf.mxu1  ;;  %v2175_v60 = vpop.f32.mrf.mxu0 }
 0x37c   :  { %v2063_v63 = vadd.f32 %v2062_v54, %v7236_v43  ;;  %v2176_v26 = vadd.f32 %v2175_v60, %v1836_v23  ;;  %v7453_v60 = vrot.slane %v1551_v17, %v6390_v40 }
 0x37d   :  { %v2064_v22 = vpop.f32.mrf.mxu1  ;;  %v2177_v38 = vpop.f32.mrf.mxu0 }
 0x37e   :  { %v2065_v31 = vadd.f32 %v2064_v22, %v7238_v27  ;;  %v7444_v22 = vrot.slane %v1551_v17, %v6386_v53  ;;  %v2366_v43 = vadd.f32 %v7438_v61, %v2063_v63  ;;  %v2178_v63 = vadd.f32 %v2177_v38, %v7371_v35  ;;  %v9966_v38 = vld [vmem:[#allocation60_spill] sm:$0xff] }
 0x37f   :  { %v2068_v30 = vpop.f32.mrf.mxu1  ;;  %v2181_v21 = vpop.f32.mrf.mxu0  ;;  %v7468_v35 = vrot.slane %v1551_v17, %v9966_v38 }
 0x380   :  { %v2367_v34 = vadd.f32 %v7434_v49, %v2065_v31  ;;  %v2069_v59 = vadd.f32 %v2068_v30, %v7240_v46 }
 0x381   :  { %v2070_v13 = vpop.f32.mrf.mxu1  ;;  %v2183_v25 = vpop.f32.mrf.mxu0 }
 0x382   :  { %v2071_v51 = vadd.f32 %v2070_v13, %v7251_v4  ;;  %v2422_v31 = vmul.f32 %v2367_v34, %v6334_v57  ;;  %v2372_v46 = vadd.f32 %v7438_v61, %v2069_v59  ;;  %v2184_v23 = vadd.f32 %v2183_v25, %v7379_v56 }
 0x383   :  { %v2187_v28 = vpop.f32.mrf.mxu0 }
 0x384   :  { %v2074_v9 = vpop.f32.mrf.mxu1  ;;  %v2373_v54 = vadd.f32 %v7434_v49, %v2071_v51  ;;  %v2188_v30 = vadd.f32 %v2187_v28, %v7383_v45 }
 0x385   :  { %v2189_v55 = vpop.f32.mrf.mxu0  ;;  %v2075_v15 = vadd.f32 %v2074_v9, %v7265_v2  ;;  %v2414_v2 = vmul.f32 %v2366_v43, %v6328_v52  ;;  %v2415_v43 = vmul.f32 %v2372_v46, %v6318_v14 }
 0x386   :  { %v2076_v24 = vpop.f32.mrf.mxu1  ;;  %v2190_v46 = vadd.f32 %v2189_v55, %v7387_v11 }
 0x387   :  { %v2193_v20 = vpop.f32.mrf.mxu0  ;;  %v2077_v27 = vadd.f32 %v2076_v24, %v7276_v5  ;;  %v2182_v24 = vadd.f32 %v2181_v21, %v7375_v50  ;;  %v2368_v5 = vadd.f32 %v7444_v22, %v2176_v26  ;;  %v2378_v59 = vadd.f32 %v7438_v61, %v2075_v15 }
 0x388   :  { %v2080_v33 = vpop.f32.mrf.mxu1  ;;  %v2194_v25 = vadd.f32 %v2193_v20, %v7391_v44  ;;  %v2369_v15 = vadd.f32 %v7453_v60, %v2178_v63 }
 0x389   :  { %v2195_v6 = vpop.f32.mrf.mxu0  ;;  %v2379_v51 = vadd.f32 %v7434_v49, %v2077_v27  ;;  %v2081_v9 = vadd.f32 %v2080_v33, %v7290_v39  ;;  %v9967_v27 = vld [vmem:[#allocation62_spill] sm:$0xff]  ;;  %v2430_v33 = vadd.f32 %v2422_v31, %v2414_v2  ;;  %v2438_v45 = vmul.f32 %v2368_v5, %v6434_v7 }
 0x38a   :  { %v2082_v0 = vpop.f32.mrf.mxu1  ;;  %v7471_v39 = vrot.slane %v1551_v17, %v9967_v27  ;;  %v2375_v17 = vadd.f32 %v7453_v60, %v2184_v23  ;;  %v2380_v31 = vadd.f32 %v7444_v22, %v2188_v30  ;;  %v2196_v44 = vadd.f32 %v2195_v6, %v7395_v58 }
 0x38b   :  { %v2083_v13 = vadd.f32 %v2082_v0, %v7304_v19  ;;  %v2199_v4 = vpop.f32.mrf.mxu0  ;;  %v9965_v19 = vld [vmem:[#allocation32_spill] sm:$0xff]  ;;  %v2424_v28 = vmul.f32 %v2379_v51, %v6256_v32  ;;  %v2384_v56 = vadd.f32 %v7438_v61, %v2081_v9  ;;  %v2446_v9 = vadd.f32 %v2438_v45, %v2430_v33 }
 0x38c   :  { %v2086_v1 = vpop.f32.mrf.mxu1  ;;  %v2423_v34 = vmul.f32 %v2373_v54, %v9965_v19  ;;  %v2374_v54 = vadd.f32 %v7444_v22, %v2182_v24  ;;  %v2416_v24 = vmul.f32 %v2378_v59, %v6308_v8  ;;  %v2200_v23 = vadd.f32 %v2199_v4, %v7399_v48 }
 0x38d   :  { %v2385_v21 = vadd.f32 %v7434_v49, %v2083_v13  ;;  %v2201_v26 = vpop.f32.mrf.mxu0  ;;  %v2417_v11 = vmul.f32 %v2384_v56, %v6298_v62  ;;  %v2087_v55 = vadd.f32 %v2086_v1, %v7318_v10  ;;  %v2454_v58 = vmul.f32 %v2369_v15, %v6422_v42 }
 0x38e   :  { %v2088_v47 = vpop.f32.mrf.mxu1  ;;  %v2431_v38 = vadd.f32 %v2423_v34, %v2415_v43  ;;  %v2439_v2 = vmul.f32 %v2374_v54, %v6344_v41  ;;  %v2386_v34 = vadd.f32 %v7444_v22, %v2194_v25  ;;  %v2432_v30 = vadd.f32 %v2424_v28, %v2416_v24 }
 0x38f   :  { %v2425_v20 = vmul.f32 %v2385_v21, %v6227_v12  ;;  %v2089_v5 = vadd.f32 %v2088_v47, %v7332_v18  ;;  %v2205_v63 = vpop.f32.mrf.mxu0  ;;  %v2202_v59 = vadd.f32 %v2201_v26, %v7403_v16  ;;  %v2440_v18 = vmul.f32 %v2380_v31, %v6304_v3  ;;  %v9969_v31 = vld [vmem:[#allocation58_spill] sm:$0xff] }
 0x390   :  { %v2092_v0 = vpop.f32.mrf.mxu1  ;;  %v2381_v47 = vadd.f32 %v7453_v60, %v2190_v46  ;;  %v2206_v21 = vadd.f32 %v2205_v63, %v7407_v36  ;;  %v2447_v33 = vadd.f32 %v2439_v2, %v2431_v38  ;;  %v2387_v48 = vadd.f32 %v7453_v60, %v2196_v44  ;;  %v9968_v38 = vld [vmem:[#allocation20_spill] sm:$0xff]  ;;  %v9972_v2 = vld [vmem:[#allocation54_spill] sm:$0xff] }
 0x391   :  { %v2433_v43 = vadd.f32 %v2425_v20, %v2417_v11  ;;  %v2391_v4 = vadd.f32 %v7434_v49, %v2089_v5  ;;  %v2207_v54 = vpop.f32.mrf.mxu0  ;;  %v2462_v16 = vadd.f32 %v2454_v58, %v2446_v9  ;;  %v2455_v10 = vmul.f32 %v2375_v17, %v6366_v29  ;;  %v9970_v20 = vld [vmem:[#allocation39_spill] sm:$0xff]  ;;  %v9975_v58 = vld [vmem:[#allocation13_spill] sm:$0xff] }
 0x392   :  { %v2094_v50 = vpop.f32.mrf.mxu1  ;;  %v2441_v26 = vmul.f32 %v2386_v34, %v6264_v37  ;;  %v2392_v25 = vadd.f32 %v7444_v22, %v2200_v23  ;;  %v2448_v45 = vadd.f32 %v2440_v18, %v2432_v30  ;;  %v2390_v15 = vadd.f32 %v7438_v61, %v2087_v55  ;;  %v9971_v5 = vld [vmem:[#allocation27_spill] sm:$0xff]  ;;  %v9973_v23 = vld [vmem:[#allocation8_spill] sm:$0xff] }
 0x393   :  { %v2393_v36 = vadd.f32 %v7453_v60, %v2202_v59  ;;  %v2093_v28 = vadd.f32 %v2092_v0, %v9968_v38  ;;  %v2456_v46 = vmul.f32 %v2381_v47, %v9969_v31  ;;  %v2398_v24 = vadd.f32 %v7444_v22, %v2206_v21  ;;  %v9974_v55 = vld [vmem:[#allocation12_spill] sm:$0xff]  ;;  %v2211_v18 = vpop.f32.mrf.mxu0  ;;  %v9976_v38 = vld [vmem:[#allocation45_spill] sm:$0xff] }
 0x394   :  { %v7480_v13 = vpop.f32.mrf.mxu1  ;;  %v2208_v44 = vadd.f32 %v2207_v54, %v9970_v20  ;;  %v2463_v63 = vadd.f32 %v2455_v10, %v2447_v33  ;;  %v2449_v9 = vadd.f32 %v2441_v26, %v2433_v43  ;;  %v2457_v34 = vmul.f32 %v2387_v48, %v9972_v2  ;;  %v9977_v54 = vld [vmem:[#allocation7_spill] sm:$0xff] }
 0x395   :  { %v2426_v30 = vmul.f32 %v2391_v4, %v9973_v23  ;;  %v2442_v59 = vmul.f32 %v2392_v25, %v9974_v55  ;;  %v2095_v0 = vadd.f32 %v2094_v50, %v9975_v58  ;;  %v2464_v31 = vadd.f32 %v2456_v46, %v2448_v45  ;;  %v9979_v4 = vld [vmem:[#allocation61_spill] sm:$0xff]  ;;  %v9981_v46 = vld [vmem:[#allocation44_spill] sm:$0xff]  ;;  %v9985_v55 = vld [vmem:[#allocation30_spill] sm:$0xff] }
 0x396   :  { %v7489_v51 = vpop.f32.mrf.mxu1  ;;  %v2418_v20 = vmul.f32 %v2390_v15, %v9977_v54  ;;  %v2396_v43 = vadd.f32 %v7438_v61, %v2093_v28  ;;  %v7529_v10 = vmul.f32 %v2398_v24, %v9979_v4  ;;  %v2399_v26 = vadd.f32 %v7453_v60, %v2208_v44  ;;  %v9980_v50 = vld [vmem:[#allocation65_spill] sm:$0xff]  ;;  %v9983_v24 = vld [vmem:[#allocation11_spill] sm:$0xff]  ;;  %v9984_v54 = vld [vmem:[#allocation18_spill] sm:$0xff] }
 0x397   :  { %v2212_v15 = vadd.f32 %v2211_v18, %v9981_v46  ;;  %v2397_v28 = vadd.f32 %v7434_v49, %v2095_v0  ;;  %v9992_v46 = vld [vmem:[#allocation63_spill] sm:$0xff] }
 0x398   :  { %v7497_v6 = vpop.f32.mrf.mxu1  ;;  %v2434_v45 = vadd.f32 %v2426_v30, %v2418_v20  ;;  %v9988_v20 = vld [vmem:[#allocation47_spill] sm:$0xff] }
 0x39a   :  { %v7505_v1 = vpop.f32.mrf.mxu1 }
 0x39c   :  { %v2288_v56 = vpop.f32.mrf.mxu1 }
 0x39d   :  { %v2289_v17 = vadd.f32 %v2288_v56, %v9971_v5  ;;  %v9978_v56 = vld [vmem:[#allocation52_spill] sm:$0xff] }
 0x39e   :  { %v2290_v11 = vpop.f32.mrf.mxu1  ;;  %v7525_v33 = vmul.f32 %v2393_v36, %v9978_v56 }
 0x39f   :  { %v2370_v47 = vadd.f32 %v7468_v35, %v2289_v17  ;;  %v2291_v21 = vadd.f32 %v2290_v11, %v9976_v38  ;;  %v7534_v17 = vadd.f32 %v2457_v34, %v2449_v9  ;;  %v9982_v11 = vld [vmem:[#allocation29_spill] sm:$0xff]  ;;  %v2213_v38 = vpop.f32.mrf.mxu0  ;;  %v9987_v34 = vld [vmem:[#allocation24_spill] sm:$0xff] }
 0x3a0   :  { %v2294_v48 = vpop.f32.mrf.mxu1  ;;  %v2101_v30 = vadd.f32 %v7489_v51, %v9987_v34  ;;  %v9991_v51 = vld [vmem:[#allocation49_spill] sm:$0xff] }
 0x3a1   :  { %v2470_v25 = vmul.f32 %v2370_v47, %v9980_v50  ;;  %v2371_v5 = vadd.f32 %v7471_v39, %v2291_v21  ;;  %v2295_v36 = vadd.f32 %v2294_v48, %v9982_v11  ;;  %v2419_v47 = vmul.f32 %v2396_v43, %v9985_v55  ;;  %v9986_v50 = vld [vmem:[#allocation22_spill] sm:$0xff]  ;;  %v2692_v43 = vld [vmem:[%s9716_s10 + $0x2f0] sm:$0xff] }
 0x3a2   :  { %v2296_v58 = vpop.f32.mrf.mxu1  ;;  %v2099_v9 = vadd.f32 %v7480_v13, %v9986_v50  ;;  %v7548_v48 = vmul.f32 %v2399_v26, %v9988_v20  ;;  %v2450_v13 = vadd.f32 %v2442_v59, %v2434_v45  ;;  %v2404_v50 = vadd.f32 %v7444_v22, %v2212_v15  ;;  %v2686_v59 = vld [vmem:[%s9716_s10 + $0x2c0] sm:$0xff] }
 0x3a3   :  { %v2478_v56 = vadd.f32 %v2470_v25, %v2462_v16  ;;  %v2486_v4 = vmul.f32 %v2371_v5, %v9983_v24  ;;  %v2297_v44 = vadd.f32 %v2296_v58, %v9984_v54  ;;  %v2376_v18 = vadd.f32 %v7468_v35, %v2295_v36  ;;  %v9990_v25 = vld [vmem:[#allocation31_spill] sm:$0xff]  ;;  %v9994_v58 = vld [vmem:[#allocation40_spill] sm:$0xff]  ;;  %v9996_v15 = vld [vmem:[#allocation14_spill] sm:$0xff] }
 0x3a4   :  { %v2300_v21 = vpop.f32.mrf.mxu1  ;;  %v2214_v5 = vadd.f32 %v2213_v38, %v9991_v51  ;;  %v2403_v45 = vadd.f32 %v7434_v49, %v2101_v30  ;;  %v2107_v38 = vadd.f32 %v7505_v1, %v9996_v15  ;;  %v9999_v30 = vld [vmem:[#allocation33_spill] sm:$0xff]  ;;  %v10000_v1 = vld [vmem:[#allocation6_spill] sm:$0xff] }
 0x3a5   :  { %v7550_v0 = vadd.f32 %v2486_v4, %v2478_v56  ;;  %v2377_v16 = vadd.f32 %v7471_v39, %v2297_v44  ;;  %v2301_v54 = vadd.f32 %v2300_v21, %v9990_v25  ;;  %v2471_v11 = vmul.f32 %v2376_v18, %v9992_v46  ;;  %v2687_v56 = vld [vmem:[%s9716_s10 + $0x2c8] sm:$0xff]  ;;  %v9993_v4 = vld [vmem:[#allocation5_spill] sm:$0xff]  ;;  %v9995_v21 = vld [vmem:[#allocation16_spill] sm:$0xff] }
 0x3a6   :  { %v2302_v36 = vpop.f32.mrf.mxu1  ;;  %v2427_v26 = vmul.f32 %v2397_v28, %v9993_v4  ;;  %v9997_v28 = vmov 0.0  }
 0x3a7   :  { %9989 = vst [vmem:[#allocation32_spill] sm:$0xff] %v7550_v0  ;;  %v2487_v44 = vmul.f32 %v2377_v16, %v9994_v58  ;;  %v2382_v34 = vadd.f32 %v7468_v35, %v2301_v54  ;;  %v2303_v25 = vadd.f32 %v2302_v36, %v9995_v21  ;;  %2865 = vmatmul.mubr.f32.vlgmr.msra.gmra.mxu1 %v7550_v0  ;;  %v2681_v16 = vld [vmem:[%s9716_s10 + $0x298] sm:$0xff]  ;;  %v2217_v36 = vpop.f32.mrf.mxu0  ;;  %v9998_v21 = vld [vmem:[#allocation59_spill] sm:$0xff] }
 0x3a8   :  { %v2479_v18 = vadd.f32 %v2471_v11, %v2463_v63  ;;  %v2306_v51 = vpop.f32.mrf.mxu1  ;;  %3027 = vmatpush1.msra.mxu1 %v2692_v43  ;;  %2870 = vmatprep.mubr.f32.mxu1 %v9997_v28  ;;  %v2402_v54 = vadd.f32 %v7438_v61, %v2099_v9  ;;  %v7583_v63 = vmul.f32 %v2404_v50, %v10000_v1  ;;  %v10001_v11 = vld [vmem:[#allocation42_spill] sm:$0xff] }
 0x3a9   :  { %v2472_v58 = vmul.f32 %v2382_v34, %v9998_v21  ;;  %v2383_v4 = vadd.f32 %v7471_v39, %v2303_v25  ;;  %v2307_v46 = vadd.f32 %v2306_v51, %v9999_v30  ;;  %3028 = vmatprep.subr.mxu1 %v2687_v56  ;;  %v7586_v43 = vadd.f32 %v7453_v60, %v2214_v5  ;;  %v2680_v34 = vld [vmem:[%s9716_s10 + $0x290] sm:$0xff]  ;;  %v10003_v51 = vld [vmem:[#allocation19_spill] sm:$0xff]  ;;  %v10004_v30 = vld [vmem:[#allocation34_spill] sm:$0xff] }
 0x3aa   :  { %v2105_v15 = vadd.f32 %v7497_v6, %v10001_v11  ;;  %v7590_v20 = vadd.f32 %v2487_v44, %v2479_v18  ;;  %v2308_v9 = vpop.f32.mrf.mxu1  ;;  %3029 = vmatpush1.msra.mxu1 %v2686_v59  ;;  %v2675_v6 = vld [vmem:[%s9716_s10 + $0x268] sm:$0xff]  ;;  %v2435_v5 = vadd.f32 %v2427_v26, %v2419_v47  ;;  %v2409_v21 = vadd.f32 %v7434_v49, %v2107_v38  ;;  %v10009_v47 = vld [vmem:[#allocation48_spill] sm:$0xff]  ;;  %v2669_v49 = vld [vmem:[%s9716_s10 + $0x238] sm:$0xff] }
 0x3ab   :  { %v2480_v25 = vadd.f32 %v2472_v58, %v2464_v31  ;;  %v2488_v56 = vmul.f32 %v2383_v4, %v10003_v51  ;;  %v2388_v50 = vadd.f32 %v7468_v35, %v2307_v46  ;;  %v2309_v1 = vadd.f32 %v2308_v9, %v10004_v30  ;;  %3030 = vmatprep.subr.mxu1 %v2681_v16  ;;  %v10005_v44 = vld [vmem:[#allocation3_spill] sm:$0xff]  ;;  %v2674_v46 = vld [vmem:[%s9716_s10 + $0x260] sm:$0xff] }
 0x3ac   :  { %10002 = vst [vmem:[#allocation62_spill] sm:$0xff] %v7590_v20  ;;  %v2428_v18 = vmul.f32 %v2403_v45, %v10005_v44  ;;  %v10006_v59 = vld [vmem:[#allocation67_spill] sm:$0xff]  ;;  %2871 = vmatmul.mubr.f32.gmra.mxu1 %v7590_v20  ;;  %v2312_v31 = vpop.f32.mrf.mxu1  ;;  %v10008_v58 = vld [vmem:[#allocation50_spill] sm:$0xff]  ;;  %v2466_v45 = vadd.f32 %v7525_v33, %v2450_v13  ;;  %v2408_v30 = vadd.f32 %v7438_v61, %v2105_v15 }
 0x3ad   :  { %v2218_v11 = vadd.f32 %v2217_v36, %v10006_v59  ;;  %v7608_v4 = vadd.f32 %v2488_v56, %v2480_v25  ;;  %v2473_v16 = vmul.f32 %v2388_v50, %v10008_v58  ;;  %v2389_v9 = vadd.f32 %v7471_v39, %v2309_v1  ;;  %3031 = vmatpush1.msra.mxu1 %v2680_v34  ;;  %v10010_v38 = vld [vmem:[#allocation2_spill] sm:$0xff]  ;;  %v2668_v1 = vld [vmem:[%s9716_s10 + $0x230] sm:$0xff]  ;;  %v2219_v56 = vpop.f32.mrf.mxu0  ;;  %v10012_v33 = vld [vmem:[#allocation35_spill] sm:$0xff] }
 0x3ae   :  { %v2313_v26 = vadd.f32 %v2312_v31, %v10009_v47  ;;  %v2420_v36 = vmul.f32 %v2402_v54, %v10010_v38  ;;  %3032 = vmatprep.subr.mxu1 %v2675_v6  ;;  %v2314_v25 = vpop.f32.mrf.mxu1  ;;  %2876 = vmatprep.mubr.f32.mxu1 %v9997_v28  ;;  %v10011_v50 = vld [vmem:[#allocation64_spill] sm:$0xff]  ;;  %v2663_v61 = vld [vmem:[%s9716_s10 + $0x208] sm:$0xff]  ;;  %v2451_v54 = vadd.f32 %v7529_v10, %v2435_v5  ;;  %v2657_v10 = vld [vmem:[%s9716_s10 + $0x1d8] sm:$0xff] }
 0x3af   :  { %10007 = vst [vmem:[#allocation20_spill] sm:$0xff] %v7608_v4  ;;  %v2481_v34 = vadd.f32 %v2473_v16, %v7534_v17  ;;  %v2489_v59 = vmul.f32 %v2389_v9, %v10011_v50  ;;  %v2315_v13 = vadd.f32 %v2314_v25, %v10012_v33  ;;  %3033 = vmatpush1.msra.mxu1 %v2674_v46  ;;  %v10013_v6 = vld [vmem:[#allocation23_spill] sm:$0xff]  ;;  %v2662_v16 = vld [vmem:[%s9716_s10 + $0x200] sm:$0xff]  ;;  %v10015_v46 = vld [vmem:[#allocation36_spill] sm:$0xff] }
 0x3b0   :  { %v2394_v31 = vadd.f32 %v7468_v35, %v2313_v26  ;;  %v2436_v15 = vadd.f32 %v2428_v18, %v2420_v36  ;;  %v2429_v47 = vmul.f32 %v2409_v21, %v10013_v6  ;;  %2877 = vmatmul.mubr.f32.gmra.mxu1 %v7608_v4  ;;  %3034 = vmatprep.subr.mxu1 %v2669_v49  ;;  %v2318_v17 = vpop.f32.mrf.mxu1  ;;  %v10016_v33 = vld [vmem:[#allocation37_spill] sm:$0xff]  ;;  %v10017_v21 = vld [vmem:[#allocation26_spill] sm:$0xff] }
 0x3b1   :  { %v7636_v9 = vadd.f32 %v2489_v59, %v2481_v34  ;;  %v2395_v25 = vadd.f32 %v7471_v39, %v2315_v13  ;;  %v2319_v50 = vadd.f32 %v2318_v17, %v10016_v33  ;;  %3035 = vmatpush1.msra.mxu1 %v2668_v1  ;;  %v2421_v5 = vmul.f32 %v2408_v30, %v10017_v21  ;;  %v10018_v49 = vld [vmem:[#allocation69_spill] sm:$0xff]  ;;  %v2656_v59 = vld [vmem:[%s9716_s10 + $0x1d0] sm:$0xff]  ;;  %v10020_v33 = vld [vmem:[#allocation51_spill] sm:$0xff] }
 0x3b2   :  { %v2474_v26 = vmul.f32 %v2394_v31, %v10015_v46  ;;  %v2410_v18 = vadd.f32 %v7444_v22, %v2218_v11  ;;  %v2220_v36 = vadd.f32 %v2219_v56, %v10018_v49  ;;  %3036 = vmatprep.subr.mxu1 %v2663_v61  ;;  %v2320_v34 = vpop.f32.mrf.mxu1  ;;  %2882 = vmatprep.mubr.f32.mxu1 %v9997_v28  ;;  %v10019_v1 = vld [vmem:[#allocation53_spill] sm:$0xff]  ;;  %v2651_v22 = vld [vmem:[%s9716_s10 + $0x1a8] sm:$0xff] }
 0x3b3   :  { %10014 = vst [vmem:[#allocation39_spill] sm:$0xff] %v7636_v9  ;;  %v2490_v13 = vmul.f32 %v2395_v25, %v10019_v1  ;;  %v2400_v17 = vadd.f32 %v7468_v35, %v2319_v50  ;;  %v2321_v46 = vadd.f32 %v2320_v34, %v10020_v33  ;;  %3037 = vmatpush1.msra.mxu1 %v2662_v16  ;;  %v2650_v50 = vld [vmem:[%s9716_s10 + $0x1a0] sm:$0xff]  ;;  %v10022_v16 = vld [vmem:[#allocation25_spill] sm:$0xff] }
 0x3b4   :  { %v2482_v31 = vadd.f32 %v2474_v26, %v2466_v45  ;;  %v2467_v11 = vadd.f32 %v7548_v48, %v2451_v54  ;;  %v2452_v30 = vadd.f32 %v7583_v63, %v2436_v15  ;;  %v2437_v56 = vadd.f32 %v2429_v47, %v2421_v5  ;;  %2883 = vmatmul.mubr.f32.gmra.mxu1 %v7636_v9  ;;  %v2324_v45 = vpop.f32.mrf.mxu1  ;;  %v10023_v49 = vld [vmem:[#allocation41_spill] sm:$0xff]  ;;  %v10025_v15 = vld [vmem:[#allocation4_spill] sm:$0xff]  ;;  %v10027_v33 = vld [vmem:[#allocation46_spill] sm:$0xff] }
 0x3b5   :  { %3038 = vmatprep.subr.mxu1 %v2657_v10  ;;  %v2475_v26 = vmul.f32 %v2400_v17, %v10022_v16  ;;  %v2401_v25 = vadd.f32 %v7471_v39, %v2321_v46  ;;  %v2325_v34 = vadd.f32 %v2324_v45, %v10023_v49  ;;  %v2645_v48 = vld [vmem:[%s9716_s10 + $0x178] sm:$0xff]  ;;  %v2445_v47 = vmul.f32 %v2410_v18, %v10025_v15  ;;  %v2644_v46 = vld [vmem:[%s9716_s10 + $0x170] sm:$0xff]  ;;  %v10030_v49 = vld [vmem:[#allocation66_spill] sm:$0xff] }
 0x3b6   :  { %v7663_v61 = vadd.f32 %v2490_v13, %v2482_v31  ;;  %3039 = vmatpush1.msra.mxu1 %v2656_v59  ;;  %v10024_v63 = vld [vmem:[#allocation9_spill] sm:$0xff]  ;;  %v2411_v10 = vadd.f32 %v7453_v60, %v2220_v36  ;;  %v2326_v5 = vpop.f32.mrf.mxu1  ;;  %2888 = vmatprep.mubr.f32.mxu1 %v9997_v28  ;;  %v10026_v31 = vld [vmem:[#allocation38_spill] sm:$0xff]  ;;  %v2639_v60 = vld [vmem:[%s9716_s10 + $0x148] sm:$0xff] }
 0x3b7   :  { %v2460_v54 = vmul.f32 %v7586_v43, %v10024_v63  ;;  %3040 = vmatprep.subr.mxu1 %v2651_v22  ;;  %v2483_v59 = vadd.f32 %v2475_v26, %v2467_v11  ;;  %v2491_v13 = vmul.f32 %v2401_v25, %v10026_v31  ;;  %v2406_v17 = vadd.f32 %v7468_v35, %v2325_v34  ;;  %v2638_v22 = vld [vmem:[%s9716_s10 + $0x140] sm:$0xff]  ;;  %v10029_v26 = vld [vmem:[#allocation15_spill] sm:$0xff] }
 0x3b8   :  { %10021 = vst [vmem:[#allocation27_spill] sm:$0xff] %v7663_v61  ;;  %v2327_v45 = vadd.f32 %v2326_v5, %v10027_v33  ;;  %3041 = vmatpush1.msra.mxu1 %v2650_v50  ;;  %v2453_v18 = vadd.f32 %v2445_v47, %v2437_v56  ;;  %v2330_v36 = vpop.f32.mrf.mxu1  ;;  %v10031_v56 = vld [vmem:[#allocation43_spill] sm:$0xff]  ;;  %v2632_v47 = vld [vmem:[%s9716_s10 + $0x110] sm:$0xff] }
 0x3b9   :  { %v2468_v43 = vadd.f32 %v2460_v54, %v2452_v30  ;;  %2889 = vmatmul.mubr.f32.gmra.mxu1 %v7663_v61  ;;  %3042 = vmatprep.subr.mxu1 %v2645_v48  ;;  %v7689_v11 = vadd.f32 %v2491_v13, %v2483_v59  ;;  %v2476_v25 = vmul.f32 %v2406_v17, %v10029_v26  ;;  %v2633_v30 = vld [vmem:[%s9716_s10 + $0x118] sm:$0xff]  ;;  %v10032_v59 = vld [vmem:[#allocation28_spill] sm:$0xff] }
 0x3ba   :  { %v2407_v50 = vadd.f32 %v7471_v39, %v2327_v45  ;;  %v2331_v34 = vadd.f32 %v2330_v36, %v10030_v49  ;;  %3043 = vmatpush1.msra.mxu1 %v2644_v46  ;;  %v2461_v48 = vmul.f32 %v2411_v10, %v10031_v56  ;;  %v2332_v54 = vpop.f32.mrf.mxu1  ;;  %2894 = vmatprep.mubr.f32.mxu1 %v9997_v28  ;;  %v10033_v46 = vld [vmem:[#allocation68_spill] sm:$0xff]  ;;  %v2627_v10 = vld [vmem:[%s9716_s10 + $0xe8] sm:$0xff]  ;;  %v10035_v36 = vld [vmem:[#allocation10_spill] sm:$0xff] }
 0x3bb   :  { %10028 = vst [vmem:[#allocation13_spill] sm:$0xff] %v7689_v11  ;;  %3044 = vmatprep.subr.mxu1 %v2639_v60  ;;  %v2484_v5 = vadd.f32 %v2476_v25, %v2468_v43  ;;  %v2333_v33 = vadd.f32 %v2332_v54, %v10033_v46  ;;  %v2626_v60 = vld [vmem:[%s9716_s10 + $0xe0] sm:$0xff]  ;;  %v10036_v49 = vld [vmem:[#allocation17_spill] sm:$0xff] }
 0x3bc   :  { %v2492_v13 = vmul.f32 %v2407_v50, %v10032_v59  ;;  %v2412_v17 = vadd.f32 %v7468_v35, %v2331_v34  ;;  %3045 = vmatpush1.msra.mxu1 %v2638_v22  ;;  %v2469_v45 = vadd.f32 %v2461_v48, %v2453_v18  ;;  %v2621_v18 = vld [vmem:[%s9716_s10 + $0xb8] sm:$0xff]  ;;  %v2620_v22 = vld [vmem:[%s9716_s10 + $0xb0] sm:$0xff]  ;;  %v2690_v46 = vld [vmem:[%s9716_s10 + $0x2e0] sm:$0xff] }
 0x3bd   :  { %2895 = vmatmul.mubr.f32.gmra.mxu1 %v7689_v11  ;;  %3046 = vmatprep.subr.mxu1 %v2633_v30  ;;  %v2413_v35 = vadd.f32 %v7471_v39, %v2333_v33  ;;  %v2615_v39 = vld [vmem:[%s9716_s10 + $0x88] sm:$0xff]  ;;  %v2614_v30 = vld [vmem:[%s9716_s10 + $0x80] sm:$0xff]  ;;  %v2609_v54 = vld [vmem:[%s9716_s10 + $0x58] sm:$0xff] }
 0x3be   :  { %v7712_v43 = vadd.f32 %v2492_v13, %v2484_v5  ;;  %v2477_v25 = vmul.f32 %v2412_v17, %v10035_v36  ;;  %3047 = vmatpush1.msra.mxu1 %v2632_v47  ;;  %2900 = vmatprep.mubr.f32.mxu1 %v9997_v28  ;;  %v2608_v47 = vld [vmem:[%s9716_s10 + $0x50] sm:$0xff]  ;;  %v2603_v5 = vld [vmem:[%s9716_s10 + $0x28] sm:$0xff]  ;;  %v2602_v13 = vld [vmem:[%s9716_s10 + $0x20] sm:$0xff] }
 0x3bf   :  { %3048 = vmatprep.subr.mxu1 %v2627_v10  ;;  %v2493_v34 = vmul.f32 %v2413_v35, %v10036_v49  ;;  %v2691_v17 = vld [vmem:[%s9716_s10 + $0x2e8] sm:$0xff]  ;;  %v2685_v33 = vld [vmem:[%s9716_s10 + $0x2b8] sm:$0xff]  ;;  %v5525_v35 = vld [vmem:[%s9812_s25 + $0x10] sm:$0xff] }
 0x3c0   :  { %10034 = vst [vmem:[#allocation45_spill] sm:$0xff] %v7712_v43  ;;  %v2485_v50 = vadd.f32 %v2477_v25, %v2469_v45  ;;  %3049 = vmatpush1.msra.mxu1 %v2626_v60  ;;  %v5524_v10 = vld [vmem:[%s9812_s25 + $0x8] sm:$0xff]  ;;  %v2684_v45 = vld [vmem:[%s9716_s10 + $0x2b0] sm:$0xff]  ;;  %v2678_v25 = vld [vmem:[%s9716_s10 + $0x280] sm:$0xff] }
 0x3c1   :  { %2901 = vmatmul.mubr.f32.gmra.mxu1 %v7712_v43  ;;  %3050 = vmatprep.subr.mxu1 %v2621_v18  ;;  %v2679_v60 = vld [vmem:[%s9716_s10 + $0x288] sm:$0xff]  ;;  %v2673_v18 = vld [vmem:[%s9716_s10 + $0x258] sm:$0xff] }
 0x3c2   :  { %v7731_v48 = vadd.f32 %v2493_v34, %v2485_v50  ;;  %3051 = vmatpush1.msra.mxu1 %v2620_v22  ;;  %2906 = vmatprep.mubr.f32.mxu1 %v9997_v28  ;;  %v5526_v22 = vld [vmem:[%s9812_s25 + $0x18] sm:$0xff]  ;;  %v2672_v50 = vld [vmem:[%s9716_s10 + $0x250] sm:$0xff]  ;;  %v2667_v34 = vld [vmem:[%s9716_s10 + $0x228] sm:$0xff] }
 0x3c3   :  { %3052 = vmatprep.subr.mxu1 %v2615_v39  ;;  %v2666_v39 = vld [vmem:[%s9716_s10 + $0x220] sm:$0xff] }
 0x3c4   :  { %10037 = vst [vmem:[#allocation44_spill] sm:$0xff] %v7731_v48  ;;  %3053 = vmatpush1.msra.mxu1 %v2614_v30  ;;  %5330 = vmatprep.subr.mxu0 %v7731_v48  ;;  %v2661_v30 = vld [vmem:[%s9716_s10 + $0x1f8] sm:$0xff] }
 0x3c5   :  { %2907 = vmatmul.mubr.f32.gmra.mxu1 %v7731_v48  ;;  %3054 = vmatprep.subr.mxu1 %v2609_v54  ;;  %v5527_v54 = vld [vmem:[%s9812_s25 + $0x20] sm:$0xff] }
 0x3c6   :  { %5331 = vmatpush3.msra.mxu0 %v7731_v48  ;;  %3055 = vmatpush1.msra.mxu1 %v2608_v47  ;;  %v2660_v47 = vld [vmem:[%s9716_s10 + $0x1f0] sm:$0xff] }
 0x3c7   :  { %5332 = vmatprep.subr.mxu0 %v7712_v43  ;;  %3056 = vmatprep.subr.mxu1 %v2603_v5  ;;  %v5528_v5 = vld [vmem:[%s9812_s25 + $0x28] sm:$0xff] }
 0x3c8   :  { %5333 = vmatpush3.msra.mxu0 %v7712_v43  ;;  %3057 = vmatpush1.msra.mxu1 %v2602_v13  ;;  %v2655_v13 = vld [vmem:[%s9716_s10 + $0x1c8] sm:$0xff] }
 0x3c9   :  { %3090 = vmatprep.mubr.f32.mxu1 %v9997_v28  ;;  %5334 = vmatprep.subr.mxu0 %v7689_v11 }
 0x3ca   :  { %3091 = vmatmul.mubr.f32.vlgmr.msra.gmra.mxu1 %v7550_v0  ;;  %5335 = vmatpush3.msra.mxu0 %v7689_v11 }
 0x3cb   :  { %5336 = vmatprep.subr.mxu0 %v7663_v61  ;;  %3096 = vmatprep.mubr.f32.mxu1 %v9997_v28 }
 0x3cc   :  { %5337 = vmatpush3.msra.mxu0 %v7663_v61 }
 0x3cd   :  { %5338 = vmatprep.subr.mxu0 %v7636_v9 }
 0x3ce   :  { %3097 = vmatmul.mubr.f32.gmra.mxu1 %v7590_v20  ;;  %5339 = vmatpush3.msra.mxu0 %v7636_v9 }
 0x3cf   :  { %5340 = vmatprep.subr.mxu0 %v7608_v4  ;;  %3102 = vmatprep.mubr.f32.mxu1 %v9997_v28 }
 0x3d0   :  { %5341 = vmatpush3.msra.mxu0 %v7608_v4 }
 0x3d1   :  { %5342 = vmatprep.subr.mxu0 %v7590_v20 }
 0x3d2   :  { %3103 = vmatmul.mubr.f32.gmra.mxu1 %v7608_v4  ;;  %5343 = vmatpush3.msra.mxu0 %v7590_v20 }
 0x3d3   :  { %5344 = vmatprep.subr.mxu0 %v7550_v0  ;;  %3108 = vmatprep.mubr.f32.mxu1 %v9997_v28 }
 0x3d4   :  { %5345 = vmatpush3.msra.mxu0 %v7550_v0 }
 0x3d5   :  { %5347 = vmatmul.mubr.msk.f32.vlgmr.msra.gmra.mxu0 %vm135_vm0, %v5524_v10  ;;  %2913 = vmatprep.subr.mxu0 %v2691_v17  ;;  %v2654_v17 = vld [vmem:[%s9716_s10 + $0x1c0] sm:$0xff]  ;;  %v2648_v10 = vld [vmem:[%s9716_s10 + $0x190] sm:$0xff] }
 0x3d6   :  { %3109 = vmatmul.mubr.f32.gmra.mxu1 %v7636_v9  ;;  %2914 = vmatpush1.msra.mxu0 %v2690_v46  ;;  %v2649_v46 = vld [vmem:[%s9716_s10 + $0x198] sm:$0xff] }
 0x3d7   :  { %2915 = vmatprep.subr.mxu0 %v2685_v33  ;;  %3114 = vmatprep.mubr.f32.mxu1 %v9997_v28  ;;  %v5529_v33 = vld [vmem:[%s9812_s25 + $0x30] sm:$0xff] }
 0x3d8   :  { %2916 = vmatpush1.msra.mxu0 %v2684_v45  ;;  %5349 = vmatprep.mubr.msk.f32.mxu0 %vm135_vm0, %v5525_v35  ;;  %v5530_v45 = vld [vmem:[%s9812_s25 + $0x38] sm:$0xff] }
 0x3d9   :  { %2917 = vmatprep.subr.mxu0 %v2679_v60  ;;  %5350 = vmatmul.mubr.msk.f32.gmra.mxu0 %vm135_vm0, %v5526_v22  ;;  %v2643_v60 = vld [vmem:[%s9716_s10 + $0x168] sm:$0xff]  ;;  %v2637_v35 = vld [vmem:[%s9716_s10 + $0x138] sm:$0xff] }
 0x3da   :  { %3115 = vmatmul.mubr.f32.gmra.mxu1 %v7663_v61  ;;  %2918 = vmatpush1.msra.mxu0 %v2678_v25  ;;  %v2642_v25 = vld [vmem:[%s9716_s10 + $0x160] sm:$0xff]  ;;  %v2631_v22 = vld [vmem:[%s9716_s10 + $0x108] sm:$0xff] }
 0x3db   :  { %2919 = vmatprep.subr.mxu0 %v2673_v18  ;;  %3120 = vmatprep.mubr.f32.mxu1 %v9997_v28  ;;  %v2636_v18 = vld [vmem:[%s9716_s10 + $0x130] sm:$0xff] }
 0x3dc   :  { %2920 = vmatpush1.msra.mxu0 %v2672_v50  ;;  %5352 = vmatprep.mubr.msk.f32.mxu0 %vm135_vm0, %v5527_v54  ;;  %v2630_v50 = vld [vmem:[%s9716_s10 + $0x100] sm:$0xff] }
 0x3dd   :  { %2921 = vmatprep.subr.mxu0 %v2667_v34  ;;  %5353 = vmatmul.mubr.msk.f32.gmra.mxu0 %vm135_vm0, %v5528_v5  ;;  %v2625_v34 = vld [vmem:[%s9716_s10 + $0xd8] sm:$0xff]  ;;  %v2618_v54 = vld [vmem:[%s9716_s10 + $0xa0] sm:$0xff]  ;;  %v2612_v5 = vld [vmem:[%s9716_s10 + $0x70] sm:$0xff] }
 0x3de   :  { %3121 = vmatmul.mubr.f32.gmra.mxu1 %v7689_v11  ;;  %2922 = vmatpush1.msra.mxu0 %v2666_v39  ;;  %v2624_v39 = vld [vmem:[%s9716_s10 + $0xd0] sm:$0xff] }
 0x3df   :  { %2923 = vmatprep.subr.mxu0 %v2661_v30  ;;  %3126 = vmatprep.mubr.f32.mxu1 %v9997_v28  ;;  %v2619_v30 = vld [vmem:[%s9716_s10 + $0xa8] sm:$0xff] }
 0x3e0   :  { %2924 = vmatpush1.msra.mxu0 %v2660_v47  ;;  %5355 = vmatprep.mubr.msk.f32.mxu0 %vm135_vm0, %v5529_v33  ;;  %v2613_v47 = vld [vmem:[%s9716_s10 + $0x78] sm:$0xff]  ;;  %v2600_v33 = vld [vmem:[%s9716_s10 + $0x10] sm:$0xff] }
 0x3e1   :  { %2925 = vmatprep.subr.mxu0 %v2655_v13  ;;  %5356 = vmatmul.mubr.msk.f32.gmra.mxu0 %vm135_vm0, %v5530_v45  ;;  %v2607_v13 = vld [vmem:[%s9716_s10 + $0x48] sm:$0xff] }
 0x3e2   :  { %3127 = vmatmul.mubr.f32.gmra.mxu1 %v7712_v43  ;;  %2926 = vmatpush1.msra.mxu0 %v2654_v17  ;;  %v2606_v17 = vld [vmem:[%s9716_s10 + $0x40] sm:$0xff]  ;;  %v2595_v45 = vld [vmem:[%s9718_s9 + $0x2e8] sm:$0xff] }
 0x3e3   :  { %2927 = vmatprep.subr.mxu0 %v2649_v46  ;;  %3132 = vmatprep.mubr.f32.mxu1 %v9997_v28  ;;  %v2601_v46 = vld [vmem:[%s9716_s10 + $0x18] sm:$0xff] }
 0x3e4   :  { %2928 = vmatpush1.msra.mxu0 %v2648_v10  ;;  %2977 = vmatprep.mubr.f32.mxu0 %v9997_v28  ;;  %v2593_v10 = vld [vmem:[%s9718_s9 + $0x2d8] sm:$0xff] }
 0x3e5   :  { %2929 = vmatprep.subr.mxu0 %v2643_v60  ;;  %v2592_v60 = vld [vmem:[%s9718_s9 + $0x2d0] sm:$0xff]  ;;  %3252 = vmatprep.subr.mxu1 %v2595_v45 }
 0x3e6   :  { %3133 = vmatmul.mubr.f32.gmra.mxu1 %v7731_v48  ;;  %2930 = vmatpush1.msra.mxu0 %v2642_v25  ;;  %v2594_v25 = vld [vmem:[%s9718_s9 + $0x2e0] sm:$0xff]  ;;  %v2568_v45 = vld [vmem:[%s9718_s9 + $0x210] sm:$0xff] }
 0x3e7   :  { %2931 = vmatprep.subr.mxu0 %v2637_v35  ;;  %3316 = vmatprep.mubr.f32.mxu1 %v9997_v28  ;;  %v2587_v35 = vld [vmem:[%s9718_s9 + $0x2a8] sm:$0xff] }
 0x3e8   :  { %2932 = vmatpush1.msra.mxu0 %v2636_v18  ;;  %v2589_v18 = vld [vmem:[%s9718_s9 + $0x2b8] sm:$0xff]  ;;  %3253 = vmatpush1.msra.mxu1 %v2594_v25 }
 0x3e9   :  { %2933 = vmatprep.subr.mxu0 %v2631_v22  ;;  %v2586_v22 = vld [vmem:[%s9718_s9 + $0x2a0] sm:$0xff]  ;;  %3254 = vmatprep.subr.mxu1 %v2589_v18  ;;  %v2565_v25 = vld [vmem:[%s9718_s9 + $0x1f8] sm:$0xff]  ;;  %v2564_v18 = vld [vmem:[%s9718_s9 + $0x1f0] sm:$0xff] }
 0x3ea   :  { %2934 = vmatpush1.msra.mxu0 %v2630_v50  ;;  %v2588_v50 = vld [vmem:[%s9718_s9 + $0x2b0] sm:$0xff] }
 0x3eb   :  { %2935 = vmatprep.subr.mxu0 %v2625_v34  ;;  %v2581_v34 = vld [vmem:[%s9718_s9 + $0x278] sm:$0xff]  ;;  %3255 = vmatpush1.msra.mxu1 %v2588_v50  ;;  %v2559_v50 = vld [vmem:[%s9718_s9 + $0x1c8] sm:$0xff] }
 0x3ec   :  { %2936 = vmatpush1.msra.mxu0 %v2624_v39  ;;  %v2583_v39 = vld [vmem:[%s9718_s9 + $0x288] sm:$0xff] }
 0x3ed   :  { %2937 = vmatprep.subr.mxu0 %v2619_v30  ;;  %v2580_v30 = vld [vmem:[%s9718_s9 + $0x270] sm:$0xff]  ;;  %3256 = vmatprep.subr.mxu1 %v2583_v39  ;;  %v2558_v39 = vld [vmem:[%s9718_s9 + $0x1c0] sm:$0xff] }
 0x3ee   :  { %2938 = vmatpush1.msra.mxu0 %v2618_v54  ;;  %v2582_v54 = vld [vmem:[%s9718_s9 + $0x280] sm:$0xff] }
 0x3ef   :  { %2939 = vmatprep.subr.mxu0 %v2613_v47  ;;  %v2575_v47 = vld [vmem:[%s9718_s9 + $0x248] sm:$0xff]  ;;  %3257 = vmatpush1.msra.mxu1 %v2582_v54  ;;  %v2553_v54 = vld [vmem:[%s9718_s9 + $0x198] sm:$0xff] }
 0x3f0   :  { %2940 = vmatpush1.msra.mxu0 %v2612_v5  ;;  %v2577_v5 = vld [vmem:[%s9718_s9 + $0x258] sm:$0xff] }
 0x3f1   :  { %2941 = vmatprep.subr.mxu0 %v2607_v13  ;;  %v2574_v13 = vld [vmem:[%s9718_s9 + $0x240] sm:$0xff]  ;;  %3258 = vmatprep.subr.mxu1 %v2577_v5 }
 0x3f2   :  { %2942 = vmatpush1.msra.mxu0 %v2606_v17  ;;  %v2576_v17 = vld [vmem:[%s9718_s9 + $0x250] sm:$0xff]  ;;  %v2550_v5 = vld [vmem:[%s9718_s9 + $0x180] sm:$0xff] }
 0x3f3   :  { %2943 = vmatprep.subr.mxu0 %v2601_v46  ;;  %v2569_v46 = vld [vmem:[%s9718_s9 + $0x218] sm:$0xff]  ;;  %3259 = vmatpush1.msra.mxu1 %v2576_v17  ;;  %v2547_v17 = vld [vmem:[%s9718_s9 + $0x168] sm:$0xff] }
 0x3f4   :  { %2944 = vmatpush1.msra.mxu0 %v2600_v33  ;;  %v2571_v33 = vld [vmem:[%s9718_s9 + $0x228] sm:$0xff] }
 0x3f5   :  { %2978 = vmatmul.mubr.f32.vlgmr.msra.gmra.mxu0 %v7550_v0  ;;  %3139 = vmatprep.subr.mxu0 %v2593_v10  ;;  %v2570_v10 = vld [vmem:[%s9718_s9 + $0x220] sm:$0xff] }
 0x3f6   :  { %2983 = vmatprep.mubr.f32.mxu0 %v9997_v28  ;;  %3140 = vmatpush1.msra.mxu0 %v2592_v60  ;;  %v2563_v60 = vld [vmem:[%s9718_s9 + $0x1e8] sm:$0xff] }
 0x3f7   :  { %3141 = vmatprep.subr.mxu0 %v2587_v35  ;;  %3260 = vmatprep.subr.mxu1 %v2571_v33  ;;  %v2562_v35 = vld [vmem:[%s9718_s9 + $0x1e0] sm:$0xff] }
 0x3f8   :  { %3142 = vmatpush1.msra.mxu0 %v2586_v22  ;;  %3261 = vmatpush1.msra.mxu1 %v2570_v10  ;;  %v2557_v22 = vld [vmem:[%s9718_s9 + $0x1b8] sm:$0xff]  ;;  %v2546_v33 = vld [vmem:[%s9718_s9 + $0x160] sm:$0xff]  ;;  %v2539_v10 = vld [vmem:[%s9718_s9 + $0x128] sm:$0xff] }
 0x3f9   :  { %2984 = vmatmul.mubr.f32.gmra.mxu0 %v7590_v20  ;;  %3143 = vmatprep.subr.mxu0 %v2581_v34  ;;  %v2556_v34 = vld [vmem:[%s9718_s9 + $0x1b0] sm:$0xff] }
 0x3fa   :  { %2989 = vmatprep.mubr.f32.mxu0 %v9997_v28  ;;  %3144 = vmatpush1.msra.mxu0 %v2580_v30  ;;  %v2551_v30 = vld [vmem:[%s9718_s9 + $0x188] sm:$0xff] }
 0x3fb   :  { %3145 = vmatprep.subr.mxu0 %v2575_v47  ;;  %3262 = vmatprep.subr.mxu1 %v2565_v25  ;;  %v2552_v47 = vld [vmem:[%s9718_s9 + $0x190] sm:$0xff] }
 0x3fc   :  { %3146 = vmatpush1.msra.mxu0 %v2574_v13  ;;  %3263 = vmatpush1.msra.mxu1 %v2564_v18  ;;  %v2545_v13 = vld [vmem:[%s9718_s9 + $0x158] sm:$0xff]  ;;  %v2540_v25 = vld [vmem:[%s9718_s9 + $0x130] sm:$0xff]  ;;  %v2535_v18 = vld [vmem:[%s9718_s9 + $0x108] sm:$0xff] }
 0x3fd   :  { %2990 = vmatmul.mubr.f32.gmra.mxu0 %v7608_v4  ;;  %3147 = vmatprep.subr.mxu0 %v2569_v46  ;;  %v2544_v46 = vld [vmem:[%s9718_s9 + $0x150] sm:$0xff] }
 0x3fe   :  { %2995 = vmatprep.mubr.f32.mxu0 %v9997_v28  ;;  %3148 = vmatpush1.msra.mxu0 %v2568_v45  ;;  %v2541_v45 = vld [vmem:[%s9718_s9 + $0x138] sm:$0xff] }
 0x3ff   :  { %3149 = vmatprep.subr.mxu0 %v2563_v60  ;;  %3264 = vmatprep.subr.mxu1 %v2559_v50  ;;  %v2538_v60 = vld [vmem:[%s9718_s9 + $0x120] sm:$0xff] }
 0x400   :  { %3150 = vmatpush1.msra.mxu0 %v2562_v35  ;;  %3265 = vmatpush1.msra.mxu1 %v2558_v39  ;;  %v2533_v35 = vld [vmem:[%s9718_s9 + $0xf8] sm:$0xff]  ;;  %v2534_v50 = vld [vmem:[%s9718_s9 + $0x100] sm:$0xff] }
 0x401   :  { %2996 = vmatmul.mubr.f32.gmra.mxu0 %v7636_v9  ;;  %3151 = vmatprep.subr.mxu0 %v2557_v22  ;;  %v2532_v22 = vld [vmem:[%s9718_s9 + $0xf0] sm:$0xff]  ;;  %v2529_v39 = vld [vmem:[%s9718_s9 + $0xd8] sm:$0xff] }
 0x402   :  { %3001 = vmatprep.mubr.f32.mxu0 %v9997_v28  ;;  %3152 = vmatpush1.msra.mxu0 %v2556_v34  ;;  %v2527_v34 = vld [vmem:[%s9718_s9 + $0xc8] sm:$0xff] }
 0x403   :  { %3153 = vmatprep.subr.mxu0 %v2551_v30  ;;  %3266 = vmatprep.subr.mxu1 %v2553_v54  ;;  %v2526_v30 = vld [vmem:[%s9718_s9 + $0xc0] sm:$0xff]  ;;  %v2528_v54 = vld [vmem:[%s9718_s9 + $0xd0] sm:$0xff] }
 0x404   :  { %3267 = vmatpush1.msra.mxu1 %v2552_v47  ;;  %3154 = vmatpush1.msra.mxu0 %v2550_v5  ;;  %v2521_v47 = vld [vmem:[%s9718_s9 + $0x98] sm:$0xff]  ;;  %v2523_v5 = vld [vmem:[%s9718_s9 + $0xa8] sm:$0xff] }
 0x405   :  { %3002 = vmatmul.mubr.f32.gmra.mxu0 %v7663_v61  ;;  %3155 = vmatprep.subr.mxu0 %v2545_v13  ;;  %v2520_v13 = vld [vmem:[%s9718_s9 + $0x90] sm:$0xff] }
 0x406   :  { %3007 = vmatprep.mubr.f32.mxu0 %v9997_v28  ;;  %3268 = vmatprep.subr.mxu1 %v2547_v17  ;;  %v2522_v17 = vld [vmem:[%s9718_s9 + $0xa0] sm:$0xff] }
 0x407   :  { %3156 = vmatpush1.msra.mxu0 %v2544_v46  ;;  %3269 = vmatpush1.msra.mxu1 %v2546_v33  ;;  %v2515_v46 = vld [vmem:[%s9718_s9 + $0x68] sm:$0xff]  ;;  %v2517_v33 = vld [vmem:[%s9718_s9 + $0x78] sm:$0xff] }
 0x408   :  { %3157 = vmatprep.subr.mxu0 %v2539_v10  ;;  %3270 = vmatprep.subr.mxu1 %v2541_v45  ;;  %v2514_v10 = vld [vmem:[%s9718_s9 + $0x60] sm:$0xff]  ;;  %v2516_v45 = vld [vmem:[%s9718_s9 + $0x70] sm:$0xff] }
 0x409   :  { %3008 = vmatmul.mubr.f32.gmra.mxu0 %v7689_v11  ;;  %3271 = vmatpush1.msra.mxu1 %v2540_v25  ;;  %v2511_v25 = vld [vmem:[%s9718_s9 + $0x48] sm:$0xff] }
 0x40a   :  { %3013 = vmatprep.mubr.f32.mxu0 %v9997_v28  ;;  %3158 = vmatpush1.msra.mxu0 %v2538_v60  ;;  %v2509_v60 = vld [vmem:[%s9718_s9 + $0x38] sm:$0xff] }
 0x40b   :  { %3159 = vmatprep.subr.mxu0 %v2533_v35  ;;  %3272 = vmatprep.subr.mxu1 %v2535_v18  ;;  %v2508_v35 = vld [vmem:[%s9718_s9 + $0x30] sm:$0xff]  ;;  %v2510_v18 = vld [vmem:[%s9718_s9 + $0x40] sm:$0xff] }
 0x40c   :  { %3160 = vmatpush1.msra.mxu0 %v2532_v22  ;;  %3273 = vmatpush1.msra.mxu1 %v2534_v50  ;;  %v2503_v22 = vld [vmem:[%s9718_s9 + $0x8] sm:$0xff]  ;;  %v2505_v50 = vld [vmem:[%s9718_s9 + $0x18] sm:$0xff] }
 0x40d   :  { %3014 = vmatmul.mubr.f32.gmra.mxu0 %v7712_v43  ;;  %3161 = vmatprep.subr.mxu0 %v2527_v34  ;;  %v2502_v34 = vld [vmem:[%s9718_s9] sm:$0xff] }
 0x40e   :  { %3019 = vmatprep.mubr.f32.mxu0 %v9997_v28  ;;  %3274 = vmatprep.subr.mxu1 %v2529_v39  ;;  %v2504_v39 = vld [vmem:[%s9718_s9 + $0x10] sm:$0xff] }
 0x40f   :  { %3162 = vmatpush1.msra.mxu0 %v2526_v30  ;;  %3275 = vmatpush1.msra.mxu1 %v2528_v54  ;;  %v2597_v30 = vld [vmem:[%s9718_s9 + $0x2f8] sm:$0xff] }
 0x410   :  { %3163 = vmatprep.subr.mxu0 %v2521_v47  ;;  %3276 = vmatprep.subr.mxu1 %v2523_v5  ;;  %v2596_v47 = vld [vmem:[%s9718_s9 + $0x2f0] sm:$0xff] }
 0x411   :  { %3020 = vmatmul.mubr.f32.gmra.mxu0 %v7731_v48  ;;  %3277 = vmatpush1.msra.mxu1 %v2522_v17  ;;  %v2590_v17 = vld [vmem:[%s9718_s9 + $0x2c0] sm:$0xff] }
 0x412   :  { %3164 = vmatpush1.msra.mxu0 %v2520_v13  ;;  %3278 = vmatprep.subr.mxu1 %v2517_v33  ;;  %v2591_v13 = vld [vmem:[%s9718_s9 + $0x2c8] sm:$0xff] }
 0x413   :  { %3165 = vmatprep.subr.mxu0 %v2515_v46  ;;  %3279 = vmatpush1.msra.mxu1 %v2516_v45  ;;  %v2585_v46 = vld [vmem:[%s9718_s9 + $0x298] sm:$0xff]  ;;  %v2579_v45 = vld [vmem:[%s9718_s9 + $0x268] sm:$0xff] }
 0x414   :  { %3166 = vmatpush1.msra.mxu0 %v2514_v10  ;;  %3280 = vmatprep.subr.mxu1 %v2511_v25  ;;  %v2584_v10 = vld [vmem:[%s9718_s9 + $0x290] sm:$0xff]  ;;  %v2573_v25 = vld [vmem:[%s9718_s9 + $0x238] sm:$0xff] }
 0x415   :  { %3167 = vmatprep.subr.mxu0 %v2509_v60  ;;  %3281 = vmatpush1.msra.mxu1 %v2510_v18  ;;  %v2578_v60 = vld [vmem:[%s9718_s9 + $0x260] sm:$0xff]  ;;  %v2572_v18 = vld [vmem:[%s9718_s9 + $0x230] sm:$0xff] }
 0x416   :  { %3168 = vmatpush1.msra.mxu0 %v2508_v35  ;;  %3282 = vmatprep.subr.mxu1 %v2505_v50  ;;  %v2566_v50 = vld [vmem:[%s9718_s9 + $0x200] sm:$0xff] }
 0x417   :  { %3169 = vmatprep.subr.mxu0 %v2503_v22  ;;  %3203 = vmatprep.mubr.f32.mxu0 %v9997_v28  ;;  %v2567_v22 = vld [vmem:[%s9718_s9 + $0x208] sm:$0xff] }
 0x418   :  { %3170 = vmatpush1.msra.mxu0 %v2502_v34  ;;  %3283 = vmatpush1.msra.mxu1 %v2504_v39  ;;  %v2561_v34 = vld [vmem:[%s9718_s9 + $0x1d8] sm:$0xff] }
 0x419   :  { %3365 = vmatprep.subr.mxu0 %v2597_v30  ;;  %v2560_v30 = vld [vmem:[%s9718_s9 + $0x1d0] sm:$0xff] }
 0x495   :  { %v8116_v54 = vpop.f32.mrf.mxu0 }
 0x497   :  { %v8121_v5 = vpop.f32.mrf.mxu0 }
 0x498   :  { %3204 = vmatmul.mubr.f32.vlgmr.msra.gmra.mxu0 %v8121_v5  ;;  %3317 = vmatmul.mubr.f32.vlgmr.msra.gmra.mxu1 %v8121_v5 }
 0x499   :  { %3366 = vmatpush1.msra.mxu0 %v2596_v47  ;;  %3209 = vmatprep.mubr.f32.mxu0 %v9997_v28  ;;  %v8136_v33 = vpop.f32.mrf.mxu0  ;;  %v2555_v47 = vld [vmem:[%s9718_s9 + $0x1a8] sm:$0xff] }
 0x49a   :  { %3367 = vmatprep.subr.mxu0 %v2591_v13  ;;  %3322 = vmatprep.mubr.f32.mxu1 %v9997_v28  ;;  %v2554_v13 = vld [vmem:[%s9718_s9 + $0x1a0] sm:$0xff] }
 0x49b   :  { %3368 = vmatpush1.msra.mxu0 %v2590_v17  ;;  %v8154_v35 = vpop.f32.mrf.mxu0  ;;  %v2549_v17 = vld [vmem:[%s9718_s9 + $0x178] sm:$0xff] }
 0x49c   :  { %3210 = vmatmul.mubr.f32.gmra.mxu0 %v8116_v54  ;;  %3323 = vmatmul.mubr.f32.gmra.mxu1 %v8116_v54 }
 0x49d   :  { %3369 = vmatprep.subr.mxu0 %v2585_v46  ;;  %3215 = vmatprep.mubr.f32.mxu0 %v9997_v28  ;;  %v8171_v39 = vpop.f32.mrf.mxu0 }
 0x49e   :  { %3370 = vmatpush1.msra.mxu0 %v2584_v10  ;;  %3328 = vmatprep.mubr.f32.mxu1 %v9997_v28  ;;  %v2548_v10 = vld [vmem:[%s9718_s9 + $0x170] sm:$0xff] }
 0x49f   :  { %3371 = vmatprep.subr.mxu0 %v2579_v45  ;;  %v2781_v46 = vpop.f32.mrf.mxu0  ;;  %v2543_v45 = vld [vmem:[%s9718_s9 + $0x148] sm:$0xff] }
 0x4a0   :  { %3372 = vmatpush1.msra.mxu0 %v2578_v60  ;;  %3329 = vmatmul.mubr.f32.gmra.mxu1 %v8154_v35  ;;  %v2542_v60 = vld [vmem:[%s9718_s9 + $0x140] sm:$0xff] }
 0x4a1   :  { %3216 = vmatmul.mubr.f32.gmra.mxu0 %v8154_v35  ;;  %3373 = vmatprep.subr.mxu0 %v2573_v25  ;;  %v2537_v25 = vld [vmem:[%s9718_s9 + $0x118] sm:$0xff] }
 0x4a2   :  { %3374 = vmatpush1.msra.mxu0 %v2572_v18  ;;  %3221 = vmatprep.mubr.f32.mxu0 %v9997_v28  ;;  %v5357_v18 = vpop.f32.mrf.mxu0 }
 0x4a3   :  { %3375 = vmatprep.subr.mxu0 %v2567_v22  ;;  %3334 = vmatprep.mubr.f32.mxu1 %v9997_v28  ;;  %v2536_v22 = vld [vmem:[%s9718_s9 + $0x110] sm:$0xff] }
 0x4a4   :  { %3376 = vmatpush1.msra.mxu0 %v2566_v50  ;;  %3335 = vmatmul.mubr.f32.gmra.mxu1 %v8136_v33  ;;  %v2531_v50 = vld [vmem:[%s9718_s9 + $0xe8] sm:$0xff] }
 0x4a5   :  { %3222 = vmatmul.mubr.f32.gmra.mxu0 %v8136_v33  ;;  %3377 = vmatprep.subr.mxu0 %v2561_v34  ;;  %v2530_v34 = vld [vmem:[%s9718_s9 + $0xe0] sm:$0xff] }
 0x4a6   :  { %3378 = vmatpush1.msra.mxu0 %v2560_v30  ;;  %3227 = vmatprep.mubr.f32.mxu0 %v9997_v28  ;;  %v2525_v30 = vld [vmem:[%s9718_s9 + $0xb8] sm:$0xff] }
 0x4a7   :  { %3379 = vmatprep.subr.mxu0 %v2555_v47  ;;  %3340 = vmatprep.mubr.f32.mxu1 %v9997_v28  ;;  %v2791_v47 = vpop.f32.mrf.mxu0 }
 0x4a8   :  { %3380 = vmatpush1.msra.mxu0 %v2554_v13  ;;  %3341 = vmatmul.mubr.f32.gmra.mxu1 %v2781_v46  ;;  %v2524_v13 = vld [vmem:[%s9718_s9 + $0xb0] sm:$0xff] }
 0x4a9   :  { %3228 = vmatmul.mubr.f32.gmra.mxu0 %v2781_v46  ;;  %3381 = vmatprep.subr.mxu0 %v2549_v17  ;;  %v2519_v17 = vld [vmem:[%s9718_s9 + $0x88] sm:$0xff] }
 0x4aa   :  { %3382 = vmatpush1.msra.mxu0 %v2548_v10  ;;  %3233 = vmatprep.mubr.f32.mxu0 %v9997_v28  ;;  %v2518_v10 = vld [vmem:[%s9718_s9 + $0x80] sm:$0xff] }
 0x4ab   :  { %3383 = vmatprep.subr.mxu0 %v2543_v45  ;;  %3346 = vmatprep.mubr.f32.mxu1 %v9997_v28  ;;  %v2513_v45 = vld [vmem:[%s9718_s9 + $0x58] sm:$0xff] }
 0x4ac   :  { %3384 = vmatpush1.msra.mxu0 %v2542_v60  ;;  %3347 = vmatmul.mubr.f32.gmra.mxu1 %v8171_v39  ;;  %v2512_v60 = vld [vmem:[%s9718_s9 + $0x50] sm:$0xff] }
 0x4ad   :  { %3234 = vmatmul.mubr.f32.gmra.mxu0 %v8171_v39  ;;  %3385 = vmatprep.subr.mxu0 %v2537_v25  ;;  %v2507_v25 = vld [vmem:[%s9718_s9 + $0x28] sm:$0xff] }
 0x4ae   :  { %3386 = vmatpush1.msra.mxu0 %v2536_v22  ;;  %3239 = vmatprep.mubr.f32.mxu0 %v9997_v28  ;;  %v2506_v22 = vld [vmem:[%s9718_s9 + $0x20] sm:$0xff] }
 0x4af   :  { %3387 = vmatprep.subr.mxu0 %v2531_v50  ;;  %3352 = vmatprep.mubr.f32.mxu1 %v9997_v28  ;;  %v5531_v50 = vld [vmem:[%s9812_s25] sm:$0xff] }
 0x4b0   :  { %3388 = vmatpush1.msra.mxu0 %v2530_v34  ;;  %3353 = vmatmul.mubr.f32.gmra.mxu1 %v2791_v47  ;;  %v3825_v34 = vld [vmem:[%s9719_s13 + $0x2a0] sm:$0xff] }
 0x4b1   :  { %3240 = vmatmul.mubr.f32.gmra.mxu0 %v2791_v47  ;;  %3389 = vmatprep.subr.mxu0 %v2525_v30  ;;  %v3820_v30 = vld [vmem:[%s9719_s13 + $0x278] sm:$0xff] }
 0x4b2   :  { %3390 = vmatpush1.msra.mxu0 %v2524_v13  ;;  %3245 = vmatprep.mubr.f32.mxu0 %v9997_v28  ;;  %v3814_v13 = vld [vmem:[%s9719_s13 + $0x248] sm:$0xff] }
 0x4b3   :  { %3391 = vmatprep.subr.mxu0 %v2519_v17  ;;  %3358 = vmatprep.mubr.f32.mxu1 %v9997_v28 }
 0x4b4   :  { %3392 = vmatpush1.msra.mxu0 %v2518_v10  ;;  %3359 = vmatmul.mubr.f32.gmra.mxu1 %v5357_v18  ;;  %v3813_v10 = vld [vmem:[%s9719_s13 + $0x240] sm:$0xff] }
 0x4b5   :  { %3246 = vmatmul.mubr.f32.gmra.mxu0 %v5357_v18  ;;  %3393 = vmatprep.subr.mxu0 %v2513_v45  ;;  %v3808_v45 = vld [vmem:[%s9719_s13 + $0x218] sm:$0xff]  ;;  %v2979_v43 = vpop.f32.mrf.mxu0 }
 0x4b6   :  { %3394 = vmatpush1.msra.mxu0 %v2512_v60  ;;  %3429 = vmatprep.mubr.f32.mxu0 %v9997_v28  ;;  %v3807_v60 = vld [vmem:[%s9719_s13 + $0x210] sm:$0xff] }
 0x4b7   :  { %3395 = vmatprep.subr.mxu0 %v2507_v25  ;;  %5374 = vmatprep.mubr.msk.f32.mxu1 %vm135_vm0, %v5531_v50  ;;  %v3801_v50 = vld [vmem:[%s9719_s13 + $0x1e0] sm:$0xff] }
 0x4b8   :  { %3396 = vmatpush1.msra.mxu0 %v2506_v22  ;;  %v3802_v22 = vld [vmem:[%s9719_s13 + $0x1e8] sm:$0xff] }
 0x4b9   :  { %3430 = vmatmul.mubr.f32.vlgmr.msra.gmra.mxu0 %v8121_v5 }
 0x4ba   :  { %3435 = vmatprep.mubr.f32.mxu0 %v9997_v28 }
 0x4bd   :  { %3436 = vmatmul.mubr.f32.gmra.mxu0 %v8116_v54  ;;  %v8261_v54 = vpop.f32.mrf.mxu1 }
 0x4be   :  { %3441 = vmatprep.mubr.f32.mxu0 %v9997_v28 }
 0x4bf   :  { %v8263_v5 = vpop.f32.mrf.mxu1 }
 0x4c1   :  { %3442 = vmatmul.mubr.f32.gmra.mxu0 %v8154_v35  ;;  %v3832_v35 = vld [vmem:[%s9719_s13 + $0x2d8] sm:$0xff] }
 0x4c2   :  { %3447 = vmatprep.mubr.f32.mxu0 %v9997_v28  ;;  %3943 = vmatprep.subr.mxu0 %v3832_v35  ;;  %v3796_v35 = vld [vmem:[%s9719_s13 + $0x1b8] sm:$0xff] }
 0x4c5   :  { %3448 = vmatmul.mubr.f32.gmra.mxu0 %v8136_v33  ;;  %v8265_v33 = vpop.f32.mrf.mxu1 }
 0x4c6   :  { %3453 = vmatprep.mubr.f32.mxu0 %v9997_v28 }
 0x4c9   :  { %3454 = vmatmul.mubr.f32.gmra.mxu0 %v2781_v46  ;;  %v3826_v46 = vld [vmem:[%s9719_s13 + $0x2a8] sm:$0xff] }
 0x4ca   :  { %3459 = vmatprep.mubr.f32.mxu0 %v9997_v28 }
 0x4cd   :  { %3460 = vmatmul.mubr.f32.gmra.mxu0 %v8171_v39  ;;  %v3831_v39 = vld [vmem:[%s9719_s13 + $0x2d0] sm:$0xff] }
 0x4ce   :  { %3465 = vmatprep.mubr.f32.mxu0 %v9997_v28  ;;  %3944 = vmatpush1.msra.mxu0 %v3831_v39  ;;  %v3795_v39 = vld [vmem:[%s9719_s13 + $0x1b0] sm:$0xff] }
 0x4cf   :  { %3945 = vmatprep.subr.mxu0 %v3826_v46 }
 0x4d0   :  { %3946 = vmatpush1.msra.mxu0 %v3825_v34  ;;  %v3790_v34 = vld [vmem:[%s9719_s13 + $0x188] sm:$0xff] }
 0x4d1   :  { %3466 = vmatmul.mubr.f32.gmra.mxu0 %v2791_v47  ;;  %3947 = vmatprep.subr.mxu0 %v3820_v30  ;;  %v3819_v47 = vld [vmem:[%s9719_s13 + $0x270] sm:$0xff]  ;;  %v3789_v30 = vld [vmem:[%s9719_s13 + $0x180] sm:$0xff] }
 0x4d2   :  { %3471 = vmatprep.mubr.f32.mxu0 %v9997_v28  ;;  %3948 = vmatpush1.msra.mxu0 %v3819_v47  ;;  %v3784_v47 = vld [vmem:[%s9719_s13 + $0x158] sm:$0xff] }
 0x4d3   :  { %3949 = vmatprep.subr.mxu0 %v3814_v13  ;;  %v3783_v13 = vld [vmem:[%s9719_s13 + $0x150] sm:$0xff] }
 0x4d4   :  { %3950 = vmatpush1.msra.mxu0 %v3813_v10 }
 0x4d5   :  { %3472 = vmatmul.mubr.f32.gmra.mxu0 %v5357_v18  ;;  %v8276_v18 = vpop.f32.mrf.mxu1  ;;  %3951 = vmatprep.subr.mxu0 %v3808_v45  ;;  %v3778_v45 = vld [vmem:[%s9719_s13 + $0x128] sm:$0xff] }
 0x4d6   :  { %4007 = vmatprep.mubr.f32.mxu0 %v9997_v28  ;;  %3952 = vmatpush1.msra.mxu0 %v3807_v60  ;;  %v3777_v60 = vld [vmem:[%s9719_s13 + $0x120] sm:$0xff] }
 0x4d7   :  { %v8290_v17 = vpop.f32.mrf.mxu1  ;;  %3953 = vmatprep.subr.mxu0 %v3802_v22  ;;  %v3772_v22 = vld [vmem:[%s9719_s13 + $0xf8] sm:$0xff] }
 0x4d8   :  { %3954 = vmatpush1.msra.mxu0 %v3801_v50  ;;  %v3771_v50 = vld [vmem:[%s9719_s13 + $0xf0] sm:$0xff] }
 0x4d9   :  { %v8301_v25 = vpop.f32.mrf.mxu1  ;;  %3955 = vmatprep.subr.mxu0 %v3796_v35 }
 0x4da   :  { %3956 = vmatpush1.msra.mxu0 %v3795_v39  ;;  %v3766_v39 = vld [vmem:[%s9719_s13 + $0xc8] sm:$0xff] }
 0x4db   :  { %v8315_v46 = vpop.f32.mrf.mxu1  ;;  %3957 = vmatprep.subr.mxu0 %v3790_v34  ;;  %v3765_v34 = vld [vmem:[%s9719_s13 + $0xc0] sm:$0xff] }
 0x4dc   :  { %3958 = vmatpush1.msra.mxu0 %v3789_v30  ;;  %v3760_v30 = vld [vmem:[%s9719_s13 + $0x98] sm:$0xff] }
 0x4dd   :  { %3959 = vmatprep.subr.mxu0 %v3784_v47  ;;  %v8329_v10 = vpop.f32.mrf.mxu1  ;;  %v3759_v47 = vld [vmem:[%s9719_s13 + $0x90] sm:$0xff] }
 0x4de   :  { %3960 = vmatpush1.msra.mxu0 %v3783_v13 }
 0x4df   :  { %3961 = vmatprep.subr.mxu0 %v3778_v45  ;;  %v8343_v35 = vpop.f32.mrf.mxu1  ;;  %v3754_v45 = vld [vmem:[%s9719_s13 + $0x68] sm:$0xff] }
 0x4e0   :  { %3962 = vmatpush1.msra.mxu0 %v3777_v60  ;;  %v3753_v60 = vld [vmem:[%s9719_s13 + $0x60] sm:$0xff] }
 0x4e1   :  { %3963 = vmatprep.subr.mxu0 %v3772_v22  ;;  %v8357_v13 = vpop.f32.mrf.mxu1  ;;  %v3748_v22 = vld [vmem:[%s9719_s13 + $0x38] sm:$0xff] }
 0x4e2   :  { %3964 = vmatpush1.msra.mxu0 %v3771_v50  ;;  %v3747_v50 = vld [vmem:[%s9719_s13 + $0x30] sm:$0xff] }
 0x4e3   :  { %3965 = vmatprep.subr.mxu0 %v3766_v39  ;;  %v8371_v39 = vpop.f32.mrf.mxu1 }
 0x4e4   :  { %3966 = vmatpush1.msra.mxu0 %v3765_v34  ;;  %10038 = vst [vmem:[#allocation29_spill] sm:$0xff] %v8371_v39  ;;  %v3742_v34 = vld [vmem:[%s9719_s13 + $0x8] sm:$0xff] }
 0x4e5   :  { %3967 = vmatprep.subr.mxu0 %v3760_v30  ;;  %v3741_v30 = vld [vmem:[%s9719_s13] sm:$0xff] }
 0x4e6   :  { %3968 = vmatpush1.msra.mxu0 %v3759_v47  ;;  %v3836_v47 = vld [vmem:[%s9719_s13 + $0x2f8] sm:$0xff] }
 0x4e7   :  { %3969 = vmatprep.subr.mxu0 %v3754_v45  ;;  %v8382_v45 = vpop.f32.mrf.mxu1 }
 0x4e8   :  { %3970 = vmatpush1.msra.mxu0 %v3753_v60  ;;  %10039 = vst [vmem:[#allocation18_spill] sm:$0xff] %v8382_v45 }
 0x4e9   :  { %3971 = vmatprep.subr.mxu0 %v3748_v22  ;;  %v8384_v60 = vpop.f32.mrf.mxu1 }
 0x4ea   :  { %3972 = vmatpush1.msra.mxu0 %v3747_v50  ;;  %10040 = vst [vmem:[#allocation22_spill] sm:$0xff] %v8384_v60 }
 0x4eb   :  { %3973 = vmatprep.subr.mxu0 %v3742_v34  ;;  %v8386_v22 = vpop.f32.mrf.mxu1 }
 0x4ec   :  { %3974 = vmatpush1.msra.mxu0 %v3741_v30  ;;  %10041 = vst [vmem:[#allocation24_spill] sm:$0xff] %v8386_v22  ;;  %v8396_v30 = vpop.f32.mrf.mxu0 }
 0x4ed   :  { %4169 = vmatprep.subr.mxu0 %v3836_v47  ;;  %v8388_v50 = vpop.f32.mrf.mxu1 }
 0x4ee   :  { %10042 = vst [vmem:[#allocation31_spill] sm:$0xff] %v8388_v50  ;;  %v8400_v47 = vpop.f32.mrf.mxu0 }
 0x4ef   :  { %v8390_v48 = vpop.f32.mrf.mxu1 }
 0x4f0   :  { %10043 = vst [vmem:[#allocation49_spill] sm:$0xff] %v8390_v48  ;;  %v8404_v4 = vpop.f32.mrf.mxu0 }
 0x4f1   :  { %v8392_v34 = vpop.f32.mrf.mxu1 }
 0x4f2   :  { %10044 = vst [vmem:[#allocation16_spill] sm:$0xff] %v8392_v34  ;;  %v8408_v0 = vpop.f32.mrf.mxu0 }
 0x4f3   :  { %v8394_v11 = vpop.f32.mrf.mxu1 }
 0x4f4   :  { %10045 = vst [vmem:[#allocation14_spill] sm:$0xff] %v8394_v11  ;;  %v8412_v36 = vpop.f32.mrf.mxu0  ;;  %v10066_v11 = vld [vmem:[#allocation57_spill] sm:$0xff] }
 0x4f5   :  { %v8398_v61 = vpop.f32.mrf.mxu1 }
 0x4f6   :  { %10046 = vst [vmem:[#allocation33_spill] sm:$0xff] %v8398_v61  ;;  %v8416_v56 = vpop.f32.mrf.mxu0 }
 0x4f7   :  { %v8402_v9 = vpop.f32.mrf.mxu1 }
 0x4f8   :  { %10047 = vst [vmem:[#allocation42_spill] sm:$0xff] %v8402_v9  ;;  %v8420_v31 = vpop.f32.mrf.mxu0 }
 0x4f9   :  { %v8406_v20 = vpop.f32.mrf.mxu1 }
 0x4fa   :  { %10048 = vst [vmem:[#allocation34_spill] sm:$0xff] %v8406_v20  ;;  %v8424_v63 = vpop.f32.mrf.mxu0 }
 0x4fb   :  { %v8410_v49 = vpop.f32.mrf.mxu1 }
 0x4fc   :  { %10049 = vst [vmem:[#allocation67_spill] sm:$0xff] %v8410_v49  ;;  %v8428_v1 = vpop.f32.mrf.mxu0 }
 0x4fd   :  { %v8414_v59 = vpop.f32.mrf.mxu1 }
 0x4fe   :  { %10050 = vst [vmem:[#allocation48_spill] sm:$0xff] %v8414_v59  ;;  %v8432_v6 = vpop.f32.mrf.mxu0 }
 0x4ff   :  { %v8418_v26 = vpop.f32.mrf.mxu1 }
 0x500   :  { %10051 = vst [vmem:[#allocation35_spill] sm:$0xff] %v8418_v26  ;;  %v8436_v58 = vpop.f32.mrf.mxu0 }
 0x501   :  { %v8422_v15 = vpop.f32.mrf.mxu1  ;;  %10056 = vst [vmem:[#allocation46_spill] sm:$0xff] %v8436_v58 }
 0x502   :  { %10052 = vst [vmem:[#allocation37_spill] sm:$0xff] %v8422_v15  ;;  %v8440_v26 = vpop.f32.mrf.mxu0 }
 0x503   :  { %v8426_v16 = vpop.f32.mrf.mxu1  ;;  %10058 = vst [vmem:[#allocation68_spill] sm:$0xff] %v8440_v26 }
 0x504   :  { %10053 = vst [vmem:[#allocation69_spill] sm:$0xff] %v8426_v16  ;;  %v8444_v15 = vpop.f32.mrf.mxu0 }
 0x505   :  { %v8430_v21 = vpop.f32.mrf.mxu1  ;;  %10060 = vst [vmem:[#allocation71_spill] sm:$0xff] %v8444_v15  ;;  %v10065_v15 = vld [vmem:[#allocation55_spill] sm:$0xff] }
 0x506   :  { %10054 = vst [vmem:[#allocation51_spill] sm:$0xff] %v8430_v21  ;;  %v8448_v16 = vpop.f32.mrf.mxu0 }
 0x507   :  { %v8434_v38 = vpop.f32.mrf.mxu1  ;;  %10062 = vst [vmem:[#allocation73_spill] sm:$0xff] %v8448_v16 }
 0x508   :  { %10055 = vst [vmem:[#allocation41_spill] sm:$0xff] %v8434_v38  ;;  %v8452_v21 = vpop.f32.mrf.mxu0 }
 0x509   :  { %v8438_v44 = vpop.f32.mrf.mxu1  ;;  %10064 = vst [vmem:[#allocation75_spill] sm:$0xff] %v8452_v21 }
 0x50a   :  { %10057 = vst [vmem:[#allocation66_spill] sm:$0xff] %v8438_v44 }
 0x50b   :  { %v8442_v51 = vpop.f32.mrf.mxu1 }
 0x50c   :  { %10059 = vst [vmem:[#allocation70_spill] sm:$0xff] %v8442_v51 }
 0x50d   :  { %v8446_v50 = vpop.f32.mrf.mxu1 }
 0x50e   :  { %10061 = vst [vmem:[#allocation72_spill] sm:$0xff] %v8446_v50  ;;  %v2694_v50 = vld [vmem:[%s9720_s11] sm:$0x3f] }
 0x50f   :  { %v8450_v59 = vpop.f32.mrf.mxu1  ;;  %v8459_v21 = vrot.slane %v2694_v50, %v10065_v15  ;;  %v8463_v45 = vrot.slane %v2694_v50, %v10066_v11 }
 0x510   :  { %10063 = vst [vmem:[#allocation74_spill] sm:$0xff] %v8450_v59 }
 0x558   :  { %v3205_v28 = vpop.f32.mrf.mxu0  ;;  %v3318_v38 = vpop.f32.mrf.mxu1 }
 0x559   :  { %v3206_v26 = vadd.f32 %v3205_v28, %v8261_v54  ;;  %v3319_v37 = vadd.f32 %v3318_v38, %v2979_v43 }
 0x55a   :  { %v3207_v48 = vpop.f32.mrf.mxu0  ;;  %v3320_v49 = vpop.f32.mrf.mxu1 }
 0x55b   :  { %v3208_v59 = vadd.f32 %v3207_v48, %v8263_v5  ;;  %v8469_v48 = vrot.slane %v2694_v50, %v6386_v53  ;;  %v3509_v28 = vadd.f32 %v8463_v45, %v3206_v26  ;;  %v3321_v26 = vadd.f32 %v3320_v49, %v8396_v30  ;;  %v10067_v49 = vld [vmem:[#allocation60_spill] sm:$0xff] }
 0x55c   :  { %v3211_v20 = vpop.f32.mrf.mxu0  ;;  %v3324_v44 = vpop.f32.mrf.mxu1  ;;  %v8493_v30 = vrot.slane %v2694_v50, %v10067_v49 }
 0x55d   :  { %v3510_v58 = vadd.f32 %v8459_v21, %v3208_v59  ;;  %v3212_v39 = vadd.f32 %v3211_v20, %v8265_v33  ;;  %v8478_v20 = vrot.slane %v2694_v50, %v6390_v40  ;;  %v3511_v43 = vadd.f32 %v8469_v48, %v3319_v37 }
 0x55e   :  { %v3213_v22 = vpop.f32.mrf.mxu0  ;;  %v3326_v60 = vpop.f32.mrf.mxu1  ;;  %v3557_v33 = vmul.f32 %v3509_v28, %v6328_v52 }
 0x55f   :  { %v3214_v23 = vadd.f32 %v3213_v22, %v8276_v18  ;;  %v3565_v59 = vmul.f32 %v3510_v58, %v6334_v57  ;;  %v3515_v38 = vadd.f32 %v8463_v45, %v3212_v39 }
 0x560   :  { %v3330_v55 = vpop.f32.mrf.mxu1 }
 0x561   :  { %v3217_v51 = vpop.f32.mrf.mxu0  ;;  %v3516_v54 = vadd.f32 %v8459_v21, %v3214_v23 }
 0x562   :  { %v3332_v9 = vpop.f32.mrf.mxu1  ;;  %v3218_v11 = vadd.f32 %v3217_v51, %v8290_v17  ;;  %v3327_v17 = vadd.f32 %v3326_v60, %v8404_v4 }
 0x563   :  { %v3219_v16 = vpop.f32.mrf.mxu0  ;;  %v3566_v58 = vmul.f32 %v3516_v54, %v9965_v19 }
 0x564   :  { %v3336_v24 = vpop.f32.mrf.mxu1  ;;  %v3220_v5 = vadd.f32 %v3219_v16, %v8301_v25  ;;  %v3325_v16 = vadd.f32 %v3324_v44, %v8400_v47  ;;  %v3331_v25 = vadd.f32 %v3330_v55, %v8408_v0  ;;  %v3558_v47 = vmul.f32 %v3515_v38, %v6318_v14 }
 0x565   :  { %v3223_v61 = vpop.f32.mrf.mxu0  ;;  %v3337_v4 = vadd.f32 %v3336_v24, %v8416_v56  ;;  %v3581_v55 = vmul.f32 %v3511_v43, %v6434_v7  ;;  %v3512_v0 = vadd.f32 %v8478_v20, %v3321_v26 }
 0x566   :  { %v3338_v34 = vpop.f32.mrf.mxu1  ;;  %v3522_v23 = vadd.f32 %v8459_v21, %v3220_v5  ;;  %v3224_v51 = vadd.f32 %v3223_v61, %v8315_v46  ;;  %v8496_v61 = vrot.slane %v2694_v50, %v9967_v27  ;;  %v3573_v46 = vadd.f32 %v3565_v59, %v3557_v33 }
 0x567   :  { %v3225_v2 = vpop.f32.mrf.mxu0  ;;  %v3517_v5 = vadd.f32 %v8469_v48, %v3325_v16  ;;  %v3574_v54 = vadd.f32 %v3566_v58, %v3558_v47  ;;  %v3518_v50 = vadd.f32 %v8478_v20, %v3327_v17  ;;  %v3333_v59 = vadd.f32 %v3332_v9, %v8412_v36 }
 0x568   :  { %v3226_v18 = vadd.f32 %v3225_v2, %v8329_v10  ;;  %v3342_v22 = vpop.f32.mrf.mxu1  ;;  %v3521_v10 = vadd.f32 %v8463_v45, %v3218_v11  ;;  %v3567_v11 = vmul.f32 %v3522_v23, %v6256_v32  ;;  %v3527_v60 = vadd.f32 %v8463_v45, %v3224_v51 }
 0x569   :  { %v3229_v15 = vpop.f32.mrf.mxu0  ;;  %v3339_v56 = vadd.f32 %v3338_v34, %v8420_v31  ;;  %v3589_v23 = vadd.f32 %v3581_v55, %v3573_v46  ;;  %v3582_v51 = vmul.f32 %v3517_v5, %v6344_v41  ;;  %v3529_v33 = vadd.f32 %v8469_v48, %v3337_v4  ;;  %v10069_v5 = vld [vmem:[#allocation21_spill] sm:$0xff] }
 0x56a   :  { %v3528_v44 = vadd.f32 %v8459_v21, %v3226_v18  ;;  %v3344_v37 = vpop.f32.mrf.mxu1  ;;  %v3523_v18 = vadd.f32 %v8469_v48, %v3331_v25  ;;  %v3559_v38 = vmul.f32 %v3521_v10, %v6308_v8  ;;  %v3343_v58 = vadd.f32 %v3342_v22, %v8424_v63 }
 0x56b   :  { %v3231_v29 = vpop.f32.mrf.mxu0  ;;  %v3560_v9 = vmul.f32 %v3527_v60, %v6298_v62  ;;  %v3230_v36 = vadd.f32 %v3229_v15, %v8343_v35  ;;  %v3345_v25 = vadd.f32 %v3344_v37, %v8428_v1  ;;  %v3524_v34 = vadd.f32 %v8478_v20, %v3333_v59  ;;  %v10068_v35 = vld [vmem:[#allocation56_spill] sm:$0xff]  ;;  %v10070_v60 = vld [vmem:[#allocation29_spill] sm:$0xff]  ;;  %v10071_v59 = vld [vmem:[#allocation58_spill] sm:$0xff] }
 0x56c   :  { %v3568_v24 = vmul.f32 %v3528_v44, %v6227_v12  ;;  %v3232_v16 = vadd.f32 %v3231_v29, %v8357_v13  ;;  %v3348_v43 = vpop.f32.mrf.mxu1  ;;  %v3575_v17 = vadd.f32 %v3567_v11, %v3559_v38  ;;  %v3597_v29 = vmul.f32 %v3512_v0, %v6422_v42 }
 0x56d   :  { %v3235_v2 = vpop.f32.mrf.mxu0  ;;  %v3583_v13 = vmul.f32 %v3523_v18, %v6304_v3  ;;  %v3349_v10 = vadd.f32 %v3348_v43, %v8432_v6  ;;  %v3590_v44 = vadd.f32 %v3582_v51, %v3574_v54  ;;  %v3530_v63 = vadd.f32 %v8478_v20, %v3339_v56  ;;  %v10072_v56 = vld [vmem:[#allocation46_spill] sm:$0xff]  ;;  %v10073_v43 = vld [vmem:[#allocation16_spill] sm:$0xff] }
 0x56e   :  { %v3576_v46 = vadd.f32 %v3568_v24, %v3560_v9  ;;  %v3534_v22 = vadd.f32 %v8459_v21, %v3232_v16  ;;  %v3350_v47 = vpop.f32.mrf.mxu1  ;;  %v3605_v1 = vadd.f32 %v3597_v29, %v3589_v23  ;;  %v3598_v37 = vmul.f32 %v3518_v50, %v10068_v35  ;;  %v10076_v29 = vld [vmem:[#allocation12_spill] sm:$0xff] }
 0x56f   :  { %v3237_v39 = vpop.f32.mrf.mxu0  ;;  %v3584_v4 = vmul.f32 %v3529_v33, %v10069_v5  ;;  %v3535_v55 = vadd.f32 %v8469_v48, %v3343_v58  ;;  %v3591_v0 = vadd.f32 %v3583_v13, %v3575_v17  ;;  %v3533_v11 = vadd.f32 %v8463_v45, %v3230_v36  ;;  %v10074_v33 = vld [vmem:[#allocation54_spill] sm:$0xff]  ;;  %v10075_v17 = vld [vmem:[#allocation8_spill] sm:$0xff] }
 0x570   :  { %v3536_v6 = vadd.f32 %v8478_v20, %v3345_v25  ;;  %v3236_v54 = vadd.f32 %v3235_v2, %v10070_v60  ;;  %v3599_v38 = vmul.f32 %v3524_v34, %v10071_v59  ;;  %v3541_v24 = vadd.f32 %v8469_v48, %v3349_v10  ;;  %v10077_v13 = vld [vmem:[#allocation18_spill] sm:$0xff]  ;;  %v3354_v60 = vpop.f32.mrf.mxu1 }
 0x571   :  { %v8505_v28 = vpop.f32.mrf.mxu0  ;;  %v3351_v16 = vadd.f32 %v3350_v47, %v10072_v56  ;;  %v3606_v23 = vadd.f32 %v3598_v37, %v3590_v44  ;;  %v3592_v51 = vadd.f32 %v3584_v4, %v3576_v46  ;;  %v3600_v58 = vmul.f32 %v3530_v63, %v10074_v33  ;;  %v10078_v59 = vld [vmem:[#allocation14_spill] sm:$0xff]  ;;  %v10079_v47 = vld [vmem:[#allocation7_spill] sm:$0xff] }
 0x572   :  { %v3569_v9 = vmul.f32 %v3534_v22, %v10075_v17  ;;  %v3585_v25 = vmul.f32 %v3535_v55, %v10076_v29  ;;  %v3238_v2 = vadd.f32 %v3237_v39, %v10077_v13  ;;  %v3607_v5 = vadd.f32 %v3599_v38, %v3591_v0  ;;  %v10081_v22 = vld [vmem:[#allocation61_spill] sm:$0xff]  ;;  %v3356_v13 = vpop.f32.mrf.mxu1  ;;  %v10087_v17 = vld [vmem:[#allocation30_spill] sm:$0xff] }
 0x573   :  { %v8514_v26 = vpop.f32.mrf.mxu0  ;;  %v3561_v56 = vmul.f32 %v3533_v11, %v10079_v47  ;;  %v3539_v46 = vadd.f32 %v8463_v45, %v3236_v54  ;;  %v8554_v37 = vmul.f32 %v3541_v24, %v10081_v22  ;;  %v3542_v4 = vadd.f32 %v8478_v20, %v3351_v16  ;;  %v10082_v39 = vld [vmem:[#allocation65_spill] sm:$0xff]  ;;  %v10085_v24 = vld [vmem:[#allocation11_spill] sm:$0xff]  ;;  %v10086_v47 = vld [vmem:[#allocation42_spill] sm:$0xff] }
 0x574   :  { %v10084_v38 = vld [vmem:[#allocation33_spill] sm:$0xff]  ;;  %v3540_v54 = vadd.f32 %v8459_v21, %v3238_v2 }
 0x575   :  { %v8522_v31 = vpop.f32.mrf.mxu0  ;;  %v3577_v0 = vadd.f32 %v3569_v9, %v3561_v56  ;;  %v10090_v56 = vld [vmem:[#allocation47_spill] sm:$0xff] }
 0x577   :  { %v8530_v15 = vpop.f32.mrf.mxu0 }
 0x579   :  { %v3431_v18 = vpop.f32.mrf.mxu0 }
 0x57a   :  { %v3432_v50 = vadd.f32 %v3431_v18, %v10073_v43  ;;  %v10080_v18 = vld [vmem:[#allocation52_spill] sm:$0xff] }
 0x57b   :  { %v3433_v36 = vpop.f32.mrf.mxu0  ;;  %v8550_v44 = vmul.f32 %v3536_v6, %v10080_v18 }
 0x57c   :  { %v3513_v34 = vadd.f32 %v8493_v30, %v3432_v50  ;;  %v3434_v10 = vadd.f32 %v3433_v36, %v10078_v59  ;;  %v8559_v50 = vadd.f32 %v3600_v58, %v3592_v51  ;;  %v10083_v59 = vld [vmem:[#allocation68_spill] sm:$0xff] }
 0x57d   :  { %v3437_v63 = vpop.f32.mrf.mxu0  ;;  %v3355_v11 = vadd.f32 %v3354_v60, %v10083_v59  ;;  %v10089_v58 = vld [vmem:[#allocation24_spill] sm:$0xff]  ;;  %v10094_v59 = vld [vmem:[#allocation63_spill] sm:$0xff] }
 0x57e   :  { %v3613_v55 = vmul.f32 %v3513_v34, %v10082_v39  ;;  %v3514_v43 = vadd.f32 %v8496_v61, %v3434_v10  ;;  %v3438_v6 = vadd.f32 %v3437_v63, %v10084_v38  ;;  %v3562_v34 = vmul.f32 %v3539_v46, %v10087_v17  ;;  %v10088_v39 = vld [vmem:[#allocation22_spill] sm:$0xff]  ;;  %v3835_v46 = vld [vmem:[%s9719_s13 + $0x2f0] sm:$0xff] }
 0x57f   :  { %v3439_v36 = vpop.f32.mrf.mxu0  ;;  %v3242_v51 = vadd.f32 %v8505_v28, %v10088_v39  ;;  %v3244_v9 = vadd.f32 %v8514_v26, %v10089_v58  ;;  %v8573_v63 = vmul.f32 %v3542_v4, %v10090_v56  ;;  %v3593_v28 = vadd.f32 %v3585_v25, %v3577_v0  ;;  %v10093_v26 = vld [vmem:[#allocation71_spill] sm:$0xff]  ;;  %v3829_v25 = vld [vmem:[%s9719_s13 + $0x2c0] sm:$0xff] }
 0x580   :  { %v3621_v18 = vadd.f32 %v3613_v55, %v3605_v1  ;;  %v3629_v22 = vmul.f32 %v3514_v43, %v10085_v24  ;;  %v3440_v16 = vadd.f32 %v3439_v36, %v10086_v47  ;;  %v3519_v60 = vadd.f32 %v8493_v30, %v3438_v6  ;;  %v10092_v55 = vld [vmem:[#allocation34_spill] sm:$0xff]  ;;  %v10096_v36 = vld [vmem:[#allocation40_spill] sm:$0xff] }
 0x581   :  { %v3443_v10 = vpop.f32.mrf.mxu0  ;;  %v3547_v39 = vadd.f32 %v8469_v48, %v3355_v11  ;;  %v3357_v43 = vadd.f32 %v3356_v13, %v10093_v26  ;;  %v3546_v0 = vadd.f32 %v8459_v21, %v3244_v9  ;;  %v10098_v11 = vld [vmem:[#allocation49_spill] sm:$0xff]  ;;  %v10101_v9 = vld [vmem:[#allocation48_spill] sm:$0xff] }
 0x582   :  { %v8575_v2 = vadd.f32 %v3629_v22, %v3621_v18  ;;  %v3520_v1 = vadd.f32 %v8496_v61, %v3440_v16  ;;  %v3444_v47 = vadd.f32 %v3443_v10, %v10092_v55  ;;  %v3614_v38 = vmul.f32 %v3519_v60, %v10094_v59  ;;  %v3830_v18 = vld [vmem:[%s9719_s13 + $0x2c8] sm:$0xff]  ;;  %v10095_v22 = vld [vmem:[#allocation5_spill] sm:$0xff] }
 0x583   :  { %v3445_v6 = vpop.f32.mrf.mxu0  ;;  %v3570_v4 = vmul.f32 %v3540_v54, %v10095_v22  ;;  %v10097_v10 = vld [vmem:[#allocation67_spill] sm:$0xff]  ;;  %v3250_v13 = vadd.f32 %v8530_v15, %v10098_v11  ;;  %v10099_v54 = vmov 0.0   ;;  %v10102_v15 = vld [vmem:[#allocation6_spill] sm:$0xff] }
 0x584   :  { %10091 = vst [vmem:[#allocation60_spill] sm:$0xff] %v8575_v2  ;;  %v3630_v16 = vmul.f32 %v3520_v1, %v10096_v36  ;;  %v3525_v58 = vadd.f32 %v8493_v30, %v3444_v47  ;;  %v3446_v55 = vadd.f32 %v3445_v6, %v10097_v10  ;;  %4008 = vmatmul.mubr.f32.vlgmr.msra.gmra.mxu0 %v8575_v2  ;;  %v3824_v1 = vld [vmem:[%s9719_s13 + $0x298] sm:$0xff]  ;;  %v3360_v6 = vpop.f32.mrf.mxu1  ;;  %v10100_v10 = vld [vmem:[#allocation59_spill] sm:$0xff] }
 0x585   :  { %v3622_v60 = vadd.f32 %v3614_v38, %v3606_v23  ;;  %v3449_v26 = vpop.f32.mrf.mxu0  ;;  %4170 = vmatpush1.msra.mxu0 %v3835_v46  ;;  %4013 = vmatprep.mubr.f32.mxu0 %v10099_v54  ;;  %v3545_v47 = vadd.f32 %v8463_v45, %v3242_v51  ;;  %v8608_v23 = vmul.f32 %v3547_v39, %v10102_v15  ;;  %v10103_v38 = vld [vmem:[#allocation31_spill] sm:$0xff] }
 0x586   :  { %v3615_v36 = vmul.f32 %v3525_v58, %v10100_v10  ;;  %v3526_v59 = vadd.f32 %v8496_v61, %v3446_v55  ;;  %v3450_v22 = vadd.f32 %v3449_v26, %v10101_v9  ;;  %4171 = vmatprep.subr.mxu0 %v3830_v18  ;;  %v8611_v46 = vadd.f32 %v8478_v20, %v3357_v43  ;;  %v3823_v58 = vld [vmem:[%s9719_s13 + $0x290] sm:$0xff]  ;;  %v10105_v26 = vld [vmem:[#allocation19_spill] sm:$0xff] }
 0x587   :  { %v3248_v11 = vadd.f32 %v8522_v31, %v10103_v38  ;;  %v8615_v56 = vadd.f32 %v3630_v16, %v3622_v60  ;;  %v3451_v51 = vpop.f32.mrf.mxu0  ;;  %4172 = vmatpush1.msra.mxu0 %v3829_v25  ;;  %v10106_v9 = vld [vmem:[#allocation35_spill] sm:$0xff]  ;;  %v3578_v43 = vadd.f32 %v3570_v4, %v3562_v34  ;;  %v10108_v25 = vld [vmem:[#allocation73_spill] sm:$0xff]  ;;  %v3552_v15 = vadd.f32 %v8459_v21, %v3250_v13  ;;  %v10112_v13 = vld [vmem:[#allocation2_spill] sm:$0xff] }
 0x588   :  { %v3623_v55 = vadd.f32 %v3615_v36, %v3607_v5  ;;  %v3631_v18 = vmul.f32 %v3526_v59, %v10105_v26  ;;  %v3531_v39 = vadd.f32 %v8493_v30, %v3450_v22  ;;  %v3452_v10 = vadd.f32 %v3451_v51, %v10106_v9  ;;  %4173 = vmatprep.subr.mxu0 %v3824_v1  ;;  %v3818_v31 = vld [vmem:[%s9719_s13 + $0x268] sm:$0xff]  ;;  %v3817_v59 = vld [vmem:[%s9719_s13 + $0x260] sm:$0xff]  ;;  %v10111_v34 = vld [vmem:[#allocation37_spill] sm:$0xff] }
 0x589   :  { %10104 = vst [vmem:[#allocation29_spill] sm:$0xff] %v8615_v56  ;;  %v10107_v16 = vld [vmem:[#allocation3_spill] sm:$0xff]  ;;  %v3361_v38 = vadd.f32 %v3360_v6, %v10108_v25  ;;  %4014 = vmatmul.mubr.f32.gmra.mxu0 %v8615_v56  ;;  %v3455_v5 = vpop.f32.mrf.mxu0  ;;  %v10110_v36 = vld [vmem:[#allocation50_spill] sm:$0xff]  ;;  %v3812_v21 = vld [vmem:[%s9719_s13 + $0x238] sm:$0xff]  ;;  %v3563_v6 = vmul.f32 %v3545_v47, %v10112_v13  ;;  %v3551_v9 = vadd.f32 %v8463_v45, %v3248_v11 }
 0x58a   :  { %v3571_v60 = vmul.f32 %v3546_v0, %v10107_v16  ;;  %v8633_v22 = vadd.f32 %v3631_v18, %v3623_v55  ;;  %v3616_v1 = vmul.f32 %v3531_v39, %v10110_v36  ;;  %v3532_v51 = vadd.f32 %v8496_v61, %v3452_v10  ;;  %4174 = vmatpush1.msra.mxu0 %v3823_v58  ;;  %v3811_v10 = vld [vmem:[%s9719_s13 + $0x230] sm:$0xff]  ;;  %v3362_v18 = vpop.f32.mrf.mxu1  ;;  %v3806_v45 = vld [vmem:[%s9719_s13 + $0x208] sm:$0xff] }
 0x58b   :  { %v3456_v4 = vadd.f32 %v3455_v5, %v10111_v34  ;;  %v3609_v0 = vadd.f32 %v8550_v44, %v3593_v28  ;;  %4175 = vmatprep.subr.mxu0 %v3818_v31  ;;  %v3457_v55 = vpop.f32.mrf.mxu0  ;;  %4019 = vmatprep.mubr.f32.mxu0 %v10099_v54  ;;  %v10113_v39 = vld [vmem:[#allocation64_spill] sm:$0xff]  ;;  %v10114_v44 = vld [vmem:[#allocation69_spill] sm:$0xff]  ;;  %v3594_v47 = vadd.f32 %v8554_v37, %v3578_v43  ;;  %v10115_v31 = vld [vmem:[#allocation23_spill] sm:$0xff] }
 0x58c   :  { %10109 = vst [vmem:[#allocation46_spill] sm:$0xff] %v8633_v22  ;;  %v3624_v58 = vadd.f32 %v3616_v1, %v8559_v50  ;;  %v3632_v25 = vmul.f32 %v3532_v51, %v10113_v39  ;;  %v3458_v28 = vadd.f32 %v3457_v55, %v10114_v44  ;;  %4176 = vmatpush1.msra.mxu0 %v3817_v59  ;;  %v3805_v1 = vld [vmem:[%s9719_s13 + $0x200] sm:$0xff]  ;;  %v10117_v59 = vld [vmem:[#allocation36_spill] sm:$0xff]  ;;  %v10118_v44 = vld [vmem:[#allocation51_spill] sm:$0xff] }
 0x58d   :  { %v3537_v5 = vadd.f32 %v8493_v30, %v3456_v4  ;;  %v3579_v11 = vadd.f32 %v3571_v60, %v3563_v6  ;;  %v3572_v34 = vmul.f32 %v3552_v15, %v10115_v31  ;;  %4020 = vmatmul.mubr.f32.gmra.mxu0 %v8633_v22  ;;  %4177 = vmatprep.subr.mxu0 %v3812_v21  ;;  %v3461_v50 = vpop.f32.mrf.mxu0  ;;  %v3800_v37 = vld [vmem:[%s9719_s13 + $0x1d8] sm:$0xff]  ;;  %v10119_v15 = vld [vmem:[#allocation26_spill] sm:$0xff]  ;;  %v10120_v21 = vld [vmem:[#allocation75_spill] sm:$0xff] }
 0x58e   :  { %v8661_v51 = vadd.f32 %v3632_v25, %v3624_v58  ;;  %v3538_v55 = vadd.f32 %v8496_v61, %v3458_v28  ;;  %v3462_v39 = vadd.f32 %v3461_v50, %v10118_v44  ;;  %4178 = vmatpush1.msra.mxu0 %v3811_v10  ;;  %v3564_v43 = vmul.f32 %v3551_v9, %v10119_v15  ;;  %v3799_v25 = vld [vmem:[%s9719_s13 + $0x1d0] sm:$0xff]  ;;  %v10121_v10 = vld [vmem:[#allocation53_spill] sm:$0xff] }
 0x58f   :  { %v3617_v4 = vmul.f32 %v3537_v5, %v10117_v59  ;;  %v3553_v60 = vadd.f32 %v8469_v48, %v3361_v38  ;;  %v3363_v6 = vadd.f32 %v3362_v18, %v10120_v21  ;;  %4179 = vmatprep.subr.mxu0 %v3806_v45  ;;  %v3463_v58 = vpop.f32.mrf.mxu0  ;;  %4025 = vmatprep.mubr.f32.mxu0 %v10099_v54  ;;  %v10122_v44 = vld [vmem:[#allocation41_spill] sm:$0xff]  ;;  %v3794_v48 = vld [vmem:[%s9719_s13 + $0x1a8] sm:$0xff]  ;;  %v10125_v21 = vld [vmem:[#allocation66_spill] sm:$0xff] }
 0x590   :  { %10116 = vst [vmem:[#allocation16_spill] sm:$0xff] %v8661_v51  ;;  %v3633_v28 = vmul.f32 %v3538_v55, %v10121_v10  ;;  %v3543_v50 = vadd.f32 %v8493_v30, %v3462_v39  ;;  %v3464_v59 = vadd.f32 %v3463_v58, %v10122_v44  ;;  %4180 = vmatpush1.msra.mxu0 %v3805_v1  ;;  %v3793_v39 = vld [vmem:[%s9719_s13 + $0x1a0] sm:$0xff]  ;;  %v10124_v1 = vld [vmem:[#allocation25_spill] sm:$0xff] }
 0x591   :  { %v3625_v5 = vadd.f32 %v3617_v4, %v3609_v0  ;;  %v3610_v38 = vadd.f32 %v8573_v63, %v3594_v47  ;;  %v3595_v9 = vadd.f32 %v8608_v23, %v3579_v11  ;;  %v3580_v18 = vadd.f32 %v3572_v34, %v3564_v43  ;;  %4026 = vmatmul.mubr.f32.gmra.mxu0 %v8661_v51  ;;  %v3467_v0 = vpop.f32.mrf.mxu0  ;;  %v3788_v63 = vld [vmem:[%s9719_s13 + $0x178] sm:$0xff]  ;;  %v10127_v11 = vld [vmem:[#allocation4_spill] sm:$0xff]  ;;  %v10129_v44 = vld [vmem:[#allocation70_spill] sm:$0xff] }
 0x592   :  { %4181 = vmatprep.subr.mxu0 %v3800_v37  ;;  %v3618_v4 = vmul.f32 %v3543_v50, %v10124_v1  ;;  %v3544_v55 = vadd.f32 %v8496_v61, %v3464_v59  ;;  %v3468_v58 = vadd.f32 %v3467_v0, %v10125_v21  ;;  %v10126_v23 = vld [vmem:[#allocation9_spill] sm:$0xff]  ;;  %v3588_v34 = vmul.f32 %v3553_v60, %v10127_v11  ;;  %v3787_v59 = vld [vmem:[%s9719_s13 + $0x170] sm:$0xff] }
 0x593   :  { %v8688_v45 = vadd.f32 %v3633_v28, %v3625_v5  ;;  %4182 = vmatpush1.msra.mxu0 %v3799_v25  ;;  %v3603_v47 = vmul.f32 %v8611_v46, %v10126_v23  ;;  %v3554_v37 = vadd.f32 %v8478_v20, %v3363_v6  ;;  %v3469_v43 = vpop.f32.mrf.mxu0  ;;  %4031 = vmatprep.mubr.f32.mxu0 %v10099_v54  ;;  %v10128_v5 = vld [vmem:[#allocation38_spill] sm:$0xff]  ;;  %v3782_v20 = vld [vmem:[%s9719_s13 + $0x148] sm:$0xff]  ;;  %v10132_v21 = vld [vmem:[#allocation72_spill] sm:$0xff] }
 0x594   :  { %4183 = vmatprep.subr.mxu0 %v3794_v48  ;;  %v3626_v25 = vadd.f32 %v3618_v4, %v3610_v38  ;;  %v3634_v28 = vmul.f32 %v3544_v55, %v10128_v5  ;;  %v3549_v50 = vadd.f32 %v8493_v30, %v3468_v58  ;;  %v3470_v0 = vadd.f32 %v3469_v43, %v10129_v44  ;;  %v3781_v48 = vld [vmem:[%s9719_s13 + $0x140] sm:$0xff]  ;;  %v10131_v4 = vld [vmem:[#allocation15_spill] sm:$0xff] }
 0x595   :  { %10123 = vst [vmem:[#allocation18_spill] sm:$0xff] %v8688_v45  ;;  %4184 = vmatpush1.msra.mxu0 %v3793_v39  ;;  %v3611_v46 = vadd.f32 %v3603_v47, %v3595_v9  ;;  %v3596_v60 = vadd.f32 %v3588_v34, %v3580_v18  ;;  %v3473_v6 = vpop.f32.mrf.mxu0  ;;  %v3776_v9 = vld [vmem:[%s9719_s13 + $0x118] sm:$0xff]  ;;  %v10133_v18 = vld [vmem:[#allocation43_spill] sm:$0xff]  ;;  %v3775_v34 = vld [vmem:[%s9719_s13 + $0x110] sm:$0xff] }
 0x596   :  { %4032 = vmatmul.mubr.f32.gmra.mxu0 %v8688_v45  ;;  %4185 = vmatprep.subr.mxu0 %v3788_v63  ;;  %v8714_v38 = vadd.f32 %v3634_v28, %v3626_v25  ;;  %v3619_v55 = vmul.f32 %v3549_v50, %v10131_v4  ;;  %v3550_v39 = vadd.f32 %v8496_v61, %v3470_v0  ;;  %v10134_v25 = vld [vmem:[#allocation28_spill] sm:$0xff]  ;;  %v4953_v4 = vld [vmem:[%s9723_s17 + $0x68] sm:$0xff]  ;;  %v4952_v5 = vld [vmem:[%s9723_s17 + $0x60] sm:$0xff] }
 0x597   :  { %v3474_v58 = vadd.f32 %v3473_v6, %v10132_v21  ;;  %4186 = vmatpush1.msra.mxu0 %v3787_v59  ;;  %v3604_v63 = vmul.f32 %v3554_v37, %v10133_v18  ;;  %v3475_v47 = vpop.f32.mrf.mxu0  ;;  %4037 = vmatprep.mubr.f32.mxu0 %v10099_v54  ;;  %v10135_v59 = vld [vmem:[#allocation74_spill] sm:$0xff]  ;;  %v3770_v37 = vld [vmem:[%s9719_s13 + $0xe8] sm:$0xff]  ;;  %v10138_v21 = vld [vmem:[#allocation17_spill] sm:$0xff] }
 0x598   :  { %10130 = vst [vmem:[#allocation14_spill] sm:$0xff] %v8714_v38  ;;  %4187 = vmatprep.subr.mxu0 %v3782_v20  ;;  %v3627_v43 = vadd.f32 %v3619_v55, %v3611_v46  ;;  %v3635_v28 = vmul.f32 %v3550_v39, %v10134_v25  ;;  %v3476_v44 = vadd.f32 %v3475_v47, %v10135_v59  ;;  %v3769_v20 = vld [vmem:[%s9719_s13 + $0xe0] sm:$0xff]  ;;  %v3752_v47 = vld [vmem:[%s9719_s13 + $0x58] sm:$0xff] }
 0x599   :  { %v3555_v50 = vadd.f32 %v8493_v30, %v3474_v58  ;;  %4188 = vmatpush1.msra.mxu0 %v3781_v48  ;;  %v3612_v0 = vadd.f32 %v3604_v63, %v3596_v60  ;;  %v10137_v6 = vld [vmem:[#allocation10_spill] sm:$0xff]  ;;  %v3764_v60 = vld [vmem:[%s9719_s13 + $0xb8] sm:$0xff]  ;;  %v3763_v48 = vld [vmem:[%s9719_s13 + $0xb0] sm:$0xff] }
 0x59a   :  { %4038 = vmatmul.mubr.f32.gmra.mxu0 %v8714_v38  ;;  %4189 = vmatprep.subr.mxu0 %v3776_v9  ;;  %v8737_v46 = vadd.f32 %v3635_v28, %v3627_v43  ;;  %v3556_v30 = vadd.f32 %v8496_v61, %v3476_v44  ;;  %v3758_v61 = vld [vmem:[%s9719_s13 + $0x88] sm:$0xff]  ;;  %v3757_v9 = vld [vmem:[%s9719_s13 + $0x80] sm:$0xff]  ;;  %v3828_v44 = vld [vmem:[%s9719_s13 + $0x2b8] sm:$0xff] }
 0x59b   :  { %v3620_v55 = vmul.f32 %v3555_v50, %v10137_v6  ;;  %4190 = vmatpush1.msra.mxu0 %v3775_v34  ;;  %4043 = vmatprep.mubr.f32.mxu0 %v10099_v54  ;;  %v3751_v34 = vld [vmem:[%s9719_s13 + $0x50] sm:$0xff]  ;;  %v3746_v43 = vld [vmem:[%s9719_s13 + $0x28] sm:$0xff]  ;;  %v3745_v28 = vld [vmem:[%s9719_s13 + $0x20] sm:$0xff] }
 0x59c   :  { %10136 = vst [vmem:[#allocation68_spill] sm:$0xff] %v8737_v46  ;;  %4191 = vmatprep.subr.mxu0 %v3770_v37  ;;  %v3636_v58 = vmul.f32 %v3556_v30, %v10138_v21  ;;  %v3834_v50 = vld [vmem:[%s9719_s13 + $0x2e8] sm:$0xff]  ;;  %v3833_v59 = vld [vmem:[%s9719_s13 + $0x2e0] sm:$0xff]  ;;  %v3816_v30 = vld [vmem:[%s9719_s13 + $0x258] sm:$0xff] }
 0x59d   :  { %v3628_v39 = vadd.f32 %v3620_v55, %v3612_v0  ;;  %4192 = vmatpush1.msra.mxu0 %v3769_v20  ;;  %v5532_v37 = vld [vmem:[%s9812_s25 + $0x8] sm:$0xff]  ;;  %v3827_v0 = vld [vmem:[%s9719_s13 + $0x2b0] sm:$0xff]  ;;  %v3821_v55 = vld [vmem:[%s9719_s13 + $0x280] sm:$0xff] }
 0x59e   :  { %4044 = vmatmul.mubr.f32.gmra.mxu0 %v8737_v46  ;;  %4193 = vmatprep.subr.mxu0 %v3764_v60  ;;  %v3822_v20 = vld [vmem:[%s9719_s13 + $0x288] sm:$0xff]  ;;  %v5533_v60 = vld [vmem:[%s9812_s25 + $0x10] sm:$0xff] }
 0x59f   :  { %v8756_v63 = vadd.f32 %v3636_v58, %v3628_v39  ;;  %4194 = vmatpush1.msra.mxu0 %v3763_v48  ;;  %4049 = vmatprep.mubr.f32.mxu0 %v10099_v54  ;;  %v3815_v48 = vld [vmem:[%s9719_s13 + $0x250] sm:$0xff]  ;;  %v5534_v39 = vld [vmem:[%s9812_s25 + $0x18] sm:$0xff]  ;;  %v3810_v58 = vld [vmem:[%s9719_s13 + $0x228] sm:$0xff] }
 0x5a0   :  { %4195 = vmatprep.subr.mxu0 %v3758_v61  ;;  %v3809_v61 = vld [vmem:[%s9719_s13 + $0x220] sm:$0xff] }
 0x5a1   :  { %10139 = vst [vmem:[#allocation33_spill] sm:$0xff] %v8756_v63  ;;  %4196 = vmatpush1.msra.mxu0 %v3757_v9  ;;  %5358 = vmatprep.subr.mxu1 %v8756_v63  ;;  %v3804_v9 = vld [vmem:[%s9719_s13 + $0x1f8] sm:$0xff] }
 0x5a2   :  { %4050 = vmatmul.mubr.f32.gmra.mxu0 %v8756_v63  ;;  %4197 = vmatprep.subr.mxu0 %v3752_v47  ;;  %v5535_v47 = vld [vmem:[%s9812_s25 + $0x20] sm:$0xff] }
 0x5a3   :  { %5359 = vmatpush3.msra.mxu1 %v8756_v63  ;;  %4198 = vmatpush1.msra.mxu0 %v3751_v34  ;;  %v3803_v34 = vld [vmem:[%s9719_s13 + $0x1f0] sm:$0xff] }
 0x5a4   :  { %5360 = vmatprep.subr.mxu1 %v8737_v46  ;;  %4199 = vmatprep.subr.mxu0 %v3746_v43  ;;  %v5536_v43 = vld [vmem:[%s9812_s25 + $0x28] sm:$0xff] }
 0x5a5   :  { %5361 = vmatpush3.msra.mxu1 %v8737_v46  ;;  %4200 = vmatpush1.msra.mxu0 %v3745_v28  ;;  %v3798_v28 = vld [vmem:[%s9719_s13 + $0x1c8] sm:$0xff] }
 0x5a6   :  { %4233 = vmatprep.mubr.f32.mxu0 %v10099_v54  ;;  %5362 = vmatprep.subr.mxu1 %v8714_v38 }
 0x5a7   :  { %4234 = vmatmul.mubr.f32.vlgmr.msra.gmra.mxu0 %v8575_v2  ;;  %5363 = vmatpush3.msra.mxu1 %v8714_v38 }
 0x5a8   :  { %5364 = vmatprep.subr.mxu1 %v8688_v45  ;;  %4239 = vmatprep.mubr.f32.mxu0 %v10099_v54 }
 0x5a9   :  { %5365 = vmatpush3.msra.mxu1 %v8688_v45 }
 0x5aa   :  { %5366 = vmatprep.subr.mxu1 %v8661_v51 }
 0x5ab   :  { %4240 = vmatmul.mubr.f32.gmra.mxu0 %v8615_v56  ;;  %5367 = vmatpush3.msra.mxu1 %v8661_v51 }
 0x5ac   :  { %5368 = vmatprep.subr.mxu1 %v8633_v22  ;;  %4245 = vmatprep.mubr.f32.mxu0 %v10099_v54 }
 0x5ad   :  { %5369 = vmatpush3.msra.mxu1 %v8633_v22 }
 0x5ae   :  { %5370 = vmatprep.subr.mxu1 %v8615_v56 }
 0x5af   :  { %4246 = vmatmul.mubr.f32.gmra.mxu0 %v8633_v22  ;;  %5371 = vmatpush3.msra.mxu1 %v8615_v56 }
 0x5b0   :  { %5372 = vmatprep.subr.mxu1 %v8575_v2  ;;  %4251 = vmatprep.mubr.f32.mxu0 %v10099_v54 }
 0x5b1   :  { %5373 = vmatpush3.msra.mxu1 %v8575_v2 }
 0x5b2   :  { %5375 = vmatmul.mubr.msk.f32.vlgmr.msra.gmra.mxu1 %vm135_vm0, %v5532_v37  ;;  %4056 = vmatprep.subr.mxu1 %v3834_v50  ;;  %v3797_v50 = vld [vmem:[%s9719_s13 + $0x1c0] sm:$0xff]  ;;  %v3791_v37 = vld [vmem:[%s9719_s13 + $0x190] sm:$0xff] }
 0x5b3   :  { %4252 = vmatmul.mubr.f32.gmra.mxu0 %v8661_v51  ;;  %4057 = vmatpush1.msra.mxu1 %v3833_v59  ;;  %v3792_v59 = vld [vmem:[%s9719_s13 + $0x198] sm:$0xff] }
 0x5b4   :  { %4058 = vmatprep.subr.mxu1 %v3828_v44  ;;  %4257 = vmatprep.mubr.f32.mxu0 %v10099_v54  ;;  %v5537_v44 = vld [vmem:[%s9812_s25 + $0x30] sm:$0xff] }
 0x5b5   :  { %4059 = vmatpush1.msra.mxu1 %v3827_v0  ;;  %5377 = vmatprep.mubr.msk.f32.mxu1 %vm135_vm0, %v5533_v60  ;;  %v5538_v0 = vld [vmem:[%s9812_s25 + $0x38] sm:$0xff]  ;;  %v3779_v60 = vld [vmem:[%s9719_s13 + $0x130] sm:$0xff] }
 0x5b6   :  { %4060 = vmatprep.subr.mxu1 %v3822_v20  ;;  %5378 = vmatmul.mubr.msk.f32.gmra.mxu1 %vm135_vm0, %v5534_v39  ;;  %v3786_v20 = vld [vmem:[%s9719_s13 + $0x168] sm:$0xff]  ;;  %v3773_v39 = vld [vmem:[%s9719_s13 + $0x100] sm:$0xff] }
 0x5b7   :  { %4258 = vmatmul.mubr.f32.gmra.mxu0 %v8688_v45  ;;  %4061 = vmatpush1.msra.mxu1 %v3821_v55  ;;  %v3785_v55 = vld [vmem:[%s9719_s13 + $0x160] sm:$0xff] }
 0x5b8   :  { %4062 = vmatprep.subr.mxu1 %v3816_v30  ;;  %4263 = vmatprep.mubr.f32.mxu0 %v10099_v54  ;;  %v3780_v30 = vld [vmem:[%s9719_s13 + $0x138] sm:$0xff] }
 0x5b9   :  { %4063 = vmatpush1.msra.mxu1 %v3815_v48  ;;  %5380 = vmatprep.mubr.msk.f32.mxu1 %vm135_vm0, %v5535_v47  ;;  %v3774_v48 = vld [vmem:[%s9719_s13 + $0x108] sm:$0xff]  ;;  %v3761_v47 = vld [vmem:[%s9719_s13 + $0xa0] sm:$0xff] }
 0x5ba   :  { %4064 = vmatprep.subr.mxu1 %v3810_v58  ;;  %5381 = vmatmul.mubr.msk.f32.gmra.mxu1 %vm135_vm0, %v5536_v43  ;;  %v3768_v58 = vld [vmem:[%s9719_s13 + $0xd8] sm:$0xff]  ;;  %v3755_v43 = vld [vmem:[%s9719_s13 + $0x70] sm:$0xff] }
 0x5bb   :  { %4264 = vmatmul.mubr.f32.gmra.mxu0 %v8714_v38  ;;  %4065 = vmatpush1.msra.mxu1 %v3809_v61  ;;  %v3767_v61 = vld [vmem:[%s9719_s13 + $0xd0] sm:$0xff] }
 0x5bc   :  { %4066 = vmatprep.subr.mxu1 %v3804_v9  ;;  %4269 = vmatprep.mubr.f32.mxu0 %v10099_v54  ;;  %v3762_v9 = vld [vmem:[%s9719_s13 + $0xa8] sm:$0xff] }
 0x5bd   :  { %4067 = vmatpush1.msra.mxu1 %v3803_v34  ;;  %5383 = vmatprep.mubr.msk.f32.mxu1 %vm135_vm0, %v5537_v44  ;;  %v3756_v34 = vld [vmem:[%s9719_s13 + $0x78] sm:$0xff]  ;;  %v3743_v44 = vld [vmem:[%s9719_s13 + $0x10] sm:$0xff] }
 0x5be   :  { %4068 = vmatprep.subr.mxu1 %v3798_v28  ;;  %5384 = vmatmul.mubr.msk.f32.gmra.mxu1 %vm135_vm0, %v5538_v0  ;;  %v3750_v28 = vld [vmem:[%s9719_s13 + $0x48] sm:$0xff] }
 0x5bf   :  { %4270 = vmatmul.mubr.f32.gmra.mxu0 %v8737_v46  ;;  %4069 = vmatpush1.msra.mxu1 %v3797_v50  ;;  %v3749_v50 = vld [vmem:[%s9719_s13 + $0x40] sm:$0xff]  ;;  %v3738_v0 = vld [vmem:[%s9721_s12 + $0x2e8] sm:$0xff] }
 0x5c0   :  { %4070 = vmatprep.subr.mxu1 %v3792_v59  ;;  %4275 = vmatprep.mubr.f32.mxu0 %v10099_v54  ;;  %v3744_v59 = vld [vmem:[%s9719_s13 + $0x18] sm:$0xff] }
 0x5c1   :  { %4071 = vmatpush1.msra.mxu1 %v3791_v37  ;;  %4120 = vmatprep.mubr.f32.mxu1 %v10099_v54  ;;  %v3736_v37 = vld [vmem:[%s9721_s12 + $0x2d8] sm:$0xff] }
 0x5c2   :  { %4072 = vmatprep.subr.mxu1 %v3786_v20  ;;  %v3735_v20 = vld [vmem:[%s9721_s12 + $0x2d0] sm:$0xff]  ;;  %4395 = vmatprep.subr.mxu0 %v3738_v0 }
 0x5c3   :  { %4276 = vmatmul.mubr.f32.gmra.mxu0 %v8756_v63  ;;  %4073 = vmatpush1.msra.mxu1 %v3785_v55  ;;  %v3737_v55 = vld [vmem:[%s9721_s12 + $0x2e0] sm:$0xff]  ;;  %v3711_v0 = vld [vmem:[%s9721_s12 + $0x210] sm:$0xff] }
 0x5c4   :  { %4074 = vmatprep.subr.mxu1 %v3780_v30  ;;  %4459 = vmatprep.mubr.f32.mxu0 %v10099_v54  ;;  %v3730_v30 = vld [vmem:[%s9721_s12 + $0x2a8] sm:$0xff] }
 0x5c5   :  { %4075 = vmatpush1.msra.mxu1 %v3779_v60  ;;  %v3732_v60 = vld [vmem:[%s9721_s12 + $0x2b8] sm:$0xff]  ;;  %4396 = vmatpush1.msra.mxu0 %v3737_v55 }
 0x5c6   :  { %4076 = vmatprep.subr.mxu1 %v3774_v48  ;;  %v3729_v48 = vld [vmem:[%s9721_s12 + $0x2a0] sm:$0xff]  ;;  %4397 = vmatprep.subr.mxu0 %v3732_v60  ;;  %v3708_v55 = vld [vmem:[%s9721_s12 + $0x1f8] sm:$0xff]  ;;  %v3707_v60 = vld [vmem:[%s9721_s12 + $0x1f0] sm:$0xff] }
 0x5c7   :  { %4077 = vmatpush1.msra.mxu1 %v3773_v39  ;;  %v3731_v39 = vld [vmem:[%s9721_s12 + $0x2b0] sm:$0xff] }
 0x5c8   :  { %4078 = vmatprep.subr.mxu1 %v3768_v58  ;;  %v3724_v58 = vld [vmem:[%s9721_s12 + $0x278] sm:$0xff]  ;;  %4398 = vmatpush1.msra.mxu0 %v3731_v39  ;;  %v3702_v39 = vld [vmem:[%s9721_s12 + $0x1c8] sm:$0xff] }
 0x5c9   :  { %4079 = vmatpush1.msra.mxu1 %v3767_v61  ;;  %v3726_v61 = vld [vmem:[%s9721_s12 + $0x288] sm:$0xff] }
 0x5ca   :  { %4080 = vmatprep.subr.mxu1 %v3762_v9  ;;  %v3723_v9 = vld [vmem:[%s9721_s12 + $0x270] sm:$0xff]  ;;  %4399 = vmatprep.subr.mxu0 %v3726_v61  ;;  %v3701_v61 = vld [vmem:[%s9721_s12 + $0x1c0] sm:$0xff] }
 0x5cb   :  { %4081 = vmatpush1.msra.mxu1 %v3761_v47  ;;  %v3725_v47 = vld [vmem:[%s9721_s12 + $0x280] sm:$0xff] }
 0x5cc   :  { %4082 = vmatprep.subr.mxu1 %v3756_v34  ;;  %v3718_v34 = vld [vmem:[%s9721_s12 + $0x248] sm:$0xff]  ;;  %4400 = vmatpush1.msra.mxu0 %v3725_v47  ;;  %v3696_v47 = vld [vmem:[%s9721_s12 + $0x198] sm:$0xff] }
 0x5cd   :  { %4083 = vmatpush1.msra.mxu1 %v3755_v43  ;;  %v3720_v43 = vld [vmem:[%s9721_s12 + $0x258] sm:$0xff] }
 0x5ce   :  { %4084 = vmatprep.subr.mxu1 %v3750_v28  ;;  %v3717_v28 = vld [vmem:[%s9721_s12 + $0x240] sm:$0xff]  ;;  %4401 = vmatprep.subr.mxu0 %v3720_v43 }
 0x5cf   :  { %4085 = vmatpush1.msra.mxu1 %v3749_v50  ;;  %v3719_v50 = vld [vmem:[%s9721_s12 + $0x250] sm:$0xff]  ;;  %v3693_v43 = vld [vmem:[%s9721_s12 + $0x180] sm:$0xff] }
 0x5d0   :  { %4086 = vmatprep.subr.mxu1 %v3744_v59  ;;  %v3712_v59 = vld [vmem:[%s9721_s12 + $0x218] sm:$0xff]  ;;  %4402 = vmatpush1.msra.mxu0 %v3719_v50  ;;  %v3690_v50 = vld [vmem:[%s9721_s12 + $0x168] sm:$0xff] }
 0x5d1   :  { %4087 = vmatpush1.msra.mxu1 %v3743_v44  ;;  %v3714_v44 = vld [vmem:[%s9721_s12 + $0x228] sm:$0xff] }
 0x5d2   :  { %4121 = vmatmul.mubr.f32.vlgmr.msra.gmra.mxu1 %v8575_v2  ;;  %4282 = vmatprep.subr.mxu1 %v3736_v37  ;;  %v3713_v37 = vld [vmem:[%s9721_s12 + $0x220] sm:$0xff] }
 0x5d3   :  { %4126 = vmatprep.mubr.f32.mxu1 %v10099_v54  ;;  %4283 = vmatpush1.msra.mxu1 %v3735_v20  ;;  %v3706_v20 = vld [vmem:[%s9721_s12 + $0x1e8] sm:$0xff] }
 0x5d4   :  { %4284 = vmatprep.subr.mxu1 %v3730_v30  ;;  %4403 = vmatprep.subr.mxu0 %v3714_v44  ;;  %v3705_v30 = vld [vmem:[%s9721_s12 + $0x1e0] sm:$0xff] }
 0x5d5   :  { %4285 = vmatpush1.msra.mxu1 %v3729_v48  ;;  %4404 = vmatpush1.msra.mxu0 %v3713_v37  ;;  %v3700_v48 = vld [vmem:[%s9721_s12 + $0x1b8] sm:$0xff]  ;;  %v3689_v44 = vld [vmem:[%s9721_s12 + $0x160] sm:$0xff]  ;;  %v3682_v37 = vld [vmem:[%s9721_s12 + $0x128] sm:$0xff] }
 0x5d6   :  { %4127 = vmatmul.mubr.f32.gmra.mxu1 %v8615_v56  ;;  %4286 = vmatprep.subr.mxu1 %v3724_v58  ;;  %v3699_v58 = vld [vmem:[%s9721_s12 + $0x1b0] sm:$0xff] }
 0x5d7   :  { %4132 = vmatprep.mubr.f32.mxu1 %v10099_v54  ;;  %4287 = vmatpush1.msra.mxu1 %v3723_v9  ;;  %v3694_v9 = vld [vmem:[%s9721_s12 + $0x188] sm:$0xff] }
 0x5d8   :  { %4288 = vmatprep.subr.mxu1 %v3718_v34  ;;  %4405 = vmatprep.subr.mxu0 %v3708_v55  ;;  %v3695_v34 = vld [vmem:[%s9721_s12 + $0x190] sm:$0xff] }
 0x5d9   :  { %4289 = vmatpush1.msra.mxu1 %v3717_v28  ;;  %4406 = vmatpush1.msra.mxu0 %v3707_v60  ;;  %v3688_v28 = vld [vmem:[%s9721_s12 + $0x158] sm:$0xff]  ;;  %v3683_v55 = vld [vmem:[%s9721_s12 + $0x130] sm:$0xff]  ;;  %v3678_v60 = vld [vmem:[%s9721_s12 + $0x108] sm:$0xff] }
 0x5da   :  { %4133 = vmatmul.mubr.f32.gmra.mxu1 %v8633_v22  ;;  %4290 = vmatprep.subr.mxu1 %v3712_v59  ;;  %v3687_v59 = vld [vmem:[%s9721_s12 + $0x150] sm:$0xff] }
 0x5db   :  { %4138 = vmatprep.mubr.f32.mxu1 %v10099_v54  ;;  %4291 = vmatpush1.msra.mxu1 %v3711_v0  ;;  %v3684_v0 = vld [vmem:[%s9721_s12 + $0x138] sm:$0xff] }
 0x5dc   :  { %4292 = vmatprep.subr.mxu1 %v3706_v20  ;;  %4407 = vmatprep.subr.mxu0 %v3702_v39  ;;  %v3681_v20 = vld [vmem:[%s9721_s12 + $0x120] sm:$0xff] }
 0x5dd   :  { %4293 = vmatpush1.msra.mxu1 %v3705_v30  ;;  %4408 = vmatpush1.msra.mxu0 %v3701_v61  ;;  %v3676_v30 = vld [vmem:[%s9721_s12 + $0xf8] sm:$0xff]  ;;  %v3677_v39 = vld [vmem:[%s9721_s12 + $0x100] sm:$0xff] }
 0x5de   :  { %4139 = vmatmul.mubr.f32.gmra.mxu1 %v8661_v51  ;;  %4294 = vmatprep.subr.mxu1 %v3700_v48  ;;  %v3675_v48 = vld [vmem:[%s9721_s12 + $0xf0] sm:$0xff]  ;;  %v3672_v61 = vld [vmem:[%s9721_s12 + $0xd8] sm:$0xff] }
 0x5df   :  { %4144 = vmatprep.mubr.f32.mxu1 %v10099_v54  ;;  %4295 = vmatpush1.msra.mxu1 %v3699_v58  ;;  %v3670_v58 = vld [vmem:[%s9721_s12 + $0xc8] sm:$0xff] }
 0x5e0   :  { %4296 = vmatprep.subr.mxu1 %v3694_v9  ;;  %4409 = vmatprep.subr.mxu0 %v3696_v47  ;;  %v3669_v9 = vld [vmem:[%s9721_s12 + $0xc0] sm:$0xff]  ;;  %v3671_v47 = vld [vmem:[%s9721_s12 + $0xd0] sm:$0xff] }
 0x5e1   :  { %4410 = vmatpush1.msra.mxu0 %v3695_v34  ;;  %4297 = vmatpush1.msra.mxu1 %v3693_v43  ;;  %v3664_v34 = vld [vmem:[%s9721_s12 + $0x98] sm:$0xff]  ;;  %v3666_v43 = vld [vmem:[%s9721_s12 + $0xa8] sm:$0xff] }
 0x5e2   :  { %4145 = vmatmul.mubr.f32.gmra.mxu1 %v8688_v45  ;;  %4298 = vmatprep.subr.mxu1 %v3688_v28  ;;  %v3663_v28 = vld [vmem:[%s9721_s12 + $0x90] sm:$0xff] }
 0x5e3   :  { %4150 = vmatprep.mubr.f32.mxu1 %v10099_v54  ;;  %4411 = vmatprep.subr.mxu0 %v3690_v50  ;;  %v3665_v50 = vld [vmem:[%s9721_s12 + $0xa0] sm:$0xff] }
 0x5e4   :  { %4299 = vmatpush1.msra.mxu1 %v3687_v59  ;;  %4412 = vmatpush1.msra.mxu0 %v3689_v44  ;;  %v3658_v59 = vld [vmem:[%s9721_s12 + $0x68] sm:$0xff]  ;;  %v3660_v44 = vld [vmem:[%s9721_s12 + $0x78] sm:$0xff] }
 0x5e5   :  { %4300 = vmatprep.subr.mxu1 %v3682_v37  ;;  %4413 = vmatprep.subr.mxu0 %v3684_v0  ;;  %v3657_v37 = vld [vmem:[%s9721_s12 + $0x60] sm:$0xff]  ;;  %v3659_v0 = vld [vmem:[%s9721_s12 + $0x70] sm:$0xff] }
 0x5e6   :  { %4151 = vmatmul.mubr.f32.gmra.mxu1 %v8714_v38  ;;  %4414 = vmatpush1.msra.mxu0 %v3683_v55  ;;  %v3654_v55 = vld [vmem:[%s9721_s12 + $0x48] sm:$0xff]  ;;  %v4954_v38 = vld [vmem:[%s9723_s17 + $0x70] sm:$0xff] }
 0x5e7   :  { %4156 = vmatprep.mubr.f32.mxu1 %v10099_v54  ;;  %4301 = vmatpush1.msra.mxu1 %v3681_v20  ;;  %v3652_v20 = vld [vmem:[%s9721_s12 + $0x38] sm:$0xff] }
 0x5e8   :  { %4302 = vmatprep.subr.mxu1 %v3676_v30  ;;  %4415 = vmatprep.subr.mxu0 %v3678_v60  ;;  %v3651_v30 = vld [vmem:[%s9721_s12 + $0x30] sm:$0xff]  ;;  %v3653_v60 = vld [vmem:[%s9721_s12 + $0x40] sm:$0xff] }
 0x5e9   :  { %4303 = vmatpush1.msra.mxu1 %v3675_v48  ;;  %4416 = vmatpush1.msra.mxu0 %v3677_v39  ;;  %v3646_v48 = vld [vmem:[%s9721_s12 + $0x8] sm:$0xff]  ;;  %v3648_v39 = vld [vmem:[%s9721_s12 + $0x18] sm:$0xff] }
 0x5ea   :  { %4157 = vmatmul.mubr.f32.gmra.mxu1 %v8737_v46  ;;  %4304 = vmatprep.subr.mxu1 %v3670_v58  ;;  %v3645_v58 = vld [vmem:[%s9721_s12] sm:$0xff] }
 0x5eb   :  { %4162 = vmatprep.mubr.f32.mxu1 %v10099_v54  ;;  %4417 = vmatprep.subr.mxu0 %v3672_v61  ;;  %v3647_v61 = vld [vmem:[%s9721_s12 + $0x10] sm:$0xff] }
 0x5ec   :  { %4305 = vmatpush1.msra.mxu1 %v3669_v9  ;;  %4418 = vmatpush1.msra.mxu0 %v3671_v47  ;;  %v3740_v9 = vld [vmem:[%s9721_s12 + $0x2f8] sm:$0xff] }
 0x5ed   :  { %4306 = vmatprep.subr.mxu1 %v3664_v34  ;;  %4419 = vmatprep.subr.mxu0 %v3666_v43  ;;  %v3739_v34 = vld [vmem:[%s9721_s12 + $0x2f0] sm:$0xff] }
 0x5ee   :  { %4163 = vmatmul.mubr.f32.gmra.mxu1 %v8756_v63  ;;  %4420 = vmatpush1.msra.mxu0 %v3665_v50  ;;  %v3733_v50 = vld [vmem:[%s9721_s12 + $0x2c0] sm:$0xff] }
 0x5ef   :  { %4307 = vmatpush1.msra.mxu1 %v3663_v28  ;;  %4421 = vmatprep.subr.mxu0 %v3660_v44  ;;  %v3734_v28 = vld [vmem:[%s9721_s12 + $0x2c8] sm:$0xff] }
 0x5f0   :  { %4308 = vmatprep.subr.mxu1 %v3658_v59  ;;  %4422 = vmatpush1.msra.mxu0 %v3659_v0  ;;  %v3728_v59 = vld [vmem:[%s9721_s12 + $0x298] sm:$0xff]  ;;  %v3722_v0 = vld [vmem:[%s9721_s12 + $0x268] sm:$0xff] }
 0x5f1   :  { %4309 = vmatpush1.msra.mxu1 %v3657_v37  ;;  %4423 = vmatprep.subr.mxu0 %v3654_v55  ;;  %v3727_v37 = vld [vmem:[%s9721_s12 + $0x290] sm:$0xff]  ;;  %v3716_v55 = vld [vmem:[%s9721_s12 + $0x238] sm:$0xff] }
 0x5f2   :  { %4310 = vmatprep.subr.mxu1 %v3652_v20  ;;  %4424 = vmatpush1.msra.mxu0 %v3653_v60  ;;  %v3721_v20 = vld [vmem:[%s9721_s12 + $0x260] sm:$0xff]  ;;  %v3715_v60 = vld [vmem:[%s9721_s12 + $0x230] sm:$0xff] }
 0x5f3   :  { %4311 = vmatpush1.msra.mxu1 %v3651_v30  ;;  %4425 = vmatprep.subr.mxu0 %v3648_v39  ;;  %v3709_v39 = vld [vmem:[%s9721_s12 + $0x200] sm:$0xff] }
 0x5f4   :  { %4312 = vmatprep.subr.mxu1 %v3646_v48  ;;  %4346 = vmatprep.mubr.f32.mxu1 %v10099_v54  ;;  %v3710_v48 = vld [vmem:[%s9721_s12 + $0x208] sm:$0xff] }
 0x5f5   :  { %4313 = vmatpush1.msra.mxu1 %v3645_v58  ;;  %4426 = vmatpush1.msra.mxu0 %v3647_v61  ;;  %v3704_v58 = vld [vmem:[%s9721_s12 + $0x1d8] sm:$0xff] }
 0x5f6   :  { %4508 = vmatprep.subr.mxu1 %v3740_v9  ;;  %v3703_v9 = vld [vmem:[%s9721_s12 + $0x1d0] sm:$0xff] }
 0x672   :  { %v9141_v47 = vpop.f32.mrf.mxu1 }
 0x674   :  { %v9146_v43 = vpop.f32.mrf.mxu1 }
 0x675   :  { %4347 = vmatmul.mubr.f32.vlgmr.msra.gmra.mxu1 %v9146_v43  ;;  %4460 = vmatmul.mubr.f32.vlgmr.msra.gmra.mxu0 %v9146_v43 }
 0x676   :  { %4509 = vmatpush1.msra.mxu1 %v3739_v34  ;;  %4352 = vmatprep.mubr.f32.mxu1 %v10099_v54  ;;  %v9161_v44 = vpop.f32.mrf.mxu1  ;;  %v3698_v34 = vld [vmem:[%s9721_s12 + $0x1a8] sm:$0xff] }
 0x677   :  { %4510 = vmatprep.subr.mxu1 %v3734_v28  ;;  %4465 = vmatprep.mubr.f32.mxu0 %v10099_v54  ;;  %v3697_v28 = vld [vmem:[%s9721_s12 + $0x1a0] sm:$0xff] }
 0x678   :  { %4511 = vmatpush1.msra.mxu1 %v3733_v50  ;;  %v9179_v30 = vpop.f32.mrf.mxu1  ;;  %v3692_v50 = vld [vmem:[%s9721_s12 + $0x178] sm:$0xff] }
 0x679   :  { %4353 = vmatmul.mubr.f32.gmra.mxu1 %v9141_v47  ;;  %4466 = vmatmul.mubr.f32.gmra.mxu0 %v9141_v47 }
 0x67a   :  { %4512 = vmatprep.subr.mxu1 %v3728_v59  ;;  %4358 = vmatprep.mubr.f32.mxu1 %v10099_v54  ;;  %v9197_v61 = vpop.f32.mrf.mxu1 }
 0x67b   :  { %4513 = vmatpush1.msra.mxu1 %v3727_v37  ;;  %4471 = vmatprep.mubr.f32.mxu0 %v10099_v54  ;;  %v3691_v37 = vld [vmem:[%s9721_s12 + $0x170] sm:$0xff] }
 0x67c   :  { %4514 = vmatprep.subr.mxu1 %v3722_v0  ;;  %v3924_v59 = vpop.f32.mrf.mxu1  ;;  %v3686_v0 = vld [vmem:[%s9721_s12 + $0x148] sm:$0xff] }
 0x67d   :  { %4515 = vmatpush1.msra.mxu1 %v3721_v20  ;;  %4472 = vmatmul.mubr.f32.gmra.mxu0 %v9179_v30  ;;  %v3685_v20 = vld [vmem:[%s9721_s12 + $0x140] sm:$0xff] }
 0x67e   :  { %4359 = vmatmul.mubr.f32.gmra.mxu1 %v9179_v30  ;;  %4516 = vmatprep.subr.mxu1 %v3716_v55  ;;  %v3680_v55 = vld [vmem:[%s9721_s12 + $0x118] sm:$0xff] }
 0x67f   :  { %4517 = vmatpush1.msra.mxu1 %v3715_v60  ;;  %4364 = vmatprep.mubr.f32.mxu1 %v10099_v54  ;;  %v5385_v60 = vpop.f32.mrf.mxu1 }
 0x680   :  { %4518 = vmatprep.subr.mxu1 %v3710_v48  ;;  %4477 = vmatprep.mubr.f32.mxu0 %v10099_v54  ;;  %v3679_v48 = vld [vmem:[%s9721_s12 + $0x110] sm:$0xff] }
 0x681   :  { %4519 = vmatpush1.msra.mxu1 %v3709_v39  ;;  %4478 = vmatmul.mubr.f32.gmra.mxu0 %v9161_v44  ;;  %v3674_v39 = vld [vmem:[%s9721_s12 + $0xe8] sm:$0xff] }
 0x682   :  { %4365 = vmatmul.mubr.f32.gmra.mxu1 %v9161_v44  ;;  %4520 = vmatprep.subr.mxu1 %v3704_v58  ;;  %v3673_v58 = vld [vmem:[%s9721_s12 + $0xe0] sm:$0xff] }
 0x683   :  { %4521 = vmatpush1.msra.mxu1 %v3703_v9  ;;  %4370 = vmatprep.mubr.f32.mxu1 %v10099_v54  ;;  %v3668_v9 = vld [vmem:[%s9721_s12 + $0xb8] sm:$0xff] }
 0x684   :  { %4522 = vmatprep.subr.mxu1 %v3698_v34  ;;  %4483 = vmatprep.mubr.f32.mxu0 %v10099_v54  ;;  %v3934_v34 = vpop.f32.mrf.mxu1 }
 0x685   :  { %4523 = vmatpush1.msra.mxu1 %v3697_v28  ;;  %4484 = vmatmul.mubr.f32.gmra.mxu0 %v3924_v59  ;;  %v3667_v28 = vld [vmem:[%s9721_s12 + $0xb0] sm:$0xff] }
 0x686   :  { %4371 = vmatmul.mubr.f32.gmra.mxu1 %v3924_v59  ;;  %4524 = vmatprep.subr.mxu1 %v3692_v50  ;;  %v3662_v50 = vld [vmem:[%s9721_s12 + $0x88] sm:$0xff] }
 0x687   :  { %4525 = vmatpush1.msra.mxu1 %v3691_v37  ;;  %4376 = vmatprep.mubr.f32.mxu1 %v10099_v54  ;;  %v3661_v37 = vld [vmem:[%s9721_s12 + $0x80] sm:$0xff] }
 0x688   :  { %4526 = vmatprep.subr.mxu1 %v3686_v0  ;;  %4489 = vmatprep.mubr.f32.mxu0 %v10099_v54  ;;  %v3656_v0 = vld [vmem:[%s9721_s12 + $0x58] sm:$0xff] }
 0x689   :  { %4527 = vmatpush1.msra.mxu1 %v3685_v20  ;;  %4490 = vmatmul.mubr.f32.gmra.mxu0 %v9197_v61  ;;  %v3655_v20 = vld [vmem:[%s9721_s12 + $0x50] sm:$0xff] }
 0x68a   :  { %4377 = vmatmul.mubr.f32.gmra.mxu1 %v9197_v61  ;;  %4528 = vmatprep.subr.mxu1 %v3680_v55  ;;  %v3650_v55 = vld [vmem:[%s9721_s12 + $0x28] sm:$0xff] }
 0x68b   :  { %4529 = vmatpush1.msra.mxu1 %v3679_v48  ;;  %4382 = vmatprep.mubr.f32.mxu1 %v10099_v54  ;;  %v3649_v48 = vld [vmem:[%s9721_s12 + $0x20] sm:$0xff] }
 0x68c   :  { %4530 = vmatprep.subr.mxu1 %v3674_v39  ;;  %4495 = vmatprep.mubr.f32.mxu0 %v10099_v54 }
 0x68d   :  { %4531 = vmatpush1.msra.mxu1 %v3673_v58  ;;  %4496 = vmatmul.mubr.f32.gmra.mxu0 %v3934_v34 }
 0x68e   :  { %4383 = vmatmul.mubr.f32.gmra.mxu1 %v3934_v34  ;;  %4532 = vmatprep.subr.mxu1 %v3668_v9  ;;  %v4816_v9 = vld [vmem:[%s9722_s15 + $0x60] sm:$0xff] }
 0x68f   :  { %4533 = vmatpush1.msra.mxu1 %v3667_v28  ;;  %4388 = vmatprep.mubr.f32.mxu1 %v10099_v54 }
 0x690   :  { %4534 = vmatprep.subr.mxu1 %v3662_v50  ;;  %4501 = vmatprep.mubr.f32.mxu0 %v10099_v54  ;;  %v4814_v50 = vld [vmem:[%s9722_s15 + $0x50] sm:$0xff] }
 0x691   :  { %4535 = vmatpush1.msra.mxu1 %v3661_v37  ;;  %4502 = vmatmul.mubr.f32.gmra.mxu0 %v5385_v60  ;;  %v4813_v37 = vld [vmem:[%s9722_s15 + $0x48] sm:$0xff] }
 0x692   :  { %4389 = vmatmul.mubr.f32.gmra.mxu1 %v5385_v60  ;;  %4536 = vmatprep.subr.mxu1 %v3656_v0  ;;  %v9363_v63 = vpop.f32.mrf.mxu1 }
 0x693   :  { %4537 = vmatpush1.msra.mxu1 %v3655_v20  ;;  %4572 = vmatprep.mubr.f32.mxu1 %v10099_v54  ;;  %v4812_v20 = vld [vmem:[%s9722_s15 + $0x40] sm:$0xff] }
 0x694   :  { %4538 = vmatprep.subr.mxu1 %v3650_v55  ;;  %v4811_v55 = vld [vmem:[%s9722_s15 + $0x38] sm:$0xff]  ;;  %v9367_v21 = vpop.f32.mrf.mxu1 }
 0x695   :  { %4539 = vmatpush1.msra.mxu1 %v3649_v48 }
 0x696   :  { %4573 = vmatmul.mubr.f32.vlgmr.msra.gmra.mxu1 %v9146_v43  ;;  %v9371_v6 = vpop.f32.mrf.mxu1 }
 0x697   :  { %4578 = vmatprep.mubr.f32.mxu1 %v10099_v54 }
 0x698   :  { %v9381_v18 = vpop.f32.mrf.mxu1 }
 0x69a   :  { %4579 = vmatmul.mubr.f32.gmra.mxu1 %v9141_v47  ;;  %v9281_v47 = vpop.f32.mrf.mxu0  ;;  %v9391_v11 = vpop.f32.mrf.mxu1 }
 0x69b   :  { %4584 = vmatprep.mubr.f32.mxu1 %v10099_v54 }
 0x69c   :  { %v9283_v43 = vpop.f32.mrf.mxu0  ;;  %v9401_v1 = vpop.f32.mrf.mxu1 }
 0x69e   :  { %4585 = vmatmul.mubr.f32.gmra.mxu1 %v9179_v30  ;;  %v9285_v30 = vpop.f32.mrf.mxu0  ;;  %v9411_v51 = vpop.f32.mrf.mxu1 }
 0x69f   :  { %4590 = vmatprep.mubr.f32.mxu1 %v10099_v54 }
 0x6a0   :  { %v9421_v22 = vpop.f32.mrf.mxu1 }
 0x6a2   :  { %4591 = vmatmul.mubr.f32.gmra.mxu1 %v9161_v44  ;;  %v9287_v44 = vpop.f32.mrf.mxu0  ;;  %v9431_v13 = vpop.f32.mrf.mxu1 }
 0x6a3   :  { %4596 = vmatprep.mubr.f32.mxu1 %v10099_v54 }
 0x6a4   :  { %v9289_v39 = vpop.f32.mrf.mxu0 }
 0x6a6   :  { %4597 = vmatmul.mubr.f32.gmra.mxu1 %v3924_v59  ;;  %v9294_v59 = vpop.f32.mrf.mxu0 }
 0x6a7   :  { %4602 = vmatprep.mubr.f32.mxu1 %v10099_v54 }
 0x6a8   :  { %v9302_v58 = vpop.f32.mrf.mxu0 }
 0x6aa   :  { %4603 = vmatmul.mubr.f32.gmra.mxu1 %v9197_v61  ;;  %v4819_v61 = vld [vmem:[%s9722_s15 + $0x78] sm:$0xff]  ;;  %v9310_v28 = vpop.f32.mrf.mxu0 }
 0x6ab   :  { %4608 = vmatprep.mubr.f32.mxu1 %v10099_v54  ;;  %5386 = vmatprep.subr.mxu0 %v4819_v61 }
 0x6ac   :  { %5387 = vmatpush3.msra.mxu0 %v4819_v61  ;;  %v9318_v0 = vpop.f32.mrf.mxu0  ;;  %v4810_v61 = vld [vmem:[%s9722_s15 + $0x30] sm:$0xff] }
 0x6ae   :  { %4609 = vmatmul.mubr.f32.gmra.mxu1 %v3934_v34  ;;  %v4815_v34 = vld [vmem:[%s9722_s15 + $0x58] sm:$0xff]  ;;  %v9326_v48 = vpop.f32.mrf.mxu0 }
 0x6af   :  { %4614 = vmatprep.mubr.f32.mxu1 %v10099_v54  ;;  %v4818_v54 = vld [vmem:[%s9722_s15 + $0x70] sm:$0xff] }
 0x6b0   :  { %5388 = vmatprep.subr.mxu0 %v4818_v54 }
 0x6b1   :  { %5389 = vmatpush3.msra.mxu0 %v4818_v54  ;;  %v4809_v54 = vld [vmem:[%s9722_s15 + $0x28] sm:$0xff] }
 0x6b2   :  { %4615 = vmatmul.mubr.f32.gmra.mxu1 %v5385_v60  ;;  %v4817_v60 = vld [vmem:[%s9722_s15 + $0x68] sm:$0xff] }
 0x6b3   :  { %5390 = vmatprep.subr.mxu0 %v4817_v60 }
 0x6b4   :  { %5391 = vmatpush3.msra.mxu0 %v4817_v60  ;;  %v9334_v60 = vpop.f32.mrf.mxu0 }
 0x6b5   :  { %5392 = vmatprep.subr.mxu0 %v4816_v9  ;;  %10140 = vst [vmem:[#allocation42_spill] sm:$0xff] %v9334_v60 }
 0x6b6   :  { %5393 = vmatpush3.msra.mxu0 %v4816_v9  ;;  %v4808_v9 = vld [vmem:[%s9722_s15 + $0x20] sm:$0xff] }
 0x6b7   :  { %5394 = vmatprep.subr.mxu0 %v4815_v34 }
 0x6b8   :  { %5395 = vmatpush3.msra.mxu0 %v4815_v34  ;;  %v4807_v34 = vld [vmem:[%s9722_s15 + $0x18] sm:$0xff] }
 0x6b9   :  { %5396 = vmatprep.subr.mxu0 %v4814_v50 }
 0x6ba   :  { %5397 = vmatpush3.msra.mxu0 %v4814_v50  ;;  %v9342_v50 = vpop.f32.mrf.mxu0 }
 0x6bb   :  { %5398 = vmatprep.subr.mxu0 %v4813_v37  ;;  %10141 = vst [vmem:[#allocation22_spill] sm:$0xff] %v9342_v50 }
 0x6bc   :  { %5399 = vmatpush3.msra.mxu0 %v4813_v37  ;;  %v4806_v37 = vld [vmem:[%s9722_s15 + $0x10] sm:$0xff] }
 0x6bd   :  { %5400 = vmatprep.subr.mxu0 %v4812_v20 }
 0x6be   :  { %5401 = vmatpush3.msra.mxu0 %v4812_v20  ;;  %v4805_v20 = vld [vmem:[%s9722_s15 + $0x8] sm:$0xff] }
 0x6bf   :  { %5402 = vmatprep.subr.mxu0 %v4811_v55 }
 0x6c0   :  { %5403 = vmatpush3.msra.mxu0 %v4811_v55  ;;  %v9350_v55 = vpop.f32.mrf.mxu0 }
 0x6c1   :  { %5404 = vmatprep.subr.mxu0 %v4810_v61  ;;  %10142 = vst [vmem:[#allocation24_spill] sm:$0xff] %v9350_v55 }
 0x6c2   :  { %5405 = vmatpush3.msra.mxu0 %v4810_v61  ;;  %v4804_v61 = vld [vmem:[%s9722_s15] sm:$0xff] }
 0x6c3   :  { %5406 = vmatprep.subr.mxu0 %v4809_v54 }
 0x6c4   :  { %5407 = vmatpush3.msra.mxu0 %v4809_v54  ;;  %v9355_v54 = vpop.f32.mrf.mxu0 }
 0x6c5   :  { %5408 = vmatprep.subr.mxu0 %v4808_v9  ;;  %10143 = vst [vmem:[#allocation34_spill] sm:$0xff] %v9355_v54 }
 0x6c6   :  { %5409 = vmatpush3.msra.mxu0 %v4808_v9  ;;  %v9357_v9 = vpop.f32.mrf.mxu0 }
 0x6c7   :  { %5410 = vmatprep.subr.mxu0 %v4807_v34  ;;  %10144 = vst [vmem:[#allocation71_spill] sm:$0xff] %v9357_v9 }
 0x6c8   :  { %5411 = vmatpush3.msra.mxu0 %v4807_v34  ;;  %v9359_v34 = vpop.f32.mrf.mxu0 }
 0x6c9   :  { %5412 = vmatprep.subr.mxu0 %v4806_v37  ;;  %10145 = vst [vmem:[#allocation67_spill] sm:$0xff] %v9359_v34 }
 0x6ca   :  { %5413 = vmatpush3.msra.mxu0 %v4806_v37  ;;  %v9361_v37 = vpop.f32.mrf.mxu0 }
 0x6cb   :  { %5414 = vmatprep.subr.mxu0 %v4805_v20  ;;  %10146 = vst [vmem:[#allocation49_spill] sm:$0xff] %v9361_v37 }
 0x6cc   :  { %5415 = vmatpush3.msra.mxu0 %v4805_v20  ;;  %v9365_v46 = vpop.f32.mrf.mxu0 }
 0x6cd   :  { %5416 = vmatprep.subr.mxu0 %v4804_v61  ;;  %10147 = vst [vmem:[#allocation48_spill] sm:$0xff] %v9365_v46 }
 0x6ce   :  { %5417 = vmatpush3.msra.mxu0 %v4804_v61  ;;  %v9369_v20 = vpop.f32.mrf.mxu0  ;;  %v4955_v61 = vld [vmem:[%s9723_s17 + $0x78] sm:$0xff] }
 0x6cf   :  { %10148 = vst [vmem:[#allocation31_spill] sm:$0xff] %v9369_v20  ;;  %5430 = vmatprep.subr.mxu1 %v4955_v61 }
 0x6d0   :  { %v9379_v25 = vpop.f32.mrf.mxu0  ;;  %5431 = vmatpush3.msra.mxu1 %v4955_v61  ;;  %v4951_v61 = vld [vmem:[%s9723_s17 + $0x58] sm:$0xff] }
 0x6d1   :  { %10149 = vst [vmem:[#allocation35_spill] sm:$0xff] %v9379_v25  ;;  %5432 = vmatprep.subr.mxu1 %v4954_v38 }
 0x6d2   :  { %5433 = vmatpush3.msra.mxu1 %v4954_v38  ;;  %v9389_v45 = vpop.f32.mrf.mxu0  ;;  %v4950_v38 = vld [vmem:[%s9723_s17 + $0x50] sm:$0xff] }
 0x6d3   :  { %10150 = vst [vmem:[#allocation73_spill] sm:$0xff] %v9389_v45  ;;  %5434 = vmatprep.subr.mxu1 %v4953_v4 }
 0x6d4   :  { %5435 = vmatpush3.msra.mxu1 %v4953_v4  ;;  %v9399_v23 = vpop.f32.mrf.mxu0  ;;  %v4949_v4 = vld [vmem:[%s9723_s17 + $0x48] sm:$0xff] }
 0x6d5   :  { %5436 = vmatprep.subr.mxu1 %v4952_v5  ;;  %10151 = vst [vmem:[#allocation37_spill] sm:$0xff] %v9399_v23 }
 0x6d6   :  { %5437 = vmatpush3.msra.mxu1 %v4952_v5  ;;  %v4948_v5 = vld [vmem:[%s9723_s17 + $0x40] sm:$0xff]  ;;  %v9409_v10 = vpop.f32.mrf.mxu0 }
 0x6d7   :  { %5438 = vmatprep.subr.mxu1 %v4951_v61  ;;  %10152 = vst [vmem:[#allocation69_spill] sm:$0xff] %v9409_v10 }
 0x6d8   :  { %5439 = vmatpush3.msra.mxu1 %v4951_v61  ;;  %v4947_v61 = vld [vmem:[%s9723_s17 + $0x38] sm:$0xff]  ;;  %v9419_v15 = vpop.f32.mrf.mxu0 }
 0x6d9   :  { %5440 = vmatprep.subr.mxu1 %v4950_v38  ;;  %10153 = vst [vmem:[#allocation51_spill] sm:$0xff] %v9419_v15 }
 0x6da   :  { %5441 = vmatpush3.msra.mxu1 %v4950_v38  ;;  %v4946_v38 = vld [vmem:[%s9723_s17 + $0x30] sm:$0xff]  ;;  %v9429_v31 = vpop.f32.mrf.mxu0 }
 0x6db   :  { %5442 = vmatprep.subr.mxu1 %v4949_v4  ;;  %10154 = vst [vmem:[#allocation75_spill] sm:$0xff] %v9429_v31 }
 0x6dc   :  { %5443 = vmatpush3.msra.mxu1 %v4949_v4  ;;  %v4945_v4 = vld [vmem:[%s9723_s17 + $0x28] sm:$0xff]  ;;  %v9433_v36 = vpop.f32.mrf.mxu0 }
 0x6dd   :  { %5444 = vmatprep.subr.mxu1 %v4948_v5  ;;  %10155 = vst [vmem:[#allocation41_spill] sm:$0xff] %v9433_v36 }
 0x6de   :  { %5445 = vmatpush3.msra.mxu1 %v4948_v5  ;;  %v4944_v5 = vld [vmem:[%s9723_s17 + $0x20] sm:$0xff]  ;;  %v9437_v56 = vpop.f32.mrf.mxu0 }
 0x6df   :  { %5446 = vmatprep.subr.mxu1 %v4947_v61  ;;  %10156 = vst [vmem:[#allocation66_spill] sm:$0xff] %v9437_v56 }
 0x6e0   :  { %5447 = vmatpush3.msra.mxu1 %v4947_v61  ;;  %v9435_v61 = vpop.f32.mrf.mxu1 }
 0x6e1   :  { %5448 = vmatprep.subr.mxu1 %v4946_v38 }
 0x6e2   :  { %5449 = vmatpush3.msra.mxu1 %v4946_v38  ;;  %v9439_v16 = vpop.f32.mrf.mxu1  ;;  %v9441_v38 = vpop.f32.mrf.mxu0 }
 0x6e3   :  { %5450 = vmatprep.subr.mxu1 %v4945_v4  ;;  %10157 = vst [vmem:[#allocation70_spill] sm:$0xff] %v9441_v38 }
 0x6e4   :  { %5451 = vmatpush3.msra.mxu1 %v4945_v4  ;;  %v9443_v15 = vpop.f32.mrf.mxu1  ;;  %v9445_v26 = vpop.f32.mrf.mxu0 }
 0x6e5   :  { %5452 = vmatprep.subr.mxu1 %v4944_v5  ;;  %10158 = vst [vmem:[#allocation72_spill] sm:$0xff] %v9443_v15  ;;  %10159 = vst [vmem:[#allocation74_spill] sm:$0xff] %v9445_v26 }
 0x6e6   :  { %5453 = vmatpush3.msra.mxu1 %v4944_v5  ;;  %v9447_v31 = vpop.f32.mrf.mxu1  ;;  %v9449_v9 = vpop.f32.mrf.mxu0 }
 0x6e7   :  { %10160 = vst [vmem:[#allocation76_spill] sm:$0xff] %v9447_v31  ;;  %10161 = vst [vmem:[#allocation77_spill] sm:$0xff] %v9449_v9  ;;  %v10168_v31 = vld [vmem:[#allocation57_spill] sm:$0xff] }
 0x6e8   :  { %v9451_v4 = vpop.f32.mrf.mxu1  ;;  %v9453_v5 = vpop.f32.mrf.mxu0 }
 0x6e9   :  { %10162 = vst [vmem:[#allocation78_spill] sm:$0xff] %v9451_v4  ;;  %10163 = vst [vmem:[#allocation79_spill] sm:$0xff] %v9453_v5  ;;  %v3837_v5 = vld [vmem:[%s9724_s14] sm:$0x3f] }
 0x6ea   :  { %v9455_v36 = vpop.f32.mrf.mxu1  ;;  %v9457_v10 = vpop.f32.mrf.mxu0  ;;  %v9470_v46 = vrot.slane %v3837_v5, %v10168_v31 }
 0x6eb   :  { %10164 = vst [vmem:[#allocation80_spill] sm:$0xff] %v9455_v36  ;;  %10165 = vst [vmem:[#allocation81_spill] sm:$0xff] %v9457_v10  ;;  %v10167_v10 = vld [vmem:[#allocation55_spill] sm:$0xff] }
 0x6ec   :  { %v9459_v56 = vpop.f32.mrf.mxu1  ;;  %v9466_v17 = vrot.slane %v3837_v5, %v10167_v10 }
 0x6ed   :  { %10166 = vst [vmem:[#allocation82_spill] sm:$0xff] %v9459_v56 }
 0x735   :  { %v4348_v34 = vpop.f32.mrf.mxu1  ;;  %v4461_v38 = vpop.f32.mrf.mxu0 }
 0x736   :  { %v4349_v55 = vadd.f32 %v4348_v34, %v9281_v47  ;;  %v9479_v47 = vrot.slane %v3837_v5, %v6386_v53 }
 0x737   :  { %v4350_v2 = vpop.f32.mrf.mxu1  ;;  %v4463_v23 = vpop.f32.mrf.mxu0 }
 0x738   :  { %v4351_v36 = vadd.f32 %v4350_v2, %v9283_v43  ;;  %v4652_v10 = vadd.f32 %v9470_v46, %v4349_v55  ;;  %v4462_v43 = vadd.f32 %v4461_v38, %v9363_v63 }
 0x739   :  { %v4354_v45 = vpop.f32.mrf.mxu1  ;;  %v4467_v26 = vpop.f32.mrf.mxu0 }
 0x73a   :  { %v4653_v37 = vadd.f32 %v9466_v17, %v4351_v36  ;;  %v4355_v60 = vadd.f32 %v4354_v45, %v9285_v30  ;;  %v4468_v45 = vadd.f32 %v4467_v26, %v9371_v6  ;;  %v9487_v30 = vrot.slane %v3837_v5, %v6390_v40 }
 0x73b   :  { %v4356_v54 = vpop.f32.mrf.mxu1  ;;  %v4469_v25 = vpop.f32.mrf.mxu0 }
 0x73c   :  { %v4357_v29 = vadd.f32 %v4356_v54, %v9287_v44  ;;  %v4708_v35 = vmul.f32 %v4653_v37, %v6334_v57  ;;  %v4658_v63 = vadd.f32 %v9470_v46, %v4355_v60  ;;  %v4470_v57 = vadd.f32 %v4469_v25, %v9381_v18 }
 0x73d   :  { %v4473_v24 = vpop.f32.mrf.mxu0 }
 0x73e   :  { %v4360_v9 = vpop.f32.mrf.mxu1  ;;  %v4659_v34 = vadd.f32 %v9466_v17, %v4357_v29  ;;  %v4700_v29 = vmul.f32 %v4652_v10, %v6328_v52  ;;  %v4474_v6 = vadd.f32 %v4473_v24, %v9391_v11  ;;  %v4701_v18 = vmul.f32 %v4658_v63, %v6318_v14 }
 0x73f   :  { %v4475_v4 = vpop.f32.mrf.mxu0  ;;  %v4361_v44 = vadd.f32 %v4360_v9, %v9289_v39  ;;  %v4654_v39 = vadd.f32 %v9479_v47, %v4462_v43 }
 0x740   :  { %v4362_v56 = vpop.f32.mrf.mxu1  ;;  %v4709_v26 = vmul.f32 %v4659_v34, %v9965_v19  ;;  %v4716_v9 = vadd.f32 %v4708_v35, %v4700_v29  ;;  %v4666_v14 = vadd.f32 %v9479_v47, %v4474_v6  ;;  %v10171_v29 = vld [vmem:[#allocation42_spill] sm:$0xff] }
 0x741   :  { %v4479_v20 = vpop.f32.mrf.mxu0  ;;  %v4363_v2 = vadd.f32 %v4362_v56, %v9294_v59  ;;  %v4664_v40 = vadd.f32 %v9470_v46, %v4361_v44  ;;  %v4724_v11 = vmul.f32 %v4654_v39, %v6434_v7  ;;  %v10172_v39 = vld [vmem:[#allocation58_spill] sm:$0xff] }
 0x742   :  { %v4366_v50 = vpop.f32.mrf.mxu1  ;;  %v4480_v24 = vadd.f32 %v4479_v20, %v9411_v51 }
 0x743   :  { %v4481_v33 = vpop.f32.mrf.mxu0  ;;  %v4665_v53 = vadd.f32 %v9466_v17, %v4363_v2  ;;  %v4367_v59 = vadd.f32 %v4366_v50, %v9302_v58  ;;  %v4660_v58 = vadd.f32 %v9479_v47, %v4468_v45  ;;  %v9502_v50 = vrot.slane %v3837_v5, %v10067_v49 }
 0x744   :  { %v4368_v15 = vpop.f32.mrf.mxu1  ;;  %v4476_v49 = vadd.f32 %v4475_v4, %v9401_v1  ;;  %v4702_v38 = vmul.f32 %v4664_v40, %v6308_v8  ;;  %v4482_v7 = vadd.f32 %v4481_v33, %v9421_v22  ;;  %v4732_v1 = vadd.f32 %v4724_v11, %v4716_v9  ;;  %v10176_v11 = vld [vmem:[#allocation12_spill] sm:$0xff] }
 0x745   :  { %v4369_v54 = vadd.f32 %v4368_v15, %v9310_v28  ;;  %v4485_v36 = vpop.f32.mrf.mxu0  ;;  %v4464_v15 = vadd.f32 %v4463_v23, %v9367_v21  ;;  %v9505_v23 = vrot.slane %v3837_v5, %v9967_v27  ;;  %v4710_v19 = vmul.f32 %v4665_v53, %v6256_v32  ;;  %v10170_v53 = vld [vmem:[#allocation21_spill] sm:$0xff] }
 0x746   :  { %v4372_v31 = vpop.f32.mrf.mxu1  ;;  %v4670_v25 = vadd.f32 %v9470_v46, %v4367_v59  ;;  %v4661_v21 = vadd.f32 %v9487_v30, %v4470_v57  ;;  %v4717_v27 = vadd.f32 %v4709_v26, %v4701_v18  ;;  %v4725_v51 = vmul.f32 %v4660_v58, %v6344_v41  ;;  %v10173_v26 = vld [vmem:[#allocation72_spill] sm:$0xff]  ;;  %v10174_v18 = vld [vmem:[#allocation49_spill] sm:$0xff] }
 0x747   :  { %v4671_v60 = vadd.f32 %v9466_v17, %v4369_v54  ;;  %v4487_v55 = vpop.f32.mrf.mxu0  ;;  %v4655_v35 = vadd.f32 %v9487_v30, %v4464_v15  ;;  %v4486_v20 = vadd.f32 %v4485_v36, %v9431_v13  ;;  %v4718_v4 = vadd.f32 %v4710_v19, %v4702_v38 }
 0x748   :  { %v4374_v56 = vpop.f32.mrf.mxu1  ;;  %v4703_v43 = vmul.f32 %v4670_v25, %v6298_v62  ;;  %v4672_v8 = vadd.f32 %v9479_v47, %v4480_v24  ;;  %v4373_v41 = vadd.f32 %v4372_v31, %v9318_v0  ;;  %v4488_v33 = vadd.f32 %v4487_v55, %v9435_v61  ;;  %v10169_v62 = vld [vmem:[#allocation56_spill] sm:$0xff]  ;;  %v10175_v25 = vld [vmem:[#allocation54_spill] sm:$0xff] }
 0x749   :  { %v4711_v32 = vmul.f32 %v4671_v60, %v6227_v12  ;;  %v4491_v5 = vpop.f32.mrf.mxu0  ;;  %v4375_v2 = vadd.f32 %v4374_v56, %v9326_v48  ;;  %v4740_v34 = vmul.f32 %v4655_v35, %v6422_v42  ;;  %v4667_v12 = vadd.f32 %v9487_v30, %v4476_v49  ;;  %v10177_v35 = vld [vmem:[#allocation8_spill] sm:$0xff]  ;;  %v10178_v49 = vld [vmem:[#allocation22_spill] sm:$0xff] }
 0x74a   :  { %v4378_v28 = vpop.f32.mrf.mxu1  ;;  %v4733_v13 = vadd.f32 %v4725_v51, %v4717_v27  ;;  %v4726_v48 = vmul.f32 %v4666_v14, %v6304_v3  ;;  %v4492_v54 = vadd.f32 %v4491_v5, %v9439_v16  ;;  %v4741_v45 = vmul.f32 %v4661_v21, %v10169_v62  ;;  %v10179_v51 = vld [vmem:[#allocation48_spill] sm:$0xff] }
 0x74b   :  { %v4719_v44 = vadd.f32 %v4711_v32, %v4703_v43  ;;  %v4493_v36 = vpop.f32.mrf.mxu0  ;;  %v4673_v56 = vadd.f32 %v9487_v30, %v4482_v7  ;;  %v4678_v42 = vadd.f32 %v9479_v47, %v4486_v20  ;;  %v4677_v63 = vadd.f32 %v9466_v17, %v4375_v2  ;;  %v10180_v20 = vld [vmem:[#allocation7_spill] sm:$0xff]  ;;  %v10185_v62 = vld [vmem:[#allocation24_spill] sm:$0xff] }
 0x74c   :  { %v4380_v52 = vpop.f32.mrf.mxu1  ;;  %v4748_v61 = vadd.f32 %v4740_v34, %v4732_v1  ;;  %v4734_v31 = vadd.f32 %v4726_v48, %v4718_v4  ;;  %v4727_v59 = vmul.f32 %v4672_v8, %v10170_v53  ;;  %v4379_v3 = vadd.f32 %v4378_v28, %v10171_v29  ;;  %v10181_v1 = vld [vmem:[#allocation52_spill] sm:$0xff]  ;;  %v10187_v53 = vld [vmem:[#allocation30_spill] sm:$0xff] }
 0x74d   :  { %v4742_v15 = vmul.f32 %v4667_v12, %v10172_v39  ;;  %v4676_v16 = vadd.f32 %v9470_v46, %v4373_v41  ;;  %v4679_v57 = vadd.f32 %v9487_v30, %v4488_v33  ;;  %v4494_v40 = vadd.f32 %v4493_v36, %v10173_v26  ;;  %v4497_v58 = vpop.f32.mrf.mxu0  ;;  %v10182_v8 = vld [vmem:[#allocation76_spill] sm:$0xff] }
 0x74e   :  { %v9515_v37 = vpop.f32.mrf.mxu1  ;;  %v4749_v60 = vadd.f32 %v4741_v45, %v4733_v13  ;;  %v4735_v55 = vadd.f32 %v4727_v59, %v4719_v44  ;;  %v4684_v9 = vadd.f32 %v9479_v47, %v4492_v54  ;;  %v4743_v24 = vmul.f32 %v4673_v56, %v10175_v25  ;;  %v10184_v13 = vld [vmem:[#allocation65_spill] sm:$0xff] }
 0x74f   :  { %v4728_v28 = vmul.f32 %v4678_v42, %v10176_v11  ;;  %v4712_v21 = vmul.f32 %v4677_v63, %v10177_v35  ;;  %v4381_v27 = vadd.f32 %v4380_v52, %v10178_v49  ;;  %v4750_v14 = vadd.f32 %v4742_v15, %v4734_v31  ;;  %v10183_v52 = vld [vmem:[#allocation61_spill] sm:$0xff]  ;;  %v4499_v56 = vpop.f32.mrf.mxu0  ;;  %v10186_v42 = vld [vmem:[#allocation31_spill] sm:$0xff] }
 0x750   :  { %v9524_v10 = vpop.f32.mrf.mxu1  ;;  %v4682_v32 = vadd.f32 %v9470_v46, %v4379_v3  ;;  %v4704_v2 = vmul.f32 %v4676_v16, %v10180_v20  ;;  %v9559_v4 = vmul.f32 %v4679_v57, %v10181_v1  ;;  %v4685_v43 = vadd.f32 %v9487_v30, %v4494_v40  ;;  %v10188_v3 = vld [vmem:[#allocation11_spill] sm:$0xff]  ;;  %v10193_v25 = vld [vmem:[#allocation73_spill] sm:$0xff]  ;;  %v10198_v1 = vld [vmem:[#allocation60_spill] sm:$0xff] }
 0x751   :  { %v4498_v34 = vadd.f32 %v4497_v58, %v10182_v8  ;;  %v9563_v41 = vadd.f32 %v4743_v24, %v4735_v55  ;;  %v9566_v33 = vmul.f32 %v4684_v9, %v10183_v52  ;;  %v4683_v36 = vadd.f32 %v9466_v17, %v4381_v27  ;;  %v10189_v15 = vld [vmem:[#allocation35_spill] sm:$0xff]  ;;  %v10192_v58 = vld [vmem:[#allocation78_spill] sm:$0xff]  ;;  %v10194_v35 = vld [vmem:[#allocation5_spill] sm:$0xff] }
 0x752   :  { %v9532_v22 = vpop.f32.mrf.mxu1  ;;  %v4720_v54 = vadd.f32 %v4712_v21, %v4704_v2  ;;  %v4385_v45 = vadd.f32 %v9515_v37, %v10185_v62  ;;  %v4705_v59 = vmul.f32 %v4682_v32, %v10187_v53  ;;  %v10190_v57 = vld [vmem:[#allocation47_spill] sm:$0xff]  ;;  %v10197_v20 = vld [vmem:[#allocation37_spill] sm:$0xff]  ;;  %v10199_v8 = vld [vmem:[#allocation6_spill] sm:$0xff] }
 0x753   :  { %v9578_v26 = vmul.f32 %v4685_v43, %v10190_v57  ;;  %v4690_v40 = vadd.f32 %v9479_v47, %v4498_v34  ;;  %v4713_v21 = vmul.f32 %v4683_v36, %v10194_v35  ;;  %v10195_v27 = vld [vmem:[#allocation63_spill] sm:$0xff]  ;;  %v10202_v62 = vld [vmem:[#allocation69_spill] sm:$0xff] }
 0x754   :  { %v9540_v0 = vpop.f32.mrf.mxu1  ;;  %v4736_v11 = vadd.f32 %v4728_v28, %v4720_v54  ;;  %v4688_v49 = vadd.f32 %v9470_v46, %v4385_v45  ;;  %v10211_v35 = vld [vmem:[#allocation75_spill] sm:$0xff] }
 0x755   :  { %v4730_v34 = vmul.f32 %v4690_v40, %v10199_v8  ;;  %v10207_v40 = vld [vmem:[#allocation51_spill] sm:$0xff] }
 0x756   :  { %v4574_v6 = vpop.f32.mrf.mxu1 }
 0x757   :  { %v4575_v19 = vadd.f32 %v4574_v6, %v10174_v18  ;;  %v10191_v6 = vld [vmem:[#allocation34_spill] sm:$0xff]  ;;  %v4500_v18 = vadd.f32 %v4499_v56, %v10192_v58  ;;  %v10203_v56 = vld [vmem:[#allocation32_spill] sm:$0xff] }
 0x758   :  { %v4576_v38 = vpop.f32.mrf.mxu1  ;;  %v4387_v55 = vadd.f32 %v9524_v10, %v10191_v6  ;;  %v10196_v10 = vld [vmem:[#allocation40_spill] sm:$0xff] }
 0x759   :  { %v4656_v5 = vadd.f32 %v9502_v50, %v4575_v19  ;;  %v4577_v7 = vadd.f32 %v4576_v38, %v10179_v51 }
 0x75a   :  { %v4580_v12 = vpop.f32.mrf.mxu1  ;;  %v4689_v28 = vadd.f32 %v9466_v17, %v4387_v55  ;;  %v4721_v55 = vadd.f32 %v4713_v21, %v4705_v59  ;;  %v10213_v21 = vld [vmem:[#allocation62_spill] sm:$0xff] }
 0x75b   :  { %v4756_v48 = vmul.f32 %v4656_v5, %v10184_v13  ;;  %v4657_v44 = vadd.f32 %v9505_v23, %v4577_v7  ;;  %v4581_v63 = vadd.f32 %v4580_v12, %v10186_v42  ;;  %v4503_v5 = vpop.f32.mrf.mxu0  ;;  %v10200_v12 = vld [vmem:[#allocation67_spill] sm:$0xff] }
 0x75c   :  { %v4582_v31 = vpop.f32.mrf.mxu1  ;;  %v4393_v52 = vadd.f32 %v9540_v0, %v10200_v12 }
 0x75d   :  { %v4764_v29 = vadd.f32 %v4756_v48, %v4748_v61  ;;  %v4772_v39 = vmul.f32 %v4657_v44, %v10188_v3  ;;  %v4583_v16 = vadd.f32 %v4582_v31, %v10189_v15  ;;  %v4662_v37 = vadd.f32 %v9502_v50, %v4581_v63  ;;  %v10201_v44 = vld [vmem:[#allocation59_spill] sm:$0xff] }
 0x75e   :  { %v4586_v9 = vpop.f32.mrf.mxu1  ;;  %v4691_v63 = vadd.f32 %v9487_v30, %v4500_v18  ;;  %v10204_v31 = vld [vmem:[#allocation71_spill] sm:$0xff]  ;;  %v4695_v58 = vadd.f32 %v9466_v17, %v4393_v52  ;;  %v10209_v18 = vld [vmem:[#allocation29_spill] sm:$0xff]  ;;  %v4505_v17 = vpop.f32.mrf.mxu0 }
 0x75f   :  { %v4780_v19 = vadd.f32 %v4772_v39, %v4764_v29  ;;  %v4663_v61 = vadd.f32 %v9505_v23, %v4583_v16  ;;  %v4587_v24 = vadd.f32 %v4586_v9, %v10193_v25  ;;  %v4757_v38 = vmul.f32 %v4662_v37, %v10195_v27  ;;  %v10205_v29 = vld [vmem:[#allocation80_spill] sm:$0xff]  ;;  %v10208_v37 = vld [vmem:[#allocation3_spill] sm:$0xff]  ;;  %v10210_v25 = vld [vmem:[#allocation50_spill] sm:$0xff] }
 0x760   :  { %v4588_v32 = vpop.f32.mrf.mxu1  ;;  %v4391_v53 = vadd.f32 %v9532_v22, %v10204_v31  ;;  %v4504_v3 = vadd.f32 %v4503_v5, %v10205_v29  ;;  %v4714_v9 = vmul.f32 %v4689_v28, %v10208_v37  ;;  %v4737_v28 = vadd.f32 %v9566_v33, %v4721_v55  ;;  %v10225_v37 = vld [vmem:[#allocation70_spill] sm:$0xff] }
 0x761   :  { %v4773_v51 = vmul.f32 %v4663_v61, %v10196_v10  ;;  %v4668_v7 = vadd.f32 %v9502_v50, %v4587_v24  ;;  %v4589_v2 = vadd.f32 %v4588_v32, %v10197_v20  ;;  %v4788_v43 = vadd.f32 %v4780_v19, %v10198_v1  ;;  %v10212_v32 = vld [vmem:[#allocation2_spill] sm:$0xff]  ;;  %v10214_v20 = vld [vmem:[#allocation64_spill] sm:$0xff] }
 0x762   :  { %v4765_v13 = vadd.f32 %v4757_v38, %v4749_v60  ;;  %v4592_v48 = vpop.f32.mrf.mxu1  ;;  %v10206_v60 = vld [vmem:[#allocation19_spill] sm:$0xff]  ;;  %v4752_v38 = vadd.f32 %v9559_v4, %v4736_v11  ;;  %v4706_v5 = vmul.f32 %v4688_v49, %v10212_v32  ;;  %v4694_v59 = vadd.f32 %v9470_v46, %v4391_v53  ;;  %v10217_v46 = vld [vmem:[#allocation46_spill] sm:$0xff]  ;;  %v10222_v53 = vld [vmem:[#allocation20_spill] sm:$0xff] }
 0x763   :  { %v4758_v54 = vmul.f32 %v4668_v7, %v10201_v44  ;;  %v4669_v36 = vadd.f32 %v9505_v23, %v4589_v2  ;;  %v4593_v45 = vadd.f32 %v4592_v48, %v10202_v62  ;;  %v4796_v42 = vadd.f32 %v4788_v43, %v10203_v56  ;;  %v10215_v43 = vld [vmem:[#allocation41_spill] sm:$0xff]  ;;  %v10216_v4 = vld [vmem:[#allocation23_spill] sm:$0xff]  ;;  %v10218_v48 = vld [vmem:[#allocation36_spill] sm:$0xff] }
 0x764   :  { %v4781_v39 = vadd.f32 %v4773_v51, %v4765_v13  ;;  %v4594_v15 = vpop.f32.mrf.mxu1  ;;  %v4722_v12 = vadd.f32 %v4714_v9, %v4706_v5  ;;  %v4715_v11 = vmul.f32 %v4695_v58, %v10216_v4  ;;  %v10220_v62 = vld [vmem:[#allocation26_spill] sm:$0xff]  ;;  %v4696_v56 = vadd.f32 %v9479_v47, %v4504_v3  ;;  %v10226_v58 = vld [vmem:[#allocation25_spill] sm:$0xff] }
 0x765   :  { %v4766_v0 = vadd.f32 %v4758_v54, %v4750_v14  ;;  %v4774_v16 = vmul.f32 %v4669_v36, %v10206_v60  ;;  %v4674_v57 = vadd.f32 %v9502_v50, %v4593_v45  ;;  %v4595_v6 = vadd.f32 %v4594_v15, %v10207_v40  ;;  %5418 = vmatprep.mubr.f32.mxu0 %v4796_v42  ;;  %v10219_v54 = vld [vmem:[#allocation66_spill] sm:$0xff]  ;;  %v10224_v60 = vld [vmem:[#allocation53_spill] sm:$0xff] }
 0x766   :  { %v4789_v19 = vadd.f32 %v4781_v39, %v10209_v18  ;;  %v4598_v22 = vpop.f32.mrf.mxu1  ;;  %v4707_v45 = vmul.f32 %v4694_v59, %v10220_v62  ;;  %v10221_v42 = vld [vmem:[#allocation82_spill] sm:$0xff]  ;;  %v10223_v39 = vld [vmem:[#allocation16_spill] sm:$0xff]  ;;  %v4753_v40 = vadd.f32 %v9578_v26, %v4737_v28  ;;  %v10231_v59 = vld [vmem:[#allocation77_spill] sm:$0xff] }
 0x767   :  { %v4782_v61 = vadd.f32 %v4774_v16, %v4766_v0  ;;  %v4759_v24 = vmul.f32 %v4674_v57, %v10210_v25  ;;  %v4675_v14 = vadd.f32 %v9505_v23, %v4595_v6  ;;  %v4599_v27 = vadd.f32 %v4598_v22, %v10211_v35  ;;  %v10230_v35 = vld [vmem:[#allocation4_spill] sm:$0xff]  ;;  %v10240_v62 = vld [vmem:[#allocation14_spill] sm:$0xff] }
 0x768   :  { %v4797_v10 = vadd.f32 %v4789_v19, %v10213_v21  ;;  %v4600_v51 = vpop.f32.mrf.mxu1  ;;  %v4506_v33 = vadd.f32 %v4505_v17, %v10221_v42  ;;  %v4738_v6 = vadd.f32 %v4730_v34, %v4722_v12  ;;  %v4723_v55 = vadd.f32 %v4715_v11, %v4707_v45  ;;  %v10227_v19 = vld [vmem:[#allocation74_spill] sm:$0xff]  ;;  %v10236_v12 = vld [vmem:[#allocation27_spill] sm:$0xff] }
 0x769   :  { %v4767_v7 = vadd.f32 %v4759_v24, %v9563_v41  ;;  %v4775_v2 = vmul.f32 %v4675_v14, %v10214_v20  ;;  %v4680_v1 = vadd.f32 %v9502_v50, %v4599_v27  ;;  %v4601_v8 = vadd.f32 %v4600_v51, %v10215_v43  ;;  %v10229_v24 = vld [vmem:[#allocation9_spill] sm:$0xff]  ;;  %v10233_v20 = vld [vmem:[#allocation38_spill] sm:$0xff]  ;;  %v10237_v11 = vld [vmem:[#allocation43_spill] sm:$0xff] }
 0x76a   :  { %5419 = vmatmul.mubr.f32.vlgmr.msra.gmra.mxu0 %v4797_v10  ;;  %v4604_v49 = vpop.f32.mrf.mxu1  ;;  %v4790_v52 = vadd.f32 %v4782_v61, %v10217_v46  ;;  %v10228_v61 = vld [vmem:[#allocation39_spill] sm:$0xff]  ;;  %v4746_v14 = vmul.f32 %v4691_v63, %v10229_v24  ;;  %v4731_v27 = vmul.f32 %v4696_v56, %v10230_v35  ;;  %v10232_v10 = vld [vmem:[#allocation18_spill] sm:$0xff] }
 0x76b   :  { %v4783_v13 = vadd.f32 %v4775_v2, %v4767_v7  ;;  %v4760_v44 = vmul.f32 %v4680_v1, %v10218_v48  ;;  %v4681_v41 = vadd.f32 %v9505_v23, %v4601_v8  ;;  %v4605_v36 = vadd.f32 %v4604_v49, %v10219_v54  ;;  %v10234_v1 = vld [vmem:[#allocation15_spill] sm:$0xff]  ;;  %v10238_v48 = vld [vmem:[#allocation28_spill] sm:$0xff]  ;;  %v10239_v54 = vld [vmem:[#allocation81_spill] sm:$0xff] }
 0x76c   :  { %v4606_v31 = vpop.f32.mrf.mxu1  ;;  %v4798_v29 = vadd.f32 %v4790_v52, %v10222_v53  ;;  %v4754_v17 = vadd.f32 %v4746_v14, %v4738_v6  ;;  %v4739_v7 = vadd.f32 %v4731_v27, %v4723_v55  ;;  %v10235_v8 = vld [vmem:[#allocation79_spill] sm:$0xff]  ;;  %v10246_v55 = vld [vmem:[#allocation33_spill] sm:$0xff] }
 0x76d   :  { %v4791_v15 = vadd.f32 %v4783_v13, %v10223_v39  ;;  %v4768_v0 = vadd.f32 %v4760_v44, %v4752_v38  ;;  %v4776_v16 = vmul.f32 %v4681_v41, %v10224_v60  ;;  %v4686_v57 = vadd.f32 %v9502_v50, %v4605_v36 }
 0x76e   :  { %v4607_v9 = vadd.f32 %v4606_v31, %v10225_v37  ;;  %5421 = vmatprep.mubr.f32.mxu0 %v4798_v29  ;;  %v4610_v47 = vpop.f32.mrf.mxu1  ;;  %v4697_v38 = vadd.f32 %v9487_v30, %v4506_v33  ;;  %v10241_v33 = vld [vmem:[#allocation10_spill] sm:$0xff]  ;;  %v10242_v29 = vld [vmem:[#allocation13_spill] sm:$0xff] }
 0x76f   :  { %v4784_v3 = vadd.f32 %v4776_v16, %v4768_v0  ;;  %v4761_v18 = vmul.f32 %v4686_v57, %v10226_v58  ;;  %v4611_v22 = vadd.f32 %v4610_v47, %v10227_v19  ;;  %v4799_v25 = vadd.f32 %v4791_v15, %v10228_v61  ;;  %v10243_v0 = vld [vmem:[#allocation17_spill] sm:$0xff]  ;;  %v10244_v16 = vld [vmem:[#allocation68_spill] sm:$0xff]  ;;  %v4941_v58 = vld [vmem:[%s9723_s17 + $0x8] sm:$0xff] }
 0x770   :  { %v4687_v26 = vadd.f32 %v9505_v23, %v4607_v9  ;;  %v4612_v34 = vpop.f32.mrf.mxu1  ;;  %v4747_v49 = vmul.f32 %v4697_v38, %v10237_v11  ;;  %v10247_v9 = vld [vmem:[#allocation44_spill] sm:$0xff]  ;;  %v5160_v19 = vld [vmem:[%s9725_s16] ss:$0 sm:$0xff] }
 0x771   :  { %v4769_v32 = vadd.f32 %v4761_v18, %v4753_v40  ;;  %v4692_v5 = vadd.f32 %v9502_v50, %v4611_v22  ;;  %v4613_v21 = vadd.f32 %v4612_v34, %v10231_v59  ;;  %5422 = vmatmul.mubr.f32.gmra.mxu0 %v4799_v25  ;;  %v4792_v51 = vadd.f32 %v4784_v3, %v10232_v10  ;;  %v10245_v40 = vld [vmem:[#allocation45_spill] sm:$0xff]  ;;  %v4942_v3 = vld [vmem:[%s9723_s17 + $0x10] sm:$0xff]  ;;  %v4940_v18 = vld [vmem:[%s9723_s17] sm:$0xff] }
 0x772   :  { %v4777_v2 = vmul.f32 %v4687_v26, %v10233_v20  ;;  %v4616_v63 = vpop.f32.mrf.mxu1  ;;  %v4755_v56 = vadd.f32 %v4747_v49, %v4739_v7 }
 0x773   :  { %v4762_v43 = vmul.f32 %v4692_v5, %v10234_v1  ;;  %v4693_v30 = vadd.f32 %v9505_v23, %v4613_v21  ;;  %v4617_v28 = vadd.f32 %v4616_v63, %v10235_v8  ;;  %v4800_v4 = vadd.f32 %v4792_v51, %v10236_v12  ;;  %v5161_v8 = vld [vmem:[%s9726_s18] ss:$0 sm:$0xff] }
 0x774   :  { %v4785_v46 = vadd.f32 %v4777_v2, %v4769_v32  ;;  %v4618_v52 = vpop.f32.mrf.mxu1 }
 0x775   :  { %v4770_v13 = vadd.f32 %v4762_v43, %v4754_v17  ;;  %v4778_v44 = vmul.f32 %v4693_v30, %v10238_v48  ;;  %v4698_v41 = vadd.f32 %v9502_v50, %v4617_v28  ;;  %v4619_v36 = vadd.f32 %v4618_v52, %v10239_v54  ;;  %5424 = vmatprep.mubr.f32.mxu0 %v4800_v4 }
 0x776   :  { %v4793_v45 = vadd.f32 %v4785_v46, %v10240_v62 }
 0x777   :  { %v4786_v42 = vadd.f32 %v4778_v44, %v4770_v13  ;;  %v4763_v31 = vmul.f32 %v4698_v41, %v10241_v33  ;;  %v4699_v53 = vadd.f32 %v9505_v23, %v4619_v36  ;;  %v4943_v23 = vld [vmem:[%s9723_s17 + $0x18] sm:$0xff] }
 0x778   :  { %v4801_v39 = vadd.f32 %v4793_v45, %v10242_v29  ;;  %5454 = vmatprep.subr.mxu1 %v4943_v23 }
 0x779   :  { %v4771_v15 = vadd.f32 %v4763_v31, %v4755_v56  ;;  %v4779_v60 = vmul.f32 %v4699_v53, %v10243_v0  ;;  %v4794_v57 = vadd.f32 %v4786_v42, %v10244_v16  ;;  %5455 = vmatpush3.msra.mxu1 %v4943_v23 }
 0x77a   :  { %5425 = vmatmul.mubr.f32.gmra.mxu0 %v4801_v39  ;;  %5456 = vmatprep.subr.mxu1 %v4942_v3 }
 0x77b   :  { %v4787_v50 = vadd.f32 %v4779_v60, %v4771_v15  ;;  %v4802_v6 = vadd.f32 %v4794_v57, %v10245_v40  ;;  %5457 = vmatpush3.msra.mxu1 %v4942_v3 }
 0x77c   :  { %5458 = vmatprep.subr.mxu1 %v4941_v58 }
 0x77d   :  { %v4795_v37 = vadd.f32 %v4787_v50, %v10246_v55  ;;  %5427 = vmatprep.mubr.f32.mxu0 %v4802_v6  ;;  %5459 = vmatpush3.msra.mxu1 %v4941_v58 }
 0x77e   :  { %5460 = vmatprep.subr.mxu1 %v4940_v18 }
 0x77f   :  { %v4803_v47 = vadd.f32 %v4795_v37, %v10247_v9  ;;  %5461 = vmatpush3.msra.mxu1 %v4940_v18 }
 0x781   :  { %5428 = vmatmul.mubr.f32.gmra.mxu0 %v4803_v47 }
 0x82a   :  { %v5420_v22 = vpop.f32.mrf.mxu0 }
 0x82b   :  { %v4899_v61 = vadd.f32 %v5420_v22, %v5160_v19 }
 0x82c   :  { %v4893_v25 = vpop.f32.mrf.mxu0 }
 0x82d   :  { %v4894_v24 = vadd.f32 %v5160_v19, %v4893_v25  ;;  %v4933_v35 = vmax.f32 %v4899_v61, 0.0 }
 0x82f   :  { %v4932_v14 = vmax.f32 %v4894_v24, 0.0 }
 0x831   :  { %5462 = vmatprep.mubr.f32.mxu1 %v4932_v14  ;;  %v5423_v27 = vpop.f32.mrf.mxu0 }
 0x832   :  { %5463 = vmatmul.mubr.f32.vlgmr.msra.gmra.mxu1 %v4933_v35  ;;  %v4909_v38 = vadd.f32 %v5423_v27, %v5160_v19 }
 0x833   :  { %v4903_v26 = vpop.f32.mrf.mxu0 }
 0x834   :  { %v4904_v34 = vadd.f32 %v5160_v19, %v4903_v26  ;;  %v4935_v5 = vmax.f32 %v4909_v38, 0.0 }
 0x836   :  { %v4934_v32 = vmax.f32 %v4904_v34, 0.0 }
 0x838   :  { %5465 = vmatprep.mubr.f32.mxu1 %v4934_v32 }
 0x839   :  { %5466 = vmatmul.mubr.f32.gmra.mxu1 %v4935_v5 }
 0x83a   :  { %v5426_v59 = vpop.f32.mrf.mxu0 }
 0x83b   :  { %v4919_v21 = vadd.f32 %v5426_v59, %v5160_v19 }
 0x83c   :  { %v4913_v10 = vpop.f32.mrf.mxu0 }
 0x83d   :  { %v4914_v51 = vadd.f32 %v5160_v19, %v4913_v10  ;;  %v4937_v7 = vmax.f32 %v4919_v21, 0.0 }
 0x83f   :  { %v4936_v17 = vmax.f32 %v4914_v51, 0.0 }
 0x841   :  { %5468 = vmatprep.mubr.f32.mxu1 %v4936_v17  ;;  %v5429_v20 = vpop.f32.mrf.mxu0 }
 0x842   :  { %5469 = vmatmul.mubr.f32.gmra.mxu1 %v4937_v7  ;;  %v4929_v2 = vadd.f32 %v5429_v20, %v5160_v19 }
 0x843   :  { %v4923_v63 = vpop.f32.mrf.mxu0 }
 0x844   :  { %v4924_v1 = vadd.f32 %v5160_v19, %v4923_v63  ;;  %v4939_v30 = vmax.f32 %v4929_v2, 0.0 }
 0x846   :  { %v4938_v43 = vmax.f32 %v4924_v1, 0.0 }
 0x848   :  { %5471 = vmatprep.mubr.f32.mxu1 %v4938_v43 }
 0x849   :  { %5472 = vmatmul.mubr.f32.gmra.mxu1 %v4939_v30 }
 0x8f2   :  { %v5464_v28 = vpop.f32.mrf.mxu1 }
 0x8f3   :  { %v5035_v12 = vadd.f32 %v5464_v28, %v5161_v8 }
 0x8f4   :  { %v5029_v4 = vpop.f32.mrf.mxu1 }
 0x8f5   :  { %5069 = vst [vmem:[%s9727_s19 + $0x8] sm:$0xff] %v5035_v12  ;;  %v5030_v11 = vadd.f32 %v5161_v8, %v5029_v4 }
 0x8f7   :  { %5068 = vst [vmem:[%s9727_s19] sm:$0xff] %v5030_v11 }
 0x8f9   :  { %v5467_v49 = vpop.f32.mrf.mxu1 }
 0x8fa   :  { %v5045_v46 = vadd.f32 %v5467_v49, %v5161_v8 }
 0x8fb   :  { %v5039_v52 = vpop.f32.mrf.mxu1 }
 0x8fc   :  { %5071 = vst [vmem:[%s9727_s19 + $0x18] sm:$0xff] %v5045_v46  ;;  %v5040_v13 = vadd.f32 %v5161_v8, %v5039_v52 }
 0x8fe   :  { %5070 = vst [vmem:[%s9727_s19 + $0x10] sm:$0xff] %v5040_v13 }
 0x902   :  { %v5470_v48 = vpop.f32.mrf.mxu1 }
 0x903   :  { %v5055_v44 = vadd.f32 %v5470_v48, %v5161_v8 }
 0x904   :  { %v5049_v41 = vpop.f32.mrf.mxu1 }
 0x905   :  { %5073 = vst [vmem:[%s9727_s19 + $0x28] sm:$0xff] %v5055_v44  ;;  %v5050_v54 = vadd.f32 %v5161_v8, %v5049_v41 }
 0x907   :  { %5072 = vst [vmem:[%s9727_s19 + $0x20] sm:$0xff] %v5050_v54 }
 0x909   :  { %v5473_v36 = vpop.f32.mrf.mxu1 }
 0x90a   :  { %v5065_v62 = vadd.f32 %v5473_v36, %v5161_v8 }
 0x90b   :  { %v5059_v45 = vpop.f32.mrf.mxu1 }
 0x90c   :  { %5075 = vst [vmem:[%s9727_s19 + $0x38] sm:$0xff] %v5065_v62  ;;  %v5060_v56 = vadd.f32 %v5161_v8, %v5059_v45 }
 0x90e   :  { %5074 = vst [vmem:[%s9727_s19 + $0x30] sm:$0xff] %v5060_v56 }

</bundles_post_ra>
